<compile_context>
chip_gen: v6e
topology: v6e:2x2x1
jax: 0.10.0
libtpu: 0.0.40
codegen_flags: <defaults>
</compile_context>

<pallas_src>
import functools

import jax
import jax.numpy as jnp
from jax import lax
from jax.experimental import pallas as pl
from jax.experimental.pallas import tpu as pltpu

_EPS = 1e-5


# --------------------------------------------------------------------------------------
# kernels
# --------------------------------------------------------------------------------------
def _accum_stats(y, s_ref, ss_ref):
    """Accumulate per-channel sum / sum-of-squares across the (arbitrary) grid axis."""
    @pl.when(pl.program_id(0) == 0)
    def _init():
        s_ref[...] = jnp.zeros_like(s_ref)
        ss_ref[...] = jnp.zeros_like(ss_ref)

    s_ref[...] += jnp.sum(y, axis=0, keepdims=True)
    ss_ref[...] += jnp.sum(y * y, axis=0, keepdims=True)


def _conv1x1_stats_kernel(x_ref, w_ref, y_ref, s_ref, ss_ref):
    # x_ref: (R, Cin) f32 rows of the flattened NHWC input, w_ref: (Cin, Cout) bf16.
    y = jnp.dot(x_ref[...].astype(jnp.bfloat16), w_ref[...],
                preferred_element_type=jnp.float32)
    y_ref[...] = y
    _accum_stats(y, s_ref, ss_ref)


def _bn_relu_conv1x1_stats_kernel(x_ref, sc_ref, sh_ref, w_ref, y_ref, s_ref, ss_ref):
    # Apply previous BN (folded to per-channel scale/shift) + ReLU, then 1x1 conv.
    x = jnp.maximum(x_ref[...] * sc_ref[...] + sh_ref[...], 0.0)
    y = jnp.dot(x.astype(jnp.bfloat16), w_ref[...],
                preferred_element_type=jnp.float32)
    y_ref[...] = y
    _accum_stats(y, s_ref, ss_ref)


def _bn_relu_conv3x3_stats_kernel(x_ref, sc_ref, sh_ref, w_ref, y_ref, s_ref, ss_ref,
                                  *, H, W):
    # x_ref: (H*W, C) rows of ONE image (one grid step per image).
    # BN1 + ReLU fused, 1-px zero halo built in-kernel, 3x3 conv as a single
    # im2col matmul with K = 9*C (single MXU push instead of 9 tiny K=C dots).
    # TODO(synk): for real H*W, tile H with a one-row halo instead of whole images.
    C = x_ref.shape[-1]
    x = jnp.maximum(x_ref[...] * sc_ref[...] + sh_ref[...], 0.0)      # (H*W, C)
    x = x.reshape(H, W, C)
    zw = jnp.zeros((H, 1, C), jnp.float32)
    x = jnp.concatenate([zw, x, zw], axis=1)                          # pad W
    zh = jnp.zeros((1, W + 2, C), jnp.float32)
    x = jnp.concatenate([zh, x, zh], axis=0)                          # pad H -> (H+2, W+2, C)
    taps = [x[kh:kh + H, kw:kw + W, :] for kh in range(3) for kw in range(3)]
    patches = jnp.concatenate(taps, axis=-1).reshape(H * W, 9 * C)    # im2col
    y = jnp.dot(patches.astype(jnp.bfloat16), w_ref[...],
                preferred_element_type=jnp.float32)
    y_ref[...] = y
    _accum_stats(y, s_ref, ss_ref)


def _bn_add_relu_kernel(y_ref, sc_ref, sh_ref, short_ref, o_ref):
    # Lane-dense epilogue: every ref is a (rows, W*C) slab (last dim multiple of 128),
    # so loads/stores are full unmasked vst/vld.
    y = y_ref[...] * sc_ref[...] + sh_ref[...]
    o_ref[...] = jnp.maximum(y + short_ref[...], 0.0)


# --------------------------------------------------------------------------------------
# wrapper
# --------------------------------------------------------------------------------------
def _fold_bn(s, ss, gamma, beta, count):
    """Fold batch-statistics BN into a per-channel affine y*scale + shift (O(C) work)."""
    mean = s / count
    var = ss / count - mean * mean
    scale = gamma.reshape(1, -1) * lax.rsqrt(var + _EPS)
    shift = beta.reshape(1, -1) - mean * scale
    return scale, shift


def bottleneck_forward(x_nchw, w1, g1, b1, w2, g2, b2, w3, g3, b3):
    """Bottleneck.forward, default (stride-1, identity-shortcut) configuration.

    x_nchw : (N, Ci, H, W) f32
    w1     : (Ci, Cm) 1x1 conv weight (cin, cout)
    w2     : (3, 3, Cm, Cm) 3x3 conv weight (kh, kw, cin, cout)
    w3     : (Cm, Ci) 1x1 conv weight (cin, cout)
    g*/b*  : BatchNorm gamma/beta per stage.
    """
    N, Ci, H, W = x_nchw.shape
    Cm = w1.shape[1]
    Co = w3.shape[1]
    assert Co == Ci, "identity shortcut requires inplanes == planes * expansion"
    NHW = N * H * W
    R = H * W                                    # rows per grid step (one image per step)
    f32 = jnp.float32

    x_nhwc = jnp.transpose(x_nchw, (0, 2, 3, 1))          # (N, H, W, Ci)
    x_flat = x_nhwc.reshape(NHW, Ci)

    w1_b = w1.astype(jnp.bfloat16)                         # (Ci, Cm)
    w2_b = w2.reshape(9 * Cm, Cm).astype(jnp.bfloat16)     # (kh, kw, cin) flattened -> K=9*Cm
    w3_b = w3.astype(jnp.bfloat16)                         # (Cm, Co)

    # The grid axis carries the BN-statistics accumulation -> must be "arbitrary".
    acc_params = pltpu.CompilerParams(
        dimension_semantics=("arbitrary",), vmem_limit_bytes=32 * 1024 * 1024)

    def _stats_out(c):
        return (pl.BlockSpec((1, c), lambda i: (0, 0)),
                pl.BlockSpec((1, c), lambda i: (0, 0)))

    def _stats_shape(c):
        return (jax.ShapeDtypeStruct((1, c), f32), jax.ShapeDtypeStruct((1, c), f32))

    # ---- pass 1: conv1 (1x1) + BN1 statistics ------------------------------------
    t1, s1, ss1 = pl.pallas_call(
        _conv1x1_stats_kernel,
        grid=(N,),
        in_specs=[pl.BlockSpec((R, Ci), lambda i: (i, 0)),
                  pl.BlockSpec((Ci, Cm), lambda i: (0, 0))],
        out_specs=(pl.BlockSpec((R, Cm), lambda i: (i, 0)),) + _stats_out(Cm),
        out_shape=(jax.ShapeDtypeStruct((NHW, Cm), f32),) + _stats_shape(Cm),
        compiler_params=acc_params,
    )(x_flat, w1_b)
    sc1, sh1 = _fold_bn(s1, ss1, g1, b1, NHW)

    # ---- pass 2: BN1 + ReLU, conv2 (3x3 via single im2col matmul) + BN2 stats ----
    t2, s2, ss2 = pl.pallas_call(
        functools.partial(_bn_relu_conv3x3_stats_kernel, H=H, W=W),
        grid=(N,),
        in_specs=[pl.BlockSpec((R, Cm), lambda i: (i, 0)),
                  pl.BlockSpec((1, Cm), lambda i: (0, 0)),
                  pl.BlockSpec((1, Cm), lambda i: (0, 0)),
                  pl.BlockSpec((9 * Cm, Cm), lambda i: (0, 0))],
        out_specs=(pl.BlockSpec((R, Cm), lambda i: (i, 0)),) + _stats_out(Cm),
        out_shape=(jax.ShapeDtypeStruct((NHW, Cm), f32),) + _stats_shape(Cm),
        compiler_params=acc_params,
    )(t1, sc1, sh1, w2_b)
    sc2, sh2 = _fold_bn(s2, ss2, g2, b2, NHW)

    # ---- pass 3: BN2 + ReLU, conv3 (1x1) + BN3 statistics -------------------------
    t3, s3, ss3 = pl.pallas_call(
        _bn_relu_conv1x1_stats_kernel,
        grid=(N,),
        in_specs=[pl.BlockSpec((R, Cm), lambda i: (i, 0)),
                  pl.BlockSpec((1, Cm), lambda i: (0, 0)),
                  pl.BlockSpec((1, Cm), lambda i: (0, 0)),
                  pl.BlockSpec((Cm, Co), lambda i: (0, 0))],
        out_specs=(pl.BlockSpec((R, Co), lambda i: (i, 0)),) + _stats_out(Co),
        out_shape=(jax.ShapeDtypeStruct((NHW, Co), f32),) + _stats_shape(Co),
        compiler_params=acc_params,
    )(t2, sc2, sh2, w3_b)
    sc3, sh3 = _fold_bn(s3, ss3, g3, b3, NHW)

    # ---- pass 4: BN3 + identity shortcut + ReLU, lane-dense (rows, W*C) layout ----
    t3_ld = t3.reshape(N * H, W * Co)            # contiguous HBM reshape (free)
    short_ld = x_nhwc.reshape(N * H, W * Ci)     # shortcut in the same lane-dense layout
    sc3_ld = jnp.tile(sc3, (1, W))               # per-lane scale/shift, (1, W*Co)
    sh3_ld = jnp.tile(sh3, (1, W))
    out_ld = pl.pallas_call(
        _bn_add_relu_kernel,
        grid=(N,),
        in_specs=[pl.BlockSpec((H, W * Co), lambda i: (i, 0)),
                  pl.BlockSpec((1, W * Co), lambda i: (0, 0)),
                  pl.BlockSpec((1, W * Co), lambda i: (0, 0)),
                  pl.BlockSpec((H, W * Co), lambda i: (i, 0))],
        out_specs=pl.BlockSpec((H, W * Co), lambda i: (i, 0)),
        out_shape=jax.ShapeDtypeStruct((N * H, W * Co), f32),
        compiler_params=pltpu.CompilerParams(
            dimension_semantics=("parallel",), vmem_limit_bytes=32 * 1024 * 1024),
    )(t3_ld, sc3_ld, sh3_ld, short_ld)

    return jnp.transpose(out_ld.reshape(N, H, W, Co), (0, 3, 1, 2))


# --------------------------------------------------------------------------------------
# pure-JAX reference (NCHW, batch-stat BN, bf16-rounded conv operands like the kernel)
# --------------------------------------------------------------------------------------
def _round_bf16(a):
    return a.astype(jnp.bfloat16).astype(jnp.float32)


def _reference(x, w1, g1, b1, w2, g2, b2, w3, g3, b3):
    def bn(y, g, b):
        mean = jnp.mean(y, axis=(0, 2, 3), keepdims=True)
        var = jnp.mean((y - mean) ** 2, axis=(0, 2, 3), keepdims=True)
        y = (y - mean) * lax.rsqrt(var + _EPS)
        return y * g[None, :, None, None] + b[None, :, None, None]

    def conv(y, w_oihw, pad):
        return lax.conv_general_dilated(
            _round_bf16(y), _round_bf16(w_oihw), (1, 1), ((pad, pad), (pad, pad)),
            dimension_numbers=("NCHW", "OIHW", "NCHW"),
            preferred_element_type=jnp.float32)

    w1_o = jnp.transpose(w1, (1, 0))[:, :, None, None]
    w2_o = jnp.transpose(w2, (3, 2, 0, 1))
    w3_o = jnp.transpose(w3, (1, 0))[:, :, None, None]

    y = jax.nn.relu(bn(conv(x, w1_o, 0), g1, b1))
    y = jax.nn.relu(bn(conv(y, w2_o, 1), g2, b2))
    y = bn(conv(y, w3_o, 0), g3, b3)
    return jax.nn.relu(y + x)


# --------------------------------------------------------------------------------------
if __name__ == "__main__":
    # Bottleneck(inplanes=16, planes=4, stride=1, downsample=None):
    #   width = first_planes = 4, outplanes = 16 -> identity shortcut, ReLU, BatchNorm2d.
    N, H, W = 2, 16, 16
    planes = 4
    width = planes                 # base_width=64, cardinality=1, reduce_first=1
    inplanes = planes * 4          # == outplanes, so downsample is None

    key = jax.random.PRNGKey(0)
    ks = jax.random.split(key, 10)
    x = jax.random.normal(ks[0], (N, inplanes, H, W), jnp.float32)
    w1 = 0.1 * jax.random.normal(ks[1], (inplanes, width), jnp.float32)      # conv1 1x1 (cin, cout)
    w2 = 0.1 * jax.random.normal(ks[2], (3, 3, width, width), jnp.float32)   # conv2 3x3 (kh, kw, cin, cout)
    w3 = 0.1 * jax.random.normal(ks[3], (width, inplanes), jnp.float32)      # conv3 1x1 (cin, cout)
    g1 = 1.0 + 0.1 * jax.random.normal(ks[4], (width,), jnp.float32)
    b1 = 0.1 * jax.random.normal(ks[5], (width,), jnp.float32)
    g2 = 1.0 + 0.1 * jax.random.normal(ks[6], (width,), jnp.float32)
    b2 = 0.1 * jax.random.normal(ks[7], (width,), jnp.float32)
    g3 = 1.0 + 0.1 * jax.random.normal(ks[8], (inplanes,), jnp.float32)
    b3 = 0.1 * jax.random.normal(ks[9], (inplanes,), jnp.float32)

    out = jax.jit(bottleneck_forward)(x, w1, g1, b1, w2, g2, b2, w3, g3, b3)
    jax.block_until_ready(out)

    ref = _reference(x, w1, g1, b1, w2, g2, b2, w3, g3, b3)
    assert out.shape == (N, inplanes, H, W), out.shape
    err = float(jnp.max(jnp.abs(out - ref)))
    # bf16 MXU operands (f32 accumulation) vs a bf16-rounded f32 reference.
    assert err < 2e-2, err
    print("KERNEL_OK")
</pallas_src>

<mosaic_0001>
module attributes {stable_mosaic.version = 11 : i64} {
  func.func @_conv1x1_stats_kernel(%arg0: i32, %arg1: memref<256x16xf32, #tpu.memory_space<vmem>>, %arg2: memref<16x4xbf16, #tpu.memory_space<vmem>>, %arg3: memref<256x4xf32, #tpu.memory_space<vmem>>, %arg4: memref<1x4xf32, #tpu.memory_space<vmem>>, %arg5: memref<1x4xf32, #tpu.memory_space<vmem>>) attributes {dimension_semantics = [#tpu.dimension_semantics<arbitrary>], iteration_bounds = array<i64: 2>, scalar_prefetch = 0 : i64, scratch_operands = 0 : i64, tpu.core_type = #tpu.core_type<tc>, window_params = [{transform_indices = @transform_0, window_bounds = array<i64: 256, 16>}, {pipeline_mode = #tpu.pipeline_mode<synchronous>, transform_indices = @transform_1, window_bounds = array<i64: 16, 4>}, {transform_indices = @transform_2, window_bounds = array<i64: 256, 4>}, {pipeline_mode = #tpu.pipeline_mode<synchronous>, transform_indices = @transform_3, window_bounds = array<i64: 1, 4>}, {pipeline_mode = #tpu.pipeline_mode<synchronous>, transform_indices = @transform_4, window_bounds = array<i64: 1, 4>}]} {
    %c0 = arith.constant 0 : index
    %c0_0 = arith.constant 0 : index
    %0 = vector.load %arg1[%c0, %c0_0] : memref<256x16xf32, #tpu.memory_space<vmem>>, vector<256x16xf32>
    %1 = arith.truncf %0 : vector<256x16xf32> to vector<256x16xbf16>
    %c0_1 = arith.constant 0 : index
    %c0_2 = arith.constant 0 : index
    %2 = vector.load %arg2[%c0_1, %c0_2] : memref<16x4xbf16, #tpu.memory_space<vmem>>, vector<16x4xbf16>
    %cst = arith.constant dense<0.000000e+00> : vector<256x4xf32>
    %3 = tpu.matmul %1, %2, %cst {dimension_numbers = #tpu.dot_dimension_numbers<[1], [0], [0], [1], [0, 0, 1, 1], [], []>} : vector<256x16xbf16>, vector<16x4xbf16>, vector<256x4xf32> -> vector<256x4xf32>
    %c0_3 = arith.constant 0 : index
    %c0_4 = arith.constant 0 : index
    %4 = vector.load %arg3[%c0_3, %c0_4] : memref<256x4xf32, #tpu.memory_space<vmem>>, vector<256x4xf32>
    tpu.vector_store %arg3[%c0_3, %c0_4], %3 {strides = array<i32>} : memref<256x4xf32, #tpu.memory_space<vmem>>, vector<256x4xf32>,
    %c0_i32 = arith.constant 0 : i32
    %5 = arith.cmpi eq, %arg0, %c0_i32 : i32
    %6 = arith.extui %5 : i1 to i32
    %c0_i32_5 = arith.constant 0 : i32
    %7 = arith.cmpi ne, %6, %c0_i32_5 : i32
    scf.if %7 {
      %cst_16 = arith.constant 0.000000e+00 : f32
      %19 = vector.broadcast %cst_16 : f32 to vector<1x4xf32>
      %c0_17 = arith.constant 0 : index
      %c0_18 = arith.constant 0 : index
      %20 = vector.load %arg4[%c0_17, %c0_18] : memref<1x4xf32, #tpu.memory_space<vmem>>, vector<1x4xf32>
      tpu.vector_store %arg4[%c0_17, %c0_18], %19 {strides = array<i32>} : memref<1x4xf32, #tpu.memory_space<vmem>>, vector<1x4xf32>,
      %cst_19 = arith.constant 0.000000e+00 : f32
      %21 = vector.broadcast %cst_19 : f32 to vector<1x4xf32>
      %c0_20 = arith.constant 0 : index
      %c0_21 = arith.constant 0 : index
      %22 = vector.load %arg5[%c0_20, %c0_21] : memref<1x4xf32, #tpu.memory_space<vmem>>, vector<1x4xf32>
      tpu.vector_store %arg5[%c0_20, %c0_21], %21 {strides = array<i32>} : memref<1x4xf32, #tpu.memory_space<vmem>>, vector<1x4xf32>,
    } else {
    }
    %c0_6 = arith.constant 0 : index
    %c0_7 = arith.constant 0 : index
    %8 = vector.load %arg4[%c0_6, %c0_7] : memref<1x4xf32, #tpu.memory_space<vmem>>, vector<1x4xf32>
    %cst_8 = arith.constant dense<0.000000e+00> : vector<4xf32>
    %9 = vector.multi_reduction <add>, %3, %cst_8 [0] : vector<256x4xf32> to vector<4xf32>
    %10 = vector.shape_cast %9 : vector<4xf32> to vector<1x4xf32>
    %11 = arith.addf %8, %10 : vector<1x4xf32>
    %c0_9 = arith.constant 0 : index
    %c0_10 = arith.constant 0 : index
    %12 = vector.load %arg4[%c0_9, %c0_10] : memref<1x4xf32, #tpu.memory_space<vmem>>, vector<1x4xf32>
    tpu.vector_store %arg4[%c0_9, %c0_10], %11 {strides = array<i32>} : memref<1x4xf32, #tpu.memory_space<vmem>>, vector<1x4xf32>,
    %c0_11 = arith.constant 0 : index
    %c0_12 = arith.constant 0 : index
    %13 = vector.load %arg5[%c0_11, %c0_12] : memref<1x4xf32, #tpu.memory_space<vmem>>, vector<1x4xf32>
    %14 = arith.mulf %3, %3 : vector<256x4xf32>
    %cst_13 = arith.constant dense<0.000000e+00> : vector<4xf32>
    %15 = vector.multi_reduction <add>, %14, %cst_13 [0] : vector<256x4xf32> to vector<4xf32>
    %16 = vector.shape_cast %15 : vector<4xf32> to vector<1x4xf32>
    %17 = arith.addf %13, %16 : vector<1x4xf32>
    %c0_14 = arith.constant 0 : index
    %c0_15 = arith.constant 0 : index
    %18 = vector.load %arg5[%c0_14, %c0_15] : memref<1x4xf32, #tpu.memory_space<vmem>>, vector<1x4xf32>
    tpu.vector_store %arg5[%c0_14, %c0_15], %17 {strides = array<i32>} : memref<1x4xf32, #tpu.memory_space<vmem>>, vector<1x4xf32>,
    return
  }
  func.func @transform_0(%arg0: i32) -> (i32, i32) {
    %c0_i32 = arith.constant 0 : i32
    %c0_i32_0 = arith.constant 0 : i32
    return %arg0, %c0_i32 : i32, i32
  }
  func.func @transform_1(%arg0: i32) -> (i32, i32) {
    %c0_i32 = arith.constant 0 : i32
    %c0_i32_0 = arith.constant 0 : i32
    %c0_i32_1 = arith.constant 0 : i32
    return %c0_i32, %c0_i32_0 : i32, i32
  }
  func.func @transform_2(%arg0: i32) -> (i32, i32) {
    %c0_i32 = arith.constant 0 : i32
    %c0_i32_0 = arith.constant 0 : i32
    return %arg0, %c0_i32 : i32, i32
  }
  func.func @transform_3(%arg0: i32) -> (i32, i32) {
    %c0_i32 = arith.constant 0 : i32
    %c0_i32_0 = arith.constant 0 : i32
    %c0_i32_1 = arith.constant 0 : i32
    return %c0_i32, %c0_i32_0 : i32, i32
  }
  func.func @transform_4(%arg0: i32) -> (i32, i32) {
    %c0_i32 = arith.constant 0 : i32
    %c0_i32_0 = arith.constant 0 : i32
    %c0_i32_1 = arith.constant 0 : i32
    return %c0_i32, %c0_i32_0 : i32, i32
  }
}

module attributes {stable_mosaic.version = 11 : i64} {
  func.func @_bn_relu_conv3x3_stats_kernel(%arg0: i32, %arg1: memref<256x4xf32, #tpu.memory_space<vmem>>, %arg2: memref<1x4xf32, #tpu.memory_space<vmem>>, %arg3: memref<1x4xf32, #tpu.memory_space<vmem>>, %arg4: memref<36x4xbf16, #tpu.memory_space<vmem>>, %arg5: memref<256x4xf32, #tpu.memory_space<vmem>>, %arg6: memref<1x4xf32, #tpu.memory_space<vmem>>, %arg7: memref<1x4xf32, #tpu.memory_space<vmem>>) attributes {dimension_semantics = [#tpu.dimension_semantics<arbitrary>], iteration_bounds = array<i64: 2>, scalar_prefetch = 0 : i64, scratch_operands = 0 : i64, tpu.core_type = #tpu.core_type<tc>, window_params = [{transform_indices = @transform_0, window_bounds = array<i64: 256, 4>}, {pipeline_mode = #tpu.pipeline_mode<synchronous>, transform_indices = @transform_1, window_bounds = array<i64: 1, 4>}, {pipeline_mode = #tpu.pipeline_mode<synchronous>, transform_indices = @transform_2, window_bounds = array<i64: 1, 4>}, {pipeline_mode = #tpu.pipeline_mode<synchronous>, transform_indices = @transform_3, window_bounds = array<i64: 36, 4>}, {transform_indices = @transform_4, window_bounds = array<i64: 256, 4>}, {pipeline_mode = #tpu.pipeline_mode<synchronous>, transform_indices = @transform_5, window_bounds = array<i64: 1, 4>}, {pipeline_mode = #tpu.pipeline_mode<synchronous>, transform_indices = @transform_6, window_bounds = array<i64: 1, 4>}]} {
    %c0 = arith.constant 0 : index
    %c0_0 = arith.constant 0 : index
    %0 = vector.load %arg1[%c0, %c0_0] : memref<256x4xf32, #tpu.memory_space<vmem>>, vector<256x4xf32>
    %c0_1 = arith.constant 0 : index
    %c0_2 = arith.constant 0 : index
    %1 = vector.load %arg2[%c0_1, %c0_2] : memref<1x4xf32, #tpu.memory_space<vmem>>, vector<1x4xf32>
    %2 = vector.broadcast %1 : vector<1x4xf32> to vector<256x4xf32>
    %3 = arith.mulf %0, %2 : vector<256x4xf32>
    %c0_3 = arith.constant 0 : index
    %c0_4 = arith.constant 0 : index
    %4 = vector.load %arg3[%c0_3, %c0_4] : memref<1x4xf32, #tpu.memory_space<vmem>>, vector<1x4xf32>
    %5 = vector.broadcast %4 : vector<1x4xf32> to vector<256x4xf32>
    %6 = arith.addf %3, %5 : vector<256x4xf32>
    %cst = arith.constant 0.000000e+00 : f32
    %7 = vector.broadcast %cst : f32 to vector<256x4xf32>
    %8 = arith.maximumf %6, %7 : vector<256x4xf32>
    %9 = vector.shape_cast %8 : vector<256x4xf32> to vector<16x16x4xf32>
    %cst_5 = arith.constant 0.000000e+00 : f32
    %10 = vector.broadcast %cst_5 : f32 to vector<16x1x4xf32>
    %11 = tpu.concatenate %10, %9, %10 in 1 : vector<16x1x4xf32>, vector<16x16x4xf32>, vector<16x1x4xf32> -> vector<16x18x4xf32>
    %cst_6 = arith.constant 0.000000e+00 : f32
    %12 = vector.broadcast %cst_6 : f32 to vector<1x18x4xf32>
    %13 = tpu.concatenate %12, %11, %12 in 0 : vector<1x18x4xf32>, vector<16x18x4xf32>, vector<1x18x4xf32> -> vector<18x18x4xf32>
    %14 = vector.extract_strided_slice %13 {offsets = [0, 0, 0], sizes = [16, 16, 4], strides = [1, 1, 1]} : vector<18x18x4xf32> to vector<16x16x4xf32>
    %15 = vector.extract_strided_slice %13 {offsets = [0, 1, 0], sizes = [16, 16, 4], strides = [1, 1, 1]} : vector<18x18x4xf32> to vector<16x16x4xf32>
    %16 = vector.extract_strided_slice %13 {offsets = [0, 2, 0], sizes = [16, 16, 4], strides = [1, 1, 1]} : vector<18x18x4xf32> to vector<16x16x4xf32>
    %17 = vector.extract_strided_slice %13 {offsets = [1, 0, 0], sizes = [16, 16, 4], strides = [1, 1, 1]} : vector<18x18x4xf32> to vector<16x16x4xf32>
    %18 = vector.extract_strided_slice %13 {offsets = [1, 1, 0], sizes = [16, 16, 4], strides = [1, 1, 1]} : vector<18x18x4xf32> to vector<16x16x4xf32>
    %19 = vector.extract_strided_slice %13 {offsets = [1, 2, 0], sizes = [16, 16, 4], strides = [1, 1, 1]} : vector<18x18x4xf32> to vector<16x16x4xf32>
    %20 = vector.extract_strided_slice %13 {offsets = [2, 0, 0], sizes = [16, 16, 4], strides = [1, 1, 1]} : vector<18x18x4xf32> to vector<16x16x4xf32>
    %21 = vector.extract_strided_slice %13 {offsets = [2, 1, 0], sizes = [16, 16, 4], strides = [1, 1, 1]} : vector<18x18x4xf32> to vector<16x16x4xf32>
    %22 = vector.extract_strided_slice %13 {offsets = [2, 2, 0], sizes = [16, 16, 4], strides = [1, 1, 1]} : vector<18x18x4xf32> to vector<16x16x4xf32>
    %23 = tpu.concatenate %14, %15, %16, %17, %18, %19, %20, %21, %22 in 2 : vector<16x16x4xf32>, vector<16x16x4xf32>, vector<16x16x4xf32>, vector<16x16x4xf32>, vector<16x16x4xf32>, vector<16x16x4xf32>, vector<16x16x4xf32>, vector<16x16x4xf32>, vector<16x16x4xf32> -> vector<16x16x36xf32>
    %24 = vector.shape_cast %23 : vector<16x16x36xf32> to vector<256x36xf32>
    %25 = arith.truncf %24 : vector<256x36xf32> to vector<256x36xbf16>
    %c0_7 = arith.constant 0 : index
    %c0_8 = arith.constant 0 : index
    %26 = vector.load %arg4[%c0_7, %c0_8] : memref<36x4xbf16, #tpu.memory_space<vmem>>, vector<36x4xbf16>
    %cst_9 = arith.constant dense<0.000000e+00> : vector<256x4xf32>
    %27 = tpu.matmul %25, %26, %cst_9 {dimension_numbers = #tpu.dot_dimension_numbers<[1], [0], [0], [1], [0, 0, 1, 1], [], []>} : vector<256x36xbf16>, vector<36x4xbf16>, vector<256x4xf32> -> vector<256x4xf32>
    %c0_10 = arith.constant 0 : index
    %c0_11 = arith.constant 0 : index
    %28 = vector.load %arg5[%c0_10, %c0_11] : memref<256x4xf32, #tpu.memory_space<vmem>>, vector<256x4xf32>
    tpu.vector_store %arg5[%c0_10, %c0_11], %27 {strides = array<i32>} : memref<256x4xf32, #tpu.memory_space<vmem>>, vector<256x4xf32>,
    %c0_i32 = arith.constant 0 : i32
    %29 = arith.cmpi eq, %arg0, %c0_i32 : i32
    %30 = arith.extui %29 : i1 to i32
    %c0_i32_12 = arith.constant 0 : i32
    %31 = arith.cmpi ne, %30, %c0_i32_12 : i32
    scf.if %31 {
      %cst_23 = arith.constant 0.000000e+00 : f32
      %43 = vector.broadcast %cst_23 : f32 to vector<1x4xf32>
      %c0_24 = arith.constant 0 : index
      %c0_25 = arith.constant 0 : index
      %44 = vector.load %arg6[%c0_24, %c0_25] : memref<1x4xf32, #tpu.memory_space<vmem>>, vector<1x4xf32>
      tpu.vector_store %arg6[%c0_24, %c0_25], %43 {strides = array<i32>} : memref<1x4xf32, #tpu.memory_space<vmem>>, vector<1x4xf32>,
      %cst_26 = arith.constant 0.000000e+00 : f32
      %45 = vector.broadcast %cst_26 : f32 to vector<1x4xf32>
      %c0_27 = arith.constant 0 : index
      %c0_28 = arith.constant 0 : index
      %46 = vector.load %arg7[%c0_27, %c0_28] : memref<1x4xf32, #tpu.memory_space<vmem>>, vector<1x4xf32>
      tpu.vector_store %arg7[%c0_27, %c0_28], %45 {strides = array<i32>} : memref<1x4xf32, #tpu.memory_space<vmem>>, vector<1x4xf32>,
    } else {
    }
    %c0_13 = arith.constant 0 : index
    %c0_14 = arith.constant 0 : index
    %32 = vector.load %arg6[%c0_13, %c0_14] : memref<1x4xf32, #tpu.memory_space<vmem>>, vector<1x4xf32>
    %cst_15 = arith.constant dense<0.000000e+00> : vector<4xf32>
    %33 = vector.multi_reduction <add>, %27, %cst_15 [0] : vector<256x4xf32> to vector<4xf32>
    %34 = vector.shape_cast %33 : vector<4xf32> to vector<1x4xf32>
    %35 = arith.addf %32, %34 : vector<1x4xf32>
    %c0_16 = arith.constant 0 : index
    %c0_17 = arith.constant 0 : index
    %36 = vector.load %arg6[%c0_16, %c0_17] : memref<1x4xf32, #tpu.memory_space<vmem>>, vector<1x4xf32>
    tpu.vector_store %arg6[%c0_16, %c0_17], %35 {strides = array<i32>} : memref<1x4xf32, #tpu.memory_space<vmem>>, vector<1x4xf32>,
    %c0_18 = arith.constant 0 : index
    %c0_19 = arith.constant 0 : index
    %37 = vector.load %arg7[%c0_18, %c0_19] : memref<1x4xf32, #tpu.memory_space<vmem>>, vector<1x4xf32>
    %38 = arith.mulf %27, %27 : vector<256x4xf32>
    %cst_20 = arith.constant dense<0.000000e+00> : vector<4xf32>
    %39 = vector.multi_reduction <add>, %38, %cst_20 [0] : vector<256x4xf32> to vector<4xf32>
    %40 = vector.shape_cast %39 : vector<4xf32> to vector<1x4xf32>
    %41 = arith.addf %37, %40 : vector<1x4xf32>
    %c0_21 = arith.constant 0 : index
    %c0_22 = arith.constant 0 : index
    %42 = vector.load %arg7[%c0_21, %c0_22] : memref<1x4xf32, #tpu.memory_space<vmem>>, vector<1x4xf32>
    tpu.vector_store %arg7[%c0_21, %c0_22], %41 {strides = array<i32>} : memref<1x4xf32, #tpu.memory_space<vmem>>, vector<1x4xf32>,
    return
  }
  func.func @transform_0(%arg0: i32) -> (i32, i32) {
    %c0_i32 = arith.constant 0 : i32
    %c0_i32_0 = arith.constant 0 : i32
    return %arg0, %c0_i32 : i32, i32
  }
  func.func @transform_1(%arg0: i32) -> (i32, i32) {
    %c0_i32 = arith.constant 0 : i32
    %c0_i32_0 = arith.constant 0 : i32
    %c0_i32_1 = arith.constant 0 : i32
    return %c0_i32, %c0_i32_0 : i32, i32
  }
  func.func @transform_2(%arg0: i32) -> (i32, i32) {
    %c0_i32 = arith.constant 0 : i32
    %c0_i32_0 = arith.constant 0 : i32
    %c0_i32_1 = arith.constant 0 : i32
    return %c0_i32, %c0_i32_0 : i32, i32
  }
  func.func @transform_3(%arg0: i32) -> (i32, i32) {
    %c0_i32 = arith.constant 0 : i32
    %c0_i32_0 = arith.constant 0 : i32
    %c0_i32_1 = arith.constant 0 : i32
    return %c0_i32, %c0_i32_0 : i32, i32
  }
  func.func @transform_4(%arg0: i32) -> (i32, i32) {
    %c0_i32 = arith.constant 0 : i32
    %c0_i32_0 = arith.constant 0 : i32
    return %arg0, %c0_i32 : i32, i32
  }
  func.func @transform_5(%arg0: i32) -> (i32, i32) {
    %c0_i32 = arith.constant 0 : i32
    %c0_i32_0 = arith.constant 0 : i32
    %c0_i32_1 = arith.constant 0 : i32
    return %c0_i32, %c0_i32_0 : i32, i32
  }
  func.func @transform_6(%arg0: i32) -> (i32, i32) {
    %c0_i32 = arith.constant 0 : i32
    %c0_i32_0 = arith.constant 0 : i32
    %c0_i32_1 = arith.constant 0 : i32
    return %c0_i32, %c0_i32_0 : i32, i32
  }
}

module attributes {stable_mosaic.version = 11 : i64} {
  func.func @_bn_relu_conv1x1_stats_kernel(%arg0: i32, %arg1: memref<256x4xf32, #tpu.memory_space<vmem>>, %arg2: memref<1x4xf32, #tpu.memory_space<vmem>>, %arg3: memref<1x4xf32, #tpu.memory_space<vmem>>, %arg4: memref<4x16xbf16, #tpu.memory_space<vmem>>, %arg5: memref<256x16xf32, #tpu.memory_space<vmem>>, %arg6: memref<1x16xf32, #tpu.memory_space<vmem>>, %arg7: memref<1x16xf32, #tpu.memory_space<vmem>>) attributes {dimension_semantics = [#tpu.dimension_semantics<arbitrary>], iteration_bounds = array<i64: 2>, scalar_prefetch = 0 : i64, scratch_operands = 0 : i64, tpu.core_type = #tpu.core_type<tc>, window_params = [{transform_indices = @transform_0, window_bounds = array<i64: 256, 4>}, {pipeline_mode = #tpu.pipeline_mode<synchronous>, transform_indices = @transform_1, window_bounds = array<i64: 1, 4>}, {pipeline_mode = #tpu.pipeline_mode<synchronous>, transform_indices = @transform_2, window_bounds = array<i64: 1, 4>}, {pipeline_mode = #tpu.pipeline_mode<synchronous>, transform_indices = @transform_3, window_bounds = array<i64: 4, 16>}, {transform_indices = @transform_4, window_bounds = array<i64: 256, 16>}, {pipeline_mode = #tpu.pipeline_mode<synchronous>, transform_indices = @transform_5, window_bounds = array<i64: 1, 16>}, {pipeline_mode = #tpu.pipeline_mode<synchronous>, transform_indices = @transform_6, window_bounds = array<i64: 1, 16>}]} {
    %c0 = arith.constant 0 : index
    %c0_0 = arith.constant 0 : index
    %0 = vector.load %arg1[%c0, %c0_0] : memref<256x4xf32, #tpu.memory_space<vmem>>, vector<256x4xf32>
    %c0_1 = arith.constant 0 : index
    %c0_2 = arith.constant 0 : index
    %1 = vector.load %arg2[%c0_1, %c0_2] : memref<1x4xf32, #tpu.memory_space<vmem>>, vector<1x4xf32>
    %2 = vector.broadcast %1 : vector<1x4xf32> to vector<256x4xf32>
    %3 = arith.mulf %0, %2 : vector<256x4xf32>
    %c0_3 = arith.constant 0 : index
    %c0_4 = arith.constant 0 : index
    %4 = vector.load %arg3[%c0_3, %c0_4] : memref<1x4xf32, #tpu.memory_space<vmem>>, vector<1x4xf32>
    %5 = vector.broadcast %4 : vector<1x4xf32> to vector<256x4xf32>
    %6 = arith.addf %3, %5 : vector<256x4xf32>
    %cst = arith.constant 0.000000e+00 : f32
    %7 = vector.broadcast %cst : f32 to vector<256x4xf32>
    %8 = arith.maximumf %6, %7 : vector<256x4xf32>
    %9 = arith.truncf %8 : vector<256x4xf32> to vector<256x4xbf16>
    %c0_5 = arith.constant 0 : index
    %c0_6 = arith.constant 0 : index
    %10 = vector.load %arg4[%c0_5, %c0_6] : memref<4x16xbf16, #tpu.memory_space<vmem>>, vector<4x16xbf16>
    %cst_7 = arith.constant dense<0.000000e+00> : vector<256x16xf32>
    %11 = tpu.matmul %9, %10, %cst_7 {dimension_numbers = #tpu.dot_dimension_numbers<[1], [0], [0], [1], [0, 0, 1, 1], [], []>} : vector<256x4xbf16>, vector<4x16xbf16>, vector<256x16xf32> -> vector<256x16xf32>
    %c0_8 = arith.constant 0 : index
    %c0_9 = arith.constant 0 : index
    %12 = vector.load %arg5[%c0_8, %c0_9] : memref<256x16xf32, #tpu.memory_space<vmem>>, vector<256x16xf32>
    tpu.vector_store %arg5[%c0_8, %c0_9], %11 {strides = array<i32>} : memref<256x16xf32, #tpu.memory_space<vmem>>, vector<256x16xf32>,
    %c0_i32 = arith.constant 0 : i32
    %13 = arith.cmpi eq, %arg0, %c0_i32 : i32
    %14 = arith.extui %13 : i1 to i32
    %c0_i32_10 = arith.constant 0 : i32
    %15 = arith.cmpi ne, %14, %c0_i32_10 : i32
    scf.if %15 {
      %cst_21 = arith.constant 0.000000e+00 : f32
      %27 = vector.broadcast %cst_21 : f32 to vector<1x16xf32>
      %c0_22 = arith.constant 0 : index
      %c0_23 = arith.constant 0 : index
      %28 = vector.load %arg6[%c0_22, %c0_23] : memref<1x16xf32, #tpu.memory_space<vmem>>, vector<1x16xf32>
      tpu.vector_store %arg6[%c0_22, %c0_23], %27 {strides = array<i32>} : memref<1x16xf32, #tpu.memory_space<vmem>>, vector<1x16xf32>,
      %cst_24 = arith.constant 0.000000e+00 : f32
      %29 = vector.broadcast %cst_24 : f32 to vector<1x16xf32>
      %c0_25 = arith.constant 0 : index
      %c0_26 = arith.constant 0 : index
      %30 = vector.load %arg7[%c0_25, %c0_26] : memref<1x16xf32, #tpu.memory_space<vmem>>, vector<1x16xf32>
      tpu.vector_store %arg7[%c0_25, %c0_26], %29 {strides = array<i32>} : memref<1x16xf32, #tpu.memory_space<vmem>>, vector<1x16xf32>,
    } else {
    }
    %c0_11 = arith.constant 0 : index
    %c0_12 = arith.constant 0 : index
    %16 = vector.load %arg6[%c0_11, %c0_12] : memref<1x16xf32, #tpu.memory_space<vmem>>, vector<1x16xf32>
    %cst_13 = arith.constant dense<0.000000e+00> : vector<16xf32>
    %17 = vector.multi_reduction <add>, %11, %cst_13 [0] : vector<256x16xf32> to vector<16xf32>
    %18 = vector.shape_cast %17 : vector<16xf32> to vector<1x16xf32>
    %19 = arith.addf %16, %18 : vector<1x16xf32>
    %c0_14 = arith.constant 0 : index
    %c0_15 = arith.constant 0 : index
    %20 = vector.load %arg6[%c0_14, %c0_15] : memref<1x16xf32, #tpu.memory_space<vmem>>, vector<1x16xf32>
    tpu.vector_store %arg6[%c0_14, %c0_15], %19 {strides = array<i32>} : memref<1x16xf32, #tpu.memory_space<vmem>>, vector<1x16xf32>,
    %c0_16 = arith.constant 0 : index
    %c0_17 = arith.constant 0 : index
    %21 = vector.load %arg7[%c0_16, %c0_17] : memref<1x16xf32, #tpu.memory_space<vmem>>, vector<1x16xf32>
    %22 = arith.mulf %11, %11 : vector<256x16xf32>
    %cst_18 = arith.constant dense<0.000000e+00> : vector<16xf32>
    %23 = vector.multi_reduction <add>, %22, %cst_18 [0] : vector<256x16xf32> to vector<16xf32>
    %24 = vector.shape_cast %23 : vector<16xf32> to vector<1x16xf32>
    %25 = arith.addf %21, %24 : vector<1x16xf32>
    %c0_19 = arith.constant 0 : index
    %c0_20 = arith.constant 0 : index
    %26 = vector.load %arg7[%c0_19, %c0_20] : memref<1x16xf32, #tpu.memory_space<vmem>>, vector<1x16xf32>
    tpu.vector_store %arg7[%c0_19, %c0_20], %25 {strides = array<i32>} : memref<1x16xf32, #tpu.memory_space<vmem>>, vector<1x16xf32>,
    return
  }
  func.func @transform_0(%arg0: i32) -> (i32, i32) {
    %c0_i32 = arith.constant 0 : i32
    %c0_i32_0 = arith.constant 0 : i32
    return %arg0, %c0_i32 : i32, i32
  }
  func.func @transform_1(%arg0: i32) -> (i32, i32) {
    %c0_i32 = arith.constant 0 : i32
    %c0_i32_0 = arith.constant 0 : i32
    %c0_i32_1 = arith.constant 0 : i32
    return %c0_i32, %c0_i32_0 : i32, i32
  }
  func.func @transform_2(%arg0: i32) -> (i32, i32) {
    %c0_i32 = arith.constant 0 : i32
    %c0_i32_0 = arith.constant 0 : i32
    %c0_i32_1 = arith.constant 0 : i32
    return %c0_i32, %c0_i32_0 : i32, i32
  }
  func.func @transform_3(%arg0: i32) -> (i32, i32) {
    %c0_i32 = arith.constant 0 : i32
    %c0_i32_0 = arith.constant 0 : i32
    %c0_i32_1 = arith.constant 0 : i32
    return %c0_i32, %c0_i32_0 : i32, i32
  }
  func.func @transform_4(%arg0: i32) -> (i32, i32) {
    %c0_i32 = arith.constant 0 : i32
    %c0_i32_0 = arith.constant 0 : i32
    return %arg0, %c0_i32 : i32, i32
  }
  func.func @transform_5(%arg0: i32) -> (i32, i32) {
    %c0_i32 = arith.constant 0 : i32
    %c0_i32_0 = arith.constant 0 : i32
    %c0_i32_1 = arith.constant 0 : i32
    return %c0_i32, %c0_i32_0 : i32, i32
  }
  func.func @transform_6(%arg0: i32) -> (i32, i32) {
    %c0_i32 = arith.constant 0 : i32
    %c0_i32_0 = arith.constant 0 : i32
    %c0_i32_1 = arith.constant 0 : i32
    return %c0_i32, %c0_i32_0 : i32, i32
  }
}

module attributes {stable_mosaic.version = 11 : i64} {
  func.func @_bn_add_relu_kernel(%arg0: i32, %arg1: memref<16x256xf32, #tpu.memory_space<vmem>>, %arg2: memref<1x256xf32, #tpu.memory_space<vmem>>, %arg3: memref<1x256xf32, #tpu.memory_space<vmem>>, %arg4: memref<16x256xf32, #tpu.memory_space<vmem>>, %arg5: memref<16x256xf32, #tpu.memory_space<vmem>>) attributes {dimension_semantics = [#tpu.dimension_semantics<parallel>], iteration_bounds = array<i64: 2>, scalar_prefetch = 0 : i64, scratch_operands = 0 : i64, tpu.core_type = #tpu.core_type<tc>, window_params = [{transform_indices = @transform_0, window_bounds = array<i64: 16, 256>}, {pipeline_mode = #tpu.pipeline_mode<synchronous>, transform_indices = @transform_1, window_bounds = array<i64: 1, 256>}, {pipeline_mode = #tpu.pipeline_mode<synchronous>, transform_indices = @transform_2, window_bounds = array<i64: 1, 256>}, {transform_indices = @transform_3, window_bounds = array<i64: 16, 256>}, {transform_indices = @transform_4, window_bounds = array<i64: 16, 256>}]} {
    %c0 = arith.constant 0 : index
    %c0_0 = arith.constant 0 : index
    %0 = vector.load %arg1[%c0, %c0_0] : memref<16x256xf32, #tpu.memory_space<vmem>>, vector<16x256xf32>
    %c0_1 = arith.constant 0 : index
    %c0_2 = arith.constant 0 : index
    %1 = vector.load %arg2[%c0_1, %c0_2] : memref<1x256xf32, #tpu.memory_space<vmem>>, vector<1x256xf32>
    %2 = vector.broadcast %1 : vector<1x256xf32> to vector<16x256xf32>
    %3 = arith.mulf %0, %2 : vector<16x256xf32>
    %c0_3 = arith.constant 0 : index
    %c0_4 = arith.constant 0 : index
    %4 = vector.load %arg3[%c0_3, %c0_4] : memref<1x256xf32, #tpu.memory_space<vmem>>, vector<1x256xf32>
    %5 = vector.broadcast %4 : vector<1x256xf32> to vector<16x256xf32>
    %6 = arith.addf %3, %5 : vector<16x256xf32>
    %c0_5 = arith.constant 0 : index
    %c0_6 = arith.constant 0 : index
    %7 = vector.load %arg4[%c0_5, %c0_6] : memref<16x256xf32, #tpu.memory_space<vmem>>, vector<16x256xf32>
    %8 = arith.addf %6, %7 : vector<16x256xf32>
    %cst = arith.constant 0.000000e+00 : f32
    %9 = vector.broadcast %cst : f32 to vector<16x256xf32>
    %10 = arith.maximumf %8, %9 : vector<16x256xf32>
    %c0_7 = arith.constant 0 : index
    %c0_8 = arith.constant 0 : index
    %11 = vector.load %arg5[%c0_7, %c0_8] : memref<16x256xf32, #tpu.memory_space<vmem>>, vector<16x256xf32>
    tpu.vector_store %arg5[%c0_7, %c0_8], %10 {strides = array<i32>} : memref<16x256xf32, #tpu.memory_space<vmem>>, vector<16x256xf32>,
    return
  }
  func.func @transform_0(%arg0: i32) -> (i32, i32) {
    %c0_i32 = arith.constant 0 : i32
    %c0_i32_0 = arith.constant 0 : i32
    return %arg0, %c0_i32 : i32, i32
  }
  func.func @transform_1(%arg0: i32) -> (i32, i32) {
    %c0_i32 = arith.constant 0 : i32
    %c0_i32_0 = arith.constant 0 : i32
    %c0_i32_1 = arith.constant 0 : i32
    return %c0_i32, %c0_i32_0 : i32, i32
  }
  func.func @transform_2(%arg0: i32) -> (i32, i32) {
    %c0_i32 = arith.constant 0 : i32
    %c0_i32_0 = arith.constant 0 : i32
    %c0_i32_1 = arith.constant 0 : i32
    return %c0_i32, %c0_i32_0 : i32, i32
  }
  func.func @transform_3(%arg0: i32) -> (i32, i32) {
    %c0_i32 = arith.constant 0 : i32
    %c0_i32_0 = arith.constant 0 : i32
    return %arg0, %c0_i32 : i32, i32
  }
  func.func @transform_4(%arg0: i32) -> (i32, i32) {
    %c0_i32 = arith.constant 0 : i32
    %c0_i32_0 = arith.constant 0 : i32
    return %arg0, %c0_i32 : i32, i32
  }
}

</mosaic_0001>

<bundles_post_ra>
// kernel: bottleneck_forward.4
= control target key start
LH: loop header
LB: loop body
LE: loop exit
PB: predicated region body
PF: predicated region fallthrough
CT: control target
= control target key end

     0   :  { %s874_s15 = smov 0   ;;  %s1297_s0 = inlined_call_operand.vmem [shape: f32[512,16], index: 0, kind: input, shape index: {}]   ;;  %s1298_s1 = inlined_call_operand.vmem [shape: bf16[16,4], index: 1, kind: input, shape index: {}]   ;;  %s1299_s2 = inlined_call_operand.vmem [shape: f32[512,4], index: 2, kind: output, shape index: {0}]   ;;  %s1300_s3 = inlined_call_operand.vmem [shape: f32[1,4], index: 3, kind: output, shape index: {1}]   ;;  %s1301_s4 = inlined_call_operand.vmem [shape: f32[1,4], index: 4, kind: output, shape index: {2}]  }
   0x1 LB: > { %s748_s16 = sadd.s32 4294967295, %s846_s15   ;;  %p752_p0 = scmp.ge.s32.totalorder %s846_s15, 1  ;;  %s846_s15 = sphi %s874_s15, %s15_s15  }
   0x2   : > { %p158_p1 = scmp.lt.s32.totalorder %s846_s15, 3 }
   0x4   : > { %p159_p2 = pnand %p752_p0, %p158_p1 }
   0x5   : > { %s753_s19 = sshll.u32 (!%p159_p2), %s748_s16, 5  ;;  %p774_p4 = scmp.ne.s32.totalorder (!%p159_p2), %s748_s16, 0 }
   0x6   : > { %162 = sbr.rel (%p159_p2) target bundleno = 328 (0x148), region = 28  ;;  %p185_p3 = scmp.lt.s32.totalorder (!%p159_p2), %s753_s19, 63 }
   0xb   : > { %v839_v0 = vld [vmem:[%s1298_s1] sm:$0xff]   ;;  %s1303_s19 = smov (!%p185_p3, %s753_s19), 63  ;;  %vm253_vm0 = vcmask 130048   ;;  %vm463_vm1 = vcmask 31744  }
   0xc   : > { %794 = vmatprep.subr.bf16.mxu0 %v839_v0  ;;  %828 = vmatprep.subr.bf16.mxu1 %v839_v0  ;;  %s754_s20 = sshll.u32 %s1303_s19, 3 }
   0xd   : > { %795 = vmatpush3.bf16.msra.mxu0 %v839_v0  ;;  %829 = vmatpush3.bf16.msra.mxu1 %v839_v0  ;;  %s895_s23 = scalar_lea.vmem %s1297_s0, %s754_s20  ;;  %s950_s26 = scalar_lea.vmem %s1299_s2, %s754_s20 }
   0xe   : > { %v197_v1 = vld [vmem:[%s895_s23] sm:$0xff]  ;;  %v198_v2 = vld [vmem:[%s895_s23 + $0x8] sm:$0xff]  ;;  %v199_v6 = vld [vmem:[%s895_s23 + $0x10] sm:$0xff] }
   0xf   : > { %v213_v3 = vld [vmem:[%s895_s23 + $0x80] sm:$0xff]  ;;  %v229_v4 = vpack.c.bf16 %v198_v2, %v197_v1  ;;  %v214_v5 = vld [vmem:[%s895_s23 + $0x88] sm:$0xff]  ;;  %v200_v7 = vld [vmem:[%s895_s23 + $0x18] sm:$0xff] }
  0x10   : > { %v237_v8 = vpack.c.bf16 %v214_v5, %v213_v3  ;;  %v230_v9 = vpack.c.bf16 %v200_v7, %v199_v6  ;;  %v215_v10 = vld [vmem:[%s895_s23 + $0x90] sm:$0xff]  ;;  %v216_v11 = vld [vmem:[%s895_s23 + $0x98] sm:$0xff]  ;;  %v201_v12 = vld [vmem:[%s895_s23 + $0x20] sm:$0xff] }
  0x11   : > { %796 = vmatprep.mubr.msk.bf16.mxu0 %vm253_vm0, %v229_v4  ;;  %v238_v13 = vpack.c.bf16 %v216_v11, %v215_v10  ;;  %v202_v14 = vld [vmem:[%s895_s23 + $0x28] sm:$0xff]  ;;  %v217_v15 = vld [vmem:[%s895_s23 + $0xa0] sm:$0xff]  ;;  %v203_v19 = vld [vmem:[%s895_s23 + $0x30] sm:$0xff] }
  0x12   : > { %v218_v16 = vld [vmem:[%s895_s23 + $0xa8] sm:$0xff]  ;;  %812 = vmatprep.mubr.msk.bf16.mxu1 %vm253_vm0, %v237_v8  ;;  %797 = vmatmul.mubr.msk.bf16.vlgmr.msra.gmra.mxu0 %vm253_vm0, %v230_v9  ;;  %v231_v17 = vpack.c.bf16 %v202_v14, %v201_v12  ;;  %v204_v20 = vld [vmem:[%s895_s23 + $0x38] sm:$0xff]  ;;  %v219_v21 = vld [vmem:[%s895_s23 + $0xb0] sm:$0xff] }
  0x13   : > { %v239_v18 = vpack.c.bf16 %v218_v16, %v217_v15  ;;  %813 = vmatmul.mubr.msk.bf16.vlgmr.msra.gmra.mxu1 %vm253_vm0, %v238_v13  ;;  %v220_v22 = vld [vmem:[%s895_s23 + $0xb8] sm:$0xff]  ;;  %v205_v23 = vld [vmem:[%s895_s23 + $0x40] sm:$0xff]  ;;  %v206_v24 = vld [vmem:[%s895_s23 + $0x48] sm:$0xff]  ;;  %v232_v27 = vpack.c.bf16 %v204_v20, %v203_v19 }
  0x14   : > { %800 = vmatprep.mubr.msk.bf16.mxu0 %vm253_vm0, %v231_v17  ;;  %v221_v25 = vld [vmem:[%s895_s23 + $0xc0] sm:$0xff]  ;;  %v222_v26 = vld [vmem:[%s895_s23 + $0xc8] sm:$0xff]  ;;  %v240_v28 = vpack.c.bf16 %v220_v22, %v219_v21  ;;  %v233_v29 = vpack.c.bf16 %v206_v24, %v205_v23  ;;  %v207_v31 = vld [vmem:[%s895_s23 + $0x50] sm:$0xff] }
  0x15   : > { %816 = vmatprep.mubr.msk.bf16.mxu1 %vm253_vm0, %v239_v18  ;;  %v241_v30 = vpack.c.bf16 %v222_v26, %v221_v25  ;;  %v208_v32 = vld [vmem:[%s895_s23 + $0x58] sm:$0xff]  ;;  %v223_v33 = vld [vmem:[%s895_s23 + $0xd0] sm:$0xff]  ;;  %v209_v35 = vld [vmem:[%s895_s23 + $0x60] sm:$0xff] }
  0x16   : > { %v224_v34 = vld [vmem:[%s895_s23 + $0xd8] sm:$0xff]  ;;  %v210_v36 = vld [vmem:[%s895_s23 + $0x68] sm:$0xff]  ;;  %v225_v37 = vld [vmem:[%s895_s23 + $0xe0] sm:$0xff]  ;;  %v234_v39 = vpack.c.bf16 %v208_v32, %v207_v31 }
  0x17   : > { %v226_v38 = vld [vmem:[%s895_s23 + $0xe8] sm:$0xff]  ;;  %v242_v40 = vpack.c.bf16 %v224_v34, %v223_v33  ;;  %v235_v41 = vpack.c.bf16 %v210_v36, %v209_v35  ;;  %v211_v43 = vld [vmem:[%s895_s23 + $0x70] sm:$0xff]  ;;  %v212_v44 = vld [vmem:[%s895_s23 + $0x78] sm:$0xff] }
  0x18   : > { %v243_v42 = vpack.c.bf16 %v226_v38, %v225_v37  ;;  %v227_v45 = vld [vmem:[%s895_s23 + $0xf0] sm:$0xff]  ;;  %v228_v46 = vld [vmem:[%s895_s23 + $0xf8] sm:$0xff]  ;;  %v236_v47 = vpack.c.bf16 %v212_v44, %v211_v43 }
  0x19   : > { %v244_v48 = vpack.c.bf16 %v228_v46, %v227_v45 }
  0x1a   : > { %801 = vmatmul.mubr.msk.bf16.gmra.mxu0 %vm253_vm0, %v232_v27 }
  0x1b   : > { %817 = vmatmul.mubr.msk.bf16.gmra.mxu1 %vm253_vm0, %v240_v28  ;;  %804 = vmatprep.mubr.msk.bf16.mxu0 %vm253_vm0, %v233_v29 }
  0x1c   : > { %820 = vmatprep.mubr.msk.bf16.mxu1 %vm253_vm0, %v241_v30 }
  0x22   : > { %805 = vmatmul.mubr.msk.bf16.gmra.mxu0 %vm253_vm0, %v234_v39 }
  0x23   : > { %821 = vmatmul.mubr.msk.bf16.gmra.mxu1 %vm253_vm0, %v242_v40  ;;  %808 = vmatprep.mubr.msk.bf16.mxu0 %vm253_vm0, %v235_v41 }
  0x24   : > { %824 = vmatprep.mubr.msk.bf16.mxu1 %vm253_vm0, %v243_v42 }
  0x2a   : > { %809 = vmatmul.mubr.msk.bf16.gmra.mxu0 %vm253_vm0, %v236_v47 }
  0x2b   : > { %825 = vmatmul.mubr.msk.bf16.gmra.mxu1 %vm253_vm0, %v244_v48 }
  0xd2   : > { %v952_v49 = vpop.f32.mrf.mxu0 }
  0xd3   : > { %466 = vst.msk [vmem:[%s950_s26 + $0x10] sm:$0xff] %vm463_vm1, %v952_v49  ;;  %v957_v50 = vpop.f32.mrf.mxu1 }
  0xd4   : > { %482 = vst.msk [vmem:[%s950_s26 + $0x90] sm:$0xff] %vm463_vm1, %v957_v50  ;;  %v962_v51 = vpop.f32.mrf.mxu0 }
  0xd5   : > { %464 = vst.msk [vmem:[%s950_s26] sm:$0xff] %vm463_vm1, %v962_v51  ;;  %v967_v52 = vpop.f32.mrf.mxu1 }
  0xd6   : > { %480 = vst.msk [vmem:[%s950_s26 + $0x80] sm:$0xff] %vm463_vm1, %v967_v52  ;;  %v972_v53 = vpop.f32.mrf.mxu0 }
  0xd7   : > { %467 = vst.msk [vmem:[%s950_s26 + $0x18] sm:$0xff] %vm463_vm1, %v972_v53  ;;  %v977_v54 = vpop.f32.mrf.mxu1 }
  0xd8   : > { %483 = vst.msk [vmem:[%s950_s26 + $0x98] sm:$0xff] %vm463_vm1, %v977_v54  ;;  %v982_v55 = vpop.f32.mrf.mxu0 }
  0xd9   : > { %465 = vst.msk [vmem:[%s950_s26 + $0x8] sm:$0xff] %vm463_vm1, %v982_v55  ;;  %v987_v56 = vpop.f32.mrf.mxu1 }
  0xda   : > { %481 = vst.msk [vmem:[%s950_s26 + $0x88] sm:$0xff] %vm463_vm1, %v987_v56  ;;  %v992_v57 = vpop.f32.mrf.mxu0 }
  0xdb   : > { %470 = vst.msk [vmem:[%s950_s26 + $0x30] sm:$0xff] %vm463_vm1, %v992_v57  ;;  %v997_v58 = vpop.f32.mrf.mxu1 }
  0xdc   : > { %486 = vst.msk [vmem:[%s950_s26 + $0xb0] sm:$0xff] %vm463_vm1, %v997_v58  ;;  %v1002_v59 = vpop.f32.mrf.mxu0 }
  0xdd   : > { %468 = vst.msk [vmem:[%s950_s26 + $0x20] sm:$0xff] %vm463_vm1, %v1002_v59  ;;  %v1007_v60 = vpop.f32.mrf.mxu1 }
  0xde   : > { %484 = vst.msk [vmem:[%s950_s26 + $0xa0] sm:$0xff] %vm463_vm1, %v1007_v60  ;;  %v1012_v61 = vpop.f32.mrf.mxu0 }
  0xdf   : > { %471 = vst.msk [vmem:[%s950_s26 + $0x38] sm:$0xff] %vm463_vm1, %v1012_v61  ;;  %v1017_v62 = vpop.f32.mrf.mxu1 }
  0xe0   : > { %487 = vst.msk [vmem:[%s950_s26 + $0xb8] sm:$0xff] %vm463_vm1, %v1017_v62  ;;  %v1022_v63 = vpop.f32.mrf.mxu0 }
  0xe1   : > { %469 = vst.msk [vmem:[%s950_s26 + $0x28] sm:$0xff] %vm463_vm1, %v1022_v63  ;;  %v1027_v0 = vpop.f32.mrf.mxu1 }
  0xe2   : > { %485 = vst.msk [vmem:[%s950_s26 + $0xa8] sm:$0xff] %vm463_vm1, %v1027_v0  ;;  %v1032_v1 = vpop.f32.mrf.mxu0 }
  0xe3   : > { %474 = vst.msk [vmem:[%s950_s26 + $0x50] sm:$0xff] %vm463_vm1, %v1032_v1  ;;  %v1037_v2 = vpop.f32.mrf.mxu1 }
  0xe4   : > { %490 = vst.msk [vmem:[%s950_s26 + $0xd0] sm:$0xff] %vm463_vm1, %v1037_v2  ;;  %v1042_v3 = vpop.f32.mrf.mxu0 }
  0xe5   : > { %472 = vst.msk [vmem:[%s950_s26 + $0x40] sm:$0xff] %vm463_vm1, %v1042_v3  ;;  %v1047_v4 = vpop.f32.mrf.mxu1 }
  0xe6   : > { %488 = vst.msk [vmem:[%s950_s26 + $0xc0] sm:$0xff] %vm463_vm1, %v1047_v4  ;;  %v1052_v5 = vpop.f32.mrf.mxu0 }
  0xe7   : > { %475 = vst.msk [vmem:[%s950_s26 + $0x58] sm:$0xff] %vm463_vm1, %v1052_v5  ;;  %v1057_v6 = vpop.f32.mrf.mxu1 }
  0xe8   : > { %491 = vst.msk [vmem:[%s950_s26 + $0xd8] sm:$0xff] %vm463_vm1, %v1057_v6  ;;  %v1062_v7 = vpop.f32.mrf.mxu0 }
  0xe9   : > { %473 = vst.msk [vmem:[%s950_s26 + $0x48] sm:$0xff] %vm463_vm1, %v1062_v7  ;;  %v1067_v8 = vpop.f32.mrf.mxu1 }
  0xea   : > { %489 = vst.msk [vmem:[%s950_s26 + $0xc8] sm:$0xff] %vm463_vm1, %v1067_v8  ;;  %v1072_v9 = vpop.f32.mrf.mxu0 }
  0xeb   : > { %478 = vst.msk [vmem:[%s950_s26 + $0x70] sm:$0xff] %vm463_vm1, %v1072_v9  ;;  %v1077_v10 = vpop.f32.mrf.mxu1 }
  0xec   : > { %494 = vst.msk [vmem:[%s950_s26 + $0xf0] sm:$0xff] %vm463_vm1, %v1077_v10  ;;  %v1082_v11 = vpop.f32.mrf.mxu0 }
  0xed   : > { %476 = vst.msk [vmem:[%s950_s26 + $0x60] sm:$0xff] %vm463_vm1, %v1082_v11  ;;  %v1087_v12 = vpop.f32.mrf.mxu1 }
  0xee   : > { %492 = vst.msk [vmem:[%s950_s26 + $0xe0] sm:$0xff] %vm463_vm1, %v1087_v12  ;;  %v1092_v13 = vpop.f32.mrf.mxu0  ;;  %499 = sbr.rel (%p774_p4) target bundleno = 245 (0xf5), region = 32 }
  0xef   : > { %479 = vst.msk [vmem:[%s950_s26 + $0x78] sm:$0xff] %vm463_vm1, %v1092_v13  ;;  %v1097_v14 = vpop.f32.mrf.mxu1 }
  0xf0   : > { %495 = vst.msk [vmem:[%s950_s26 + $0xf8] sm:$0xff] %vm463_vm1, %v1097_v14  ;;  %v1102_v15 = vpop.f32.mrf.mxu0 }
  0xf1   : > { %477 = vst.msk [vmem:[%s950_s26 + $0x68] sm:$0xff] %vm463_vm1, %v1102_v15  ;;  %v1107_v16 = vpop.f32.mrf.mxu1 }
  0xf2   : > { %493 = vst.msk [vmem:[%s950_s26 + $0xe8] sm:$0xff] %vm463_vm1, %v1107_v16 }
  0xf3   : > { %vm500_vm2 = vcmask 24576   ;;  %v848_v17 = vmov 0.0  }
  0xf4   : > { %501 = vst.msk [vmem:[%s1300_s3] sm:$0x1] %vm500_vm2, %v848_v17  ;;  %502 = vst.msk [vmem:[%s1301_s4] sm:$0x1] %vm500_vm2, %v848_v17 }
  0xf5 PF: > { %v504_v18 = vsel %vm463_vm1, %v962_v51, 0.0  ;;  %v505_v19 = vsel %vm463_vm1, %v982_v55, 0.0  ;;  %v507_v20 = vsel %vm463_vm1, %v952_v49, 0.0  ;;  %v509_v22 = vsel %vm463_vm1, %v972_v53, 0.0 }
  0xf6   : > { %v506_v21 = vadd.f32 %v505_v19, %v504_v18  ;;  %v511_v24 = vsel %vm463_vm1, %v1002_v59, 0.0  ;;  %v513_v26 = vsel %vm463_vm1, %v1022_v63, 0.0  ;;  %v515_v28 = vsel %vm463_vm1, %v992_v57, 0.0 }
  0xf7   : > { %v517_v30 = vsel %vm463_vm1, %v1012_v61, 0.0  ;;  %v519_v32 = vsel %vm463_vm1, %v1042_v3, 0.0  ;;  %v521_v34 = vsel %vm463_vm1, %v1062_v7, 0.0  ;;  %v577_v35 = vmul.f32 %v962_v51, %v962_v51 }
  0xf8   : > { %v508_v23 = vadd.f32 %v507_v20, %v506_v21  ;;  %v578_v36 = vmul.f32 %v982_v55, %v982_v55  ;;  %v579_v38 = vmul.f32 %v952_v49, %v952_v49  ;;  %v523_v39 = vsel %vm463_vm1, %v1032_v1, 0.0 }
  0xf9   : > { %v580_v40 = vmul.f32 %v972_v53, %v972_v53  ;;  %v525_v42 = vsel %vm463_vm1, %v1052_v5, 0.0  ;;  %v581_v43 = vmul.f32 %v1002_v59, %v1002_v59  ;;  %v609_v44 = vsel %vm463_vm1, %v577_v35, 0.0 }
  0xfa   : > { %v510_v25 = vadd.f32 %v509_v22, %v508_v23  ;;  %v610_v45 = vsel %vm463_vm1, %v578_v36, 0.0  ;;  %v612_v48 = vsel %vm463_vm1, %v579_v38, 0.0  ;;  %v527_v49 = vsel %vm463_vm1, %v1082_v11, 0.0 }
  0xfb   : > { %v611_v47 = vadd.f32 %v610_v45, %v609_v44  ;;  %v582_v51 = vmul.f32 %v1022_v63, %v1022_v63  ;;  %v614_v53 = vsel %vm463_vm1, %v580_v40, 0.0  ;;  %v529_v59 = vsel %vm463_vm1, %v1102_v15, 0.0 }
  0xfc   : > { %v512_v27 = vadd.f32 %v511_v24, %v510_v25  ;;  %v583_v18 = vmul.f32 %v992_v57, %v992_v57  ;;  %v616_v19 = vsel %vm463_vm1, %v581_v43, 0.0  ;;  %v531_v22 = vsel %vm463_vm1, %v1072_v9, 0.0 }
  0xfd   : > { %v613_v17 = vadd.f32 %v612_v48, %v611_v47  ;;  %v584_v63 = vmul.f32 %v1012_v61, %v1012_v61  ;;  %v618_v23 = vsel %vm463_vm1, %v582_v51, 0.0  ;;  %v585_v57 = vmul.f32 %v1042_v3, %v1042_v3 }
  0xfe   : > { %v514_v29 = vadd.f32 %v513_v26, %v512_v27  ;;  %v533_v26 = vsel %vm463_vm1, %v1092_v13, 0.0  ;;  %v620_v27 = vsel %vm463_vm1, %v583_v18, 0.0  ;;  %v586_v61 = vmul.f32 %v1062_v7, %v1062_v7 }
  0xff   : > { %v615_v21 = vadd.f32 %v614_v53, %v613_v17  ;;  %v587_v3 = vmul.f32 %v1032_v1, %v1032_v1  ;;  %v624_v35 = vsel %vm463_vm1, %v585_v57, 0.0  ;;  %v539_v38 = vsel %vm463_vm1, %v957_v50, 0.0 }
 0x100   : > { %v516_v31 = vadd.f32 %v515_v28, %v514_v29  ;;  %v588_v7 = vmul.f32 %v1052_v5, %v1052_v5  ;;  %v589_v1 = vmul.f32 %v1082_v11, %v1082_v11  ;;  %v590_v5 = vmul.f32 %v1102_v15, %v1102_v15 }
 0x101   : > { %v617_v25 = vadd.f32 %v616_v19, %v615_v21  ;;  %v628_v43 = vsel %vm463_vm1, %v587_v3, 0.0  ;;  %v545_v51 = vsel %vm463_vm1, %v1027_v0, 0.0  ;;  %v591_v11 = vmul.f32 %v1072_v9, %v1072_v9 }
 0x102   : > { %v518_v33 = vadd.f32 %v517_v30, %v516_v31  ;;  %v535_v30 = vsel %vm463_vm1, %v967_v52, 0.0  ;;  %v622_v31 = vsel %vm463_vm1, %v584_v63, 0.0  ;;  %v630_v47 = vsel %vm463_vm1, %v588_v7, 0.0 }
 0x103   : > { %v619_v29 = vadd.f32 %v618_v23, %v617_v25  ;;  %v632_v53 = vsel %vm463_vm1, %v589_v1, 0.0  ;;  %v592_v15 = vmul.f32 %v1092_v13, %v1092_v13  ;;  %v634_v18 = vsel %vm463_vm1, %v590_v5, 0.0 }
 0x104   : > { %v520_v37 = vadd.f32 %v519_v32, %v518_v33  ;;  %v549_v21 = vsel %vm463_vm1, %v1017_v62, 0.0  ;;  %v593_v9 = vmul.f32 %v967_v52, %v967_v52  ;;  %v594_v13 = vmul.f32 %v987_v56, %v987_v56 }
 0x105   : > { %v621_v33 = vadd.f32 %v620_v27, %v619_v29  ;;  %v638_v25 = vsel %vm463_vm1, %v592_v15, 0.0  ;;  %v553_v27 = vsel %vm463_vm1, %v1067_v8, 0.0  ;;  %v595_v52 = vmul.f32 %v957_v50, %v957_v50 }
 0x106   : > { %v522_v41 = vadd.f32 %v521_v34, %v520_v37  ;;  %v537_v34 = vsel %vm463_vm1, %v987_v56, 0.0  ;;  %v596_v56 = vmul.f32 %v977_v54, %v977_v54  ;;  %v597_v50 = vmul.f32 %v1007_v60, %v1007_v60 }
 0x107   : > { %v623_v37 = vadd.f32 %v622_v31, %v621_v33  ;;  %v642_v31 = vsel %vm463_vm1, %v594_v13, 0.0  ;;  %v644_v3 = vsel %vm463_vm1, %v595_v52, 0.0  ;;  %v565_v5 = vsel %vm463_vm1, %v1097_v14, 0.0 }
 0x108   : > { %v524_v46 = vadd.f32 %v523_v39, %v522_v41  ;;  %v626_v39 = vsel %vm463_vm1, %v586_v61, 0.0  ;;  %v555_v61 = vsel %vm463_vm1, %v1037_v2, 0.0  ;;  %vm574_vm3 = vcmask 24576  }
 0x109   : > { %v625_v41 = vadd.f32 %v624_v35, %v623_v37  ;;  %v559_v37 = vsel %vm463_vm1, %v1087_v12, 0.0 }
 0x10a   : > { %v526_v55 = vadd.f32 %v525_v42, %v524_v46  ;;  %v541_v42 = vsel %vm463_vm1, %v977_v54, 0.0  ;;  %v543_v46 = vsel %vm463_vm1, %v1007_v60, 0.0  ;;  %v598_v54 = vmul.f32 %v1027_v0, %v1027_v0 }
 0x10b   : > { %v627_v45 = vadd.f32 %v626_v39, %v625_v41  ;;  %v599_v60 = vmul.f32 %v997_v58, %v997_v58  ;;  %v648_v41 = vsel %vm463_vm1, %v597_v50, 0.0  ;;  %v600_v0 = vmul.f32 %v1017_v62, %v1017_v62  ;;  %v576_v50 = vld [vmem:[%s1301_s4] sm:$0x1] }
 0x10c   : > { %v528_v20 = vadd.f32 %v527_v49, %v526_v55 }
 0x10d   : > { %v629_v49 = vadd.f32 %v628_v43, %v627_v45  ;;  %v563_v43 = vsel %vm463_vm1, %v1077_v10, 0.0 }
 0x10e   : > { %v530_v24 = vadd.f32 %v529_v59, %v528_v20  ;;  %v547_v59 = vsel %vm463_vm1, %v997_v58, 0.0  ;;  %v601_v58 = vmul.f32 %v1047_v4, %v1047_v4 }
 0x10f   : > { %v631_v17 = vadd.f32 %v630_v47, %v629_v49  ;;  %v652_v47 = vsel %vm463_vm1, %v599_v60, 0.0 }
 0x110   : > { %v532_v28 = vadd.f32 %v531_v22, %v530_v24  ;;  %v636_v22 = vsel %vm463_vm1, %v591_v11, 0.0  ;;  %v551_v24 = vsel %vm463_vm1, %v1047_v4, 0.0  ;;  %v654_v11 = vsel %vm463_vm1, %v600_v0, 0.0 }
 0x111   : > { %v633_v20 = vadd.f32 %v632_v53, %v631_v17  ;;  %v656_v17 = vsel %vm463_vm1, %v601_v58, 0.0  ;;  %v604_v4 = vmul.f32 %v1057_v6, %v1057_v6 }
 0x112   : > { %v534_v32 = vadd.f32 %v533_v26, %v532_v28  ;;  %v640_v28 = vsel %vm463_vm1, %v593_v9, 0.0 }
 0x113   : > { %v635_v23 = vadd.f32 %v634_v18, %v633_v20 }
 0x114   : > { %v536_v36 = vadd.f32 %v535_v30, %v534_v32 }
 0x115   : > { %v637_v57 = vadd.f32 %v636_v22, %v635_v23 }
 0x116   : > { %v538_v40 = vadd.f32 %v537_v34, %v536_v36  ;;  %v557_v34 = vsel %vm463_vm1, %v1057_v6, 0.0  ;;  %v607_v6 = vmul.f32 %v1077_v10, %v1077_v10 }
 0x117   : > { %v639_v30 = vadd.f32 %v638_v25, %v637_v57  ;;  %v608_v57 = vmul.f32 %v1097_v14, %v1097_v14 }
 0x118   : > { %v540_v44 = vadd.f32 %v539_v38, %v538_v40  ;;  %v646_v38 = vsel %vm463_vm1, %v596_v56, 0.0  ;;  %v561_v40 = vsel %vm463_vm1, %v1107_v16, 0.0 }
 0x119   : > { %v641_v33 = vadd.f32 %v640_v28, %v639_v30  ;;  %v668_v28 = vsel %vm463_vm1, %v607_v6, 0.0  ;;  %v670_v30 = vsel %vm463_vm1, %v608_v57, 0.0 }
 0x11a   : > { %v542_v48 = vadd.f32 %v541_v42, %v540_v44  ;;  %v650_v44 = vsel %vm463_vm1, %v598_v54, 0.0 }
 0x11b   : > { %v643_v36 = vadd.f32 %v642_v31, %v641_v33 }
 0x11c   : > { %v544_v55 = vadd.f32 %v543_v46, %v542_v48 }
 0x11d   : > { %v645_v39 = vadd.f32 %v644_v3, %v643_v36 }
 0x11e   : > { %v546_v19 = vadd.f32 %v545_v51, %v544_v55  ;;  %v602_v51 = vmul.f32 %v1067_v8, %v1067_v8  ;;  %v603_v55 = vmul.f32 %v1037_v2, %v1037_v2  ;;  %v605_v8 = vmul.f32 %v1087_v12, %v1087_v12  ;;  %v503_v12 = vld [vmem:[%s1300_s3] sm:$0x1] }
 0x11f   : > { %v647_v1 = vadd.f32 %v646_v38, %v645_v39  ;;  %v606_v2 = vmul.f32 %v1107_v16, %v1107_v16 }
 0x120   : > { %v548_v63 = vadd.f32 %v547_v59, %v546_v19  ;;  %v658_v18 = vsel %vm463_vm1, %v602_v51, 0.0  ;;  %v664_v13 = vsel %vm463_vm1, %v605_v8, 0.0 }
 0x121   : > { %v649_v46 = vadd.f32 %v648_v41, %v647_v1  ;;  %v666_v16 = vsel %vm463_vm1, %v606_v2, 0.0 }
 0x122   : > { %v550_v26 = vadd.f32 %v549_v21, %v548_v63  ;;  %v660_v21 = vsel %vm463_vm1, %v603_v55, 0.0  ;;  %v662_v63 = vsel %vm463_vm1, %v604_v4, 0.0 }
 0x123   : > { %v651_v49 = vadd.f32 %v650_v44, %v649_v46 }
 0x124   : > { %v552_v29 = vadd.f32 %v551_v24, %v550_v26 }
 0x125   : > { %v653_v53 = vadd.f32 %v652_v47, %v651_v49 }
 0x126   : > { %v554_v32 = vadd.f32 %v553_v27, %v552_v29 }
 0x127   : > { %v655_v15 = vadd.f32 %v654_v11, %v653_v53 }
 0x128   : > { %v556_v35 = vadd.f32 %v555_v61, %v554_v32 }
 0x129   : > { %v657_v20 = vadd.f32 %v656_v17, %v655_v15 }
 0x12a   : > { %v558_v7 = vadd.f32 %v557_v34, %v556_v35 }
 0x12b   : > { %v659_v22 = vadd.f32 %v658_v18, %v657_v20 }
 0x12c   : > { %v560_v42 = vadd.f32 %v559_v37, %v558_v7 }
 0x12d   : > { %v661_v24 = vadd.f32 %v660_v21, %v659_v22 }
 0x12e   : > { %v562_v45 = vadd.f32 %v561_v40, %v560_v42 }
 0x12f   : > { %v663_v26 = vadd.f32 %v662_v63, %v661_v24 }
 0x130   : > { %v564_v48 = vadd.f32 %v563_v43, %v562_v45 }
 0x131   : > { %v665_v52 = vadd.f32 %v664_v13, %v663_v26 }
 0x132   : > { %v566_v62 = vadd.f32 %v565_v5, %v564_v48 }
 0x133   : > { %v667_v10 = vadd.f32 %v666_v16, %v665_v52 }
 0x134   : > { %v567_v59 = vrot.slane %v566_v62, 4 }
 0x135   : > { %v669_v61 = vadd.f32 %v668_v28, %v667_v10 }
 0x136   : > { %v568_v19 = vadd.f32 %v567_v59, %v566_v62 }
 0x137   : > { %v671_v56 = vadd.f32 %v670_v30, %v669_v61 }
 0x138   : > { %v569_v9 = vrot.slane %v568_v19, 2 }
 0x139   : > { %v672_v31 = vrot.slane %v671_v56, 4 }
 0x13a   : > { %v570_v23 = vadd.f32 %v569_v9, %v568_v19 }
 0x13b   : > { %v673_v14 = vadd.f32 %v672_v31, %v671_v56 }
 0x13c   : > { %v571_v25 = vrot.slane %v570_v23, 1 }
 0x13d   : > { %v674_v32 = vrot.slane %v673_v14, 2 }
 0x13e   : > { %v572_v27 = vadd.f32 %v571_v25, %v570_v23 }
 0x13f   : > { %v675_v33 = vadd.f32 %v674_v32, %v673_v14 }
 0x140   : > { %v573_v29 = vadd.f32 %v572_v27, %v503_v12 }
 0x141   : > { %v676_v34 = vrot.slane %v675_v33, 1 }
 0x142   : > { %575 = vst.msk [vmem:[%s1300_s3] sm:$0x1] %vm574_vm3, %v573_v29 }
 0x143   : > { %v677_v3 = vadd.f32 %v676_v34, %v675_v33 }
 0x145   : > { %v678_v35 = vadd.f32 %v677_v3, %v576_v50 }
 0x147   : > { %679 = vst.msk [vmem:[%s1301_s4] sm:$0x1] %vm574_vm3, %v678_v35 }
 0x148 PF: > { %s15_s15 = sadd.s32 1, %s846_s15  }
 0x149   : > { %p12_p5 = scmp.ge.s32.totalorder %s15_s15, 4  }
 0x14b   :  { %14 = sbr.rel (!%p12_p5) target bundleno = 1 (0x1), region = 78 }

// kernel: bottleneck_forward.6
= control target key start
LH: loop header
LB: loop body
LE: loop exit
PB: predicated region body
PF: predicated region fallthrough
CT: control target
= control target key end

     0   :  { %s1047_s21 = smov 0   ;;  %s1544_s0 = inlined_call_operand.vmem [shape: f32[512,4], index: 0, kind: input, shape index: {}]   ;;  %s1545_s1 = inlined_call_operand.vmem [shape: f32[1,4], index: 1, kind: input, shape index: {}]   ;;  %s1546_s2 = inlined_call_operand.vmem [shape: f32[1,4], index: 2, kind: input, shape index: {}]   ;;  %s1547_s3 = inlined_call_operand.vmem [shape: bf16[4,16], index: 3, kind: input, shape index: {}]   ;;  %s1548_s4 = inlined_call_operand.vmem [shape: f32[512,16], index: 4, kind: output, shape index: {0}]   ;;  %s1549_s5 = inlined_call_operand.vmem [shape: f32[1,16], index: 5, kind: output, shape index: {1}]   ;;  %s1550_s6 = inlined_call_operand.vmem [shape: f32[1,16], index: 6, kind: output, shape index: {2}]  }
   0x1 LB: > { %s909_s22 = sadd.s32 4294967295, %s1009_s21   ;;  %p913_p0 = scmp.ge.s32.totalorder %s1009_s21, 1  ;;  %s1009_s21 = sphi %s1047_s21, %s17_s21  }
   0x2   : > { %p208_p1 = scmp.lt.s32.totalorder %s1009_s21, 3 }
   0x4   : > { %p209_p2 = pnand %p913_p0, %p208_p1 }
   0x5   : > { %s914_s25 = sshll.u32 (!%p209_p2), %s909_s22, 5  ;;  %p936_p4 = scmp.ne.s32.totalorder (!%p209_p2), %s909_s22, 0 }
   0x6   : > { %212 = sbr.rel (%p209_p2) target bundleno = 335 (0x14f), region = 36  ;;  %p239_p3 = scmp.lt.s32.totalorder (!%p209_p2), %s914_s25, 63 }
   0xb   : > { %v409_v0 = vld [vmem:[%s1547_s3] sm:$0x3]  ;;  %vm459_vm0 = vcmask 1041408   ;;  %s1552_s25 = smov (!%p239_p3, %s914_s25), 63  ;;  %vm410_vm1 = vcmask 31744   ;;  %vm624_vm2 = vcmask 130048  }
   0xc   : > { %992 = vmatprep.subr.msk.bf16.mxu0 %vm459_vm0, %v409_v0  ;;  %993 = vmatprep.subr.msk.bf16.mxu1 %vm459_vm0, %v409_v0  ;;  %v461_v1 = vsel %vm459_vm0, %v409_v0, 0  ;;  %s915_s26 = sshll.u32 %s1552_s25, 3  ;;  %v1066_v2 = vld [vmem:[%s1545_s1] ss:$0 sm:$0xff] }
   0xd   : > { %957 = vmatpush3.bf16.msra.mxu0 %v461_v1  ;;  %991 = vmatpush3.bf16.msra.mxu1 %v461_v1  ;;  %s1073_s7 = scalar_lea.vmem %s1544_s0, %s915_s26  ;;  %v1078_v3 = vld [vmem:[%s1546_s2] ss:$0 sm:$0xff]  ;;  %s1197_s12 = scalar_lea.vmem %s1548_s4, %s915_s26 }
   0xe   : > { %v251_v4 = vld [vmem:[%s1073_s7] sm:$0xff]  ;;  %v252_v5 = vld [vmem:[%s1073_s7 + $0x8] sm:$0xff]  ;;  %v253_v11 = vld [vmem:[%s1073_s7 + $0x10] sm:$0xff] }
   0xf   : > { %v267_v6 = vld [vmem:[%s1073_s7 + $0x80] sm:$0xff]  ;;  %v290_v7 = vmul.f32 %v1066_v2, %v251_v4  ;;  %v291_v8 = vmul.f32 %v1066_v2, %v252_v5  ;;  %v268_v9 = vld [vmem:[%s1073_s7 + $0x88] sm:$0xff]  ;;  %v254_v12 = vld [vmem:[%s1073_s7 + $0x18] sm:$0xff]  ;;  %v292_v14 = vmul.f32 %v1066_v2, %v253_v11 }
  0x10   : > { %v306_v10 = vmul.f32 %v1066_v2, %v267_v6  ;;  %v307_v13 = vmul.f32 %v1066_v2, %v268_v9  ;;  %v293_v15 = vmul.f32 %v1066_v2, %v254_v12  ;;  %v269_v16 = vld [vmem:[%s1073_s7 + $0x90] sm:$0xff]  ;;  %v270_v17 = vld [vmem:[%s1073_s7 + $0x98] sm:$0xff]  ;;  %v255_v26 = vld [vmem:[%s1073_s7 + $0x20] sm:$0xff] }
  0x11   : > { %v329_v18 = vadd.f32 %v1078_v3, %v290_v7  ;;  %v330_v19 = vadd.f32 %v1078_v3, %v291_v8  ;;  %v308_v21 = vmul.f32 %v1066_v2, %v269_v16  ;;  %v331_v23 = vadd.f32 %v1078_v3, %v292_v14  ;;  %v256_v27 = vld [vmem:[%s1073_s7 + $0x28] sm:$0xff]  ;;  %v271_v32 = vld [vmem:[%s1073_s7 + $0xa0] sm:$0xff]  ;;  %v257_v38 = vld [vmem:[%s1073_s7 + $0x30] sm:$0xff] }
  0x12   : > { %v345_v20 = vadd.f32 %v1078_v3, %v306_v10  ;;  %v346_v22 = vadd.f32 %v1078_v3, %v307_v13  ;;  %v332_v24 = vadd.f32 %v1078_v3, %v293_v15  ;;  %v309_v25 = vmul.f32 %v1066_v2, %v270_v17  ;;  %v272_v37 = vld [vmem:[%s1073_s7 + $0xa8] sm:$0xff]  ;;  %v258_v43 = vld [vmem:[%s1073_s7 + $0x38] sm:$0xff]  ;;  %v273_v52 = vld [vmem:[%s1073_s7 + $0xb0] sm:$0xff] }
  0x13   : > { %v361_v28 = vmax.f32 %v329_v18, 0.0  ;;  %v362_v29 = vmax.f32 %v330_v19, 0.0  ;;  %v347_v31 = vadd.f32 %v1078_v3, %v308_v21  ;;  %v363_v34 = vmax.f32 %v331_v23, 0.0  ;;  %v274_v53 = vld [vmem:[%s1073_s7 + $0xb8] sm:$0xff]  ;;  %v259_v57 = vld [vmem:[%s1073_s7 + $0x40] sm:$0xff]  ;;  %v260_v62 = vld [vmem:[%s1073_s7 + $0x48] sm:$0xff] }
  0x14   : > { %v377_v30 = vmax.f32 %v345_v20, 0.0  ;;  %v378_v33 = vmax.f32 %v346_v22, 0.0  ;;  %v364_v35 = vmax.f32 %v332_v24, 0.0  ;;  %v348_v36 = vadd.f32 %v1078_v3, %v309_v25  ;;  %v275_v5 = vld [vmem:[%s1073_s7 + $0xc0] sm:$0xff]  ;;  %v276_v6 = vld [vmem:[%s1073_s7 + $0xc8] sm:$0xff]  ;;  %v261_v15 = vld [vmem:[%s1073_s7 + $0x50] sm:$0xff] }
  0x15   : > { %v393_v39 = vpack.c.bf16 %v362_v29, %v361_v28  ;;  %v379_v40 = vmax.f32 %v347_v31, 0.0  ;;  %v294_v41 = vmul.f32 %v1066_v2, %v255_v26  ;;  %v295_v42 = vmul.f32 %v1066_v2, %v256_v27  ;;  %v262_v20 = vld [vmem:[%s1073_s7 + $0x58] sm:$0xff]  ;;  %v277_v21 = vld [vmem:[%s1073_s7 + $0xd0] sm:$0xff]  ;;  %v263_v31 = vld [vmem:[%s1073_s7 + $0x60] sm:$0xff] }
  0x16   : > { %v401_v44 = vpack.c.bf16 %v378_v33, %v377_v30  ;;  %v394_v45 = vpack.c.bf16 %v364_v35, %v363_v34  ;;  %v380_v46 = vmax.f32 %v348_v36, 0.0  ;;  %v310_v47 = vmul.f32 %v1066_v2, %v271_v32  ;;  %v278_v26 = vld [vmem:[%s1073_s7 + $0xd8] sm:$0xff]  ;;  %v264_v36 = vld [vmem:[%s1073_s7 + $0x68] sm:$0xff] }
  0x17   : > { %958 = vmatprep.mubr.msk.bf16.mxu0 %vm410_vm1, %v393_v39  ;;  %v333_v48 = vadd.f32 %v1078_v3, %v294_v41  ;;  %v334_v49 = vadd.f32 %v1078_v3, %v295_v42  ;;  %v311_v50 = vmul.f32 %v1066_v2, %v272_v37  ;;  %v296_v51 = vmul.f32 %v1066_v2, %v257_v38  ;;  %v279_v41 = vld [vmem:[%s1073_s7 + $0xe0] sm:$0xff] }
  0x18   : > { %974 = vmatprep.mubr.msk.bf16.mxu1 %vm410_vm1, %v401_v44  ;;  %959 = vmatmul.mubr.msk.bf16.vlgmr.msra.gmra.mxu0 %vm410_vm1, %v394_v45  ;;  %v402_v54 = vpack.c.bf16 %v380_v46, %v379_v40  ;;  %v349_v55 = vadd.f32 %v1078_v3, %v310_v47  ;;  %v297_v56 = vmul.f32 %v1066_v2, %v258_v43  ;;  %v280_v46 = vld [vmem:[%s1073_s7 + $0xe8] sm:$0xff]  ;;  %v265_v47 = vld [vmem:[%s1073_s7 + $0x70] sm:$0xff] }
  0x19   : > { %v365_v58 = vmax.f32 %v333_v48, 0.0  ;;  %v366_v59 = vmax.f32 %v334_v49, 0.0  ;;  %v350_v60 = vadd.f32 %v1078_v3, %v311_v50  ;;  %v335_v61 = vadd.f32 %v1078_v3, %v296_v51 }
  0x1a   : > { %975 = vmatmul.mubr.msk.bf16.vlgmr.msra.gmra.mxu1 %vm410_vm1, %v402_v54  ;;  %v381_v63 = vmax.f32 %v349_v55, 0.0  ;;  %v336_v0 = vadd.f32 %v1078_v3, %v297_v56  ;;  %v312_v1 = vmul.f32 %v1066_v2, %v273_v52  ;;  %v313_v4 = vmul.f32 %v1066_v2, %v274_v53  ;;  %v266_v52 = vld [vmem:[%s1073_s7 + $0x78] sm:$0xff] }
  0x1b   : > { %v395_v7 = vpack.c.bf16 %v366_v59, %v365_v58  ;;  %v382_v8 = vmax.f32 %v350_v60, 0.0  ;;  %v367_v9 = vmax.f32 %v335_v61, 0.0  ;;  %v298_v10 = vmul.f32 %v1066_v2, %v259_v57  ;;  %v281_v61 = vld [vmem:[%s1073_s7 + $0xf0] sm:$0xff] }
  0x1c   : > { %v368_v11 = vmax.f32 %v336_v0, 0.0  ;;  %v351_v12 = vadd.f32 %v1078_v3, %v312_v1  ;;  %v352_v13 = vadd.f32 %v1078_v3, %v313_v4  ;;  %v299_v14 = vmul.f32 %v1066_v2, %v260_v62  ;;  %v282_v62 = vld [vmem:[%s1073_s7 + $0xf8] sm:$0xff] }
  0x1d   : > { %962 = vmatprep.mubr.msk.bf16.mxu0 %vm410_vm1, %v395_v7  ;;  %v403_v16 = vpack.c.bf16 %v382_v8, %v381_v63  ;;  %v337_v17 = vadd.f32 %v1078_v3, %v298_v10  ;;  %v314_v18 = vmul.f32 %v1066_v2, %v275_v5  ;;  %v315_v19 = vmul.f32 %v1066_v2, %v276_v6 }
  0x1e   : > { %v396_v22 = vpack.c.bf16 %v368_v11, %v367_v9  ;;  %v383_v23 = vmax.f32 %v351_v12, 0.0  ;;  %v384_v24 = vmax.f32 %v352_v13, 0.0  ;;  %v338_v25 = vadd.f32 %v1078_v3, %v299_v14 }
  0x1f   : > { %978 = vmatprep.mubr.msk.bf16.mxu1 %vm410_vm1, %v403_v16  ;;  %v369_v27 = vmax.f32 %v337_v17, 0.0  ;;  %v353_v28 = vadd.f32 %v1078_v3, %v314_v18  ;;  %v354_v29 = vadd.f32 %v1078_v3, %v315_v19  ;;  %v300_v30 = vmul.f32 %v1066_v2, %v261_v15 }
  0x20   : > { %963 = vmatmul.mubr.msk.bf16.gmra.mxu0 %vm410_vm1, %v396_v22  ;;  %v404_v32 = vpack.c.bf16 %v384_v24, %v383_v23  ;;  %v370_v33 = vmax.f32 %v338_v25, 0.0  ;;  %v301_v34 = vmul.f32 %v1066_v2, %v262_v20  ;;  %v316_v35 = vmul.f32 %v1066_v2, %v277_v21 }
  0x21   : > { %v385_v37 = vmax.f32 %v353_v28, 0.0  ;;  %v386_v38 = vmax.f32 %v354_v29, 0.0  ;;  %v339_v39 = vadd.f32 %v1078_v3, %v300_v30  ;;  %v317_v40 = vmul.f32 %v1066_v2, %v278_v26 }
  0x22   : > { %979 = vmatmul.mubr.msk.bf16.gmra.mxu1 %vm410_vm1, %v404_v32  ;;  %v397_v42 = vpack.c.bf16 %v370_v33, %v369_v27  ;;  %v340_v43 = vadd.f32 %v1078_v3, %v301_v34  ;;  %v355_v44 = vadd.f32 %v1078_v3, %v316_v35  ;;  %v302_v45 = vmul.f32 %v1066_v2, %v263_v31 }
  0x23   : > { %v405_v48 = vpack.c.bf16 %v386_v38, %v385_v37  ;;  %v371_v49 = vmax.f32 %v339_v39, 0.0  ;;  %v356_v50 = vadd.f32 %v1078_v3, %v317_v40  ;;  %v303_v51 = vmul.f32 %v1066_v2, %v264_v36 }
  0x24   : > { %966 = vmatprep.mubr.msk.bf16.mxu0 %vm410_vm1, %v397_v42  ;;  %v372_v53 = vmax.f32 %v340_v43, 0.0  ;;  %v387_v54 = vmax.f32 %v355_v44, 0.0  ;;  %v341_v55 = vadd.f32 %v1078_v3, %v302_v45  ;;  %v318_v56 = vmul.f32 %v1066_v2, %v279_v41 }
  0x25   : > { %982 = vmatprep.mubr.msk.bf16.mxu1 %vm410_vm1, %v405_v48  ;;  %v388_v57 = vmax.f32 %v356_v50, 0.0  ;;  %v342_v58 = vadd.f32 %v1078_v3, %v303_v51  ;;  %v319_v59 = vmul.f32 %v1066_v2, %v280_v46  ;;  %v304_v60 = vmul.f32 %v1066_v2, %v265_v47 }
  0x26   : > { %v398_v63 = vpack.c.bf16 %v372_v53, %v371_v49  ;;  %v373_v0 = vmax.f32 %v341_v55, 0.0  ;;  %v357_v1 = vadd.f32 %v1078_v3, %v318_v56  ;;  %v305_v4 = vmul.f32 %v1066_v2, %v266_v52 }
  0x27   : > { %v406_v5 = vpack.c.bf16 %v388_v57, %v387_v54  ;;  %v374_v6 = vmax.f32 %v342_v58, 0.0  ;;  %v358_v7 = vadd.f32 %v1078_v3, %v319_v59  ;;  %v343_v8 = vadd.f32 %v1078_v3, %v304_v60 }
  0x28   : > { %967 = vmatmul.mubr.msk.bf16.gmra.mxu0 %vm410_vm1, %v398_v63  ;;  %v389_v9 = vmax.f32 %v357_v1, 0.0  ;;  %v344_v10 = vadd.f32 %v1078_v3, %v305_v4  ;;  %v320_v11 = vmul.f32 %v1066_v2, %v281_v61  ;;  %v321_v12 = vmul.f32 %v1066_v2, %v282_v62 }
  0x29   : > { %v399_v13 = vpack.c.bf16 %v374_v6, %v373_v0  ;;  %v390_v14 = vmax.f32 %v358_v7, 0.0  ;;  %v375_v15 = vmax.f32 %v343_v8, 0.0 }
  0x2a   : > { %983 = vmatmul.mubr.msk.bf16.gmra.mxu1 %vm410_vm1, %v406_v5  ;;  %v376_v16 = vmax.f32 %v344_v10, 0.0  ;;  %v359_v17 = vadd.f32 %v1078_v3, %v320_v11  ;;  %v360_v18 = vadd.f32 %v1078_v3, %v321_v12 }
  0x2b   : > { %970 = vmatprep.mubr.msk.bf16.mxu0 %vm410_vm1, %v399_v13  ;;  %v407_v19 = vpack.c.bf16 %v390_v14, %v389_v9 }
  0x2c   : > { %v400_v20 = vpack.c.bf16 %v376_v16, %v375_v15  ;;  %v391_v21 = vmax.f32 %v359_v17, 0.0  ;;  %v392_v22 = vmax.f32 %v360_v18, 0.0 }
  0x2d   : > { %986 = vmatprep.mubr.msk.bf16.mxu1 %vm410_vm1, %v407_v19 }
  0x2e   : > { %v408_v2 = vpack.c.bf16 %v392_v22, %v391_v21 }
  0x30   : > { %971 = vmatmul.mubr.msk.bf16.gmra.mxu0 %vm410_vm1, %v400_v20 }
  0x32   : > { %987 = vmatmul.mubr.msk.bf16.gmra.mxu1 %vm410_vm1, %v408_v2 }
  0xd8   : > { %v1199_v3 = vpop.f32.mrf.mxu0 }
  0xd9   : > { %627 = vst.msk [vmem:[%s1197_s12 + $0x10] sm:$0xff] %vm624_vm2, %v1199_v3 }
  0xda   : > { %v1204_v23 = vpop.f32.mrf.mxu1  ;;  %v1206_v24 = vpop.f32.mrf.mxu0 }
  0xdb   : > { %643 = vst.msk [vmem:[%s1197_s12 + $0x90] sm:$0xff] %vm624_vm2, %v1204_v23  ;;  %625 = vst.msk [vmem:[%s1197_s12] sm:$0xff] %vm624_vm2, %v1206_v24 }
  0xdc   : > { %v1214_v25 = vpop.f32.mrf.mxu1  ;;  %v1216_v26 = vpop.f32.mrf.mxu0 }
  0xdd   : > { %641 = vst.msk [vmem:[%s1197_s12 + $0x80] sm:$0xff] %vm624_vm2, %v1214_v25  ;;  %628 = vst.msk [vmem:[%s1197_s12 + $0x18] sm:$0xff] %vm624_vm2, %v1216_v26 }
  0xde   : > { %v1224_v27 = vpop.f32.mrf.mxu1  ;;  %v1226_v28 = vpop.f32.mrf.mxu0 }
  0xdf   : > { %644 = vst.msk [vmem:[%s1197_s12 + $0x98] sm:$0xff] %vm624_vm2, %v1224_v27  ;;  %626 = vst.msk [vmem:[%s1197_s12 + $0x8] sm:$0xff] %vm624_vm2, %v1226_v28 }
  0xe0   : > { %v1234_v29 = vpop.f32.mrf.mxu1  ;;  %v1236_v30 = vpop.f32.mrf.mxu0 }
  0xe1   : > { %642 = vst.msk [vmem:[%s1197_s12 + $0x88] sm:$0xff] %vm624_vm2, %v1234_v29  ;;  %631 = vst.msk [vmem:[%s1197_s12 + $0x30] sm:$0xff] %vm624_vm2, %v1236_v30 }
  0xe2   : > { %v1244_v31 = vpop.f32.mrf.mxu1  ;;  %v1246_v32 = vpop.f32.mrf.mxu0 }
  0xe3   : > { %647 = vst.msk [vmem:[%s1197_s12 + $0xb0] sm:$0xff] %vm624_vm2, %v1244_v31  ;;  %629 = vst.msk [vmem:[%s1197_s12 + $0x20] sm:$0xff] %vm624_vm2, %v1246_v32 }
  0xe4   : > { %v1254_v33 = vpop.f32.mrf.mxu1  ;;  %v1256_v34 = vpop.f32.mrf.mxu0 }
  0xe5   : > { %645 = vst.msk [vmem:[%s1197_s12 + $0xa0] sm:$0xff] %vm624_vm2, %v1254_v33  ;;  %632 = vst.msk [vmem:[%s1197_s12 + $0x38] sm:$0xff] %vm624_vm2, %v1256_v34 }
  0xe6   : > { %v1264_v35 = vpop.f32.mrf.mxu1  ;;  %v1266_v36 = vpop.f32.mrf.mxu0 }
  0xe7   : > { %648 = vst.msk [vmem:[%s1197_s12 + $0xb8] sm:$0xff] %vm624_vm2, %v1264_v35  ;;  %630 = vst.msk [vmem:[%s1197_s12 + $0x28] sm:$0xff] %vm624_vm2, %v1266_v36 }
  0xe8   : > { %v1274_v37 = vpop.f32.mrf.mxu1  ;;  %v1276_v38 = vpop.f32.mrf.mxu0 }
  0xe9   : > { %646 = vst.msk [vmem:[%s1197_s12 + $0xa8] sm:$0xff] %vm624_vm2, %v1274_v37  ;;  %635 = vst.msk [vmem:[%s1197_s12 + $0x50] sm:$0xff] %vm624_vm2, %v1276_v38 }
  0xea   : > { %v1284_v39 = vpop.f32.mrf.mxu1  ;;  %v1286_v40 = vpop.f32.mrf.mxu0 }
  0xeb   : > { %651 = vst.msk [vmem:[%s1197_s12 + $0xd0] sm:$0xff] %vm624_vm2, %v1284_v39  ;;  %633 = vst.msk [vmem:[%s1197_s12 + $0x40] sm:$0xff] %vm624_vm2, %v1286_v40 }
  0xec   : > { %v1294_v41 = vpop.f32.mrf.mxu1  ;;  %v1296_v42 = vpop.f32.mrf.mxu0 }
  0xed   : > { %649 = vst.msk [vmem:[%s1197_s12 + $0xc0] sm:$0xff] %vm624_vm2, %v1294_v41  ;;  %636 = vst.msk [vmem:[%s1197_s12 + $0x58] sm:$0xff] %vm624_vm2, %v1296_v42 }
  0xee   : > { %v1304_v43 = vpop.f32.mrf.mxu1  ;;  %v1306_v44 = vpop.f32.mrf.mxu0 }
  0xef   : > { %652 = vst.msk [vmem:[%s1197_s12 + $0xd8] sm:$0xff] %vm624_vm2, %v1304_v43  ;;  %634 = vst.msk [vmem:[%s1197_s12 + $0x48] sm:$0xff] %vm624_vm2, %v1306_v44 }
  0xf0   : > { %v1314_v45 = vpop.f32.mrf.mxu1  ;;  %v1316_v46 = vpop.f32.mrf.mxu0 }
  0xf1   : > { %650 = vst.msk [vmem:[%s1197_s12 + $0xc8] sm:$0xff] %vm624_vm2, %v1314_v45  ;;  %639 = vst.msk [vmem:[%s1197_s12 + $0x70] sm:$0xff] %vm624_vm2, %v1316_v46 }
  0xf2   : > { %v1324_v47 = vpop.f32.mrf.mxu1  ;;  %v1326_v48 = vpop.f32.mrf.mxu0 }
  0xf3   : > { %655 = vst.msk [vmem:[%s1197_s12 + $0xf0] sm:$0xff] %vm624_vm2, %v1324_v47  ;;  %637 = vst.msk [vmem:[%s1197_s12 + $0x60] sm:$0xff] %vm624_vm2, %v1326_v48 }
  0xf4   : > { %v1334_v49 = vpop.f32.mrf.mxu1  ;;  %v1336_v50 = vpop.f32.mrf.mxu0 }
  0xf5   : > { %653 = vst.msk [vmem:[%s1197_s12 + $0xe0] sm:$0xff] %vm624_vm2, %v1334_v49  ;;  %640 = vst.msk [vmem:[%s1197_s12 + $0x78] sm:$0xff] %vm624_vm2, %v1336_v50  ;;  %660 = sbr.rel (%p936_p4) target bundleno = 252 (0xfc), region = 40 }
  0xf6   : > { %v1344_v51 = vpop.f32.mrf.mxu1  ;;  %v1346_v52 = vpop.f32.mrf.mxu0 }
  0xf7   : > { %656 = vst.msk [vmem:[%s1197_s12 + $0xf8] sm:$0xff] %vm624_vm2, %v1344_v51  ;;  %638 = vst.msk [vmem:[%s1197_s12 + $0x68] sm:$0xff] %vm624_vm2, %v1346_v52 }
  0xf8   : > { %v1354_v53 = vpop.f32.mrf.mxu1 }
  0xf9   : > { %654 = vst.msk [vmem:[%s1197_s12 + $0xe8] sm:$0xff] %vm624_vm2, %v1354_v53 }
  0xfa   : > { %vm661_vm3 = vcmask 122880   ;;  %v1011_v54 = vmov 0.0  }
  0xfb   : > { %662 = vst.msk [vmem:[%s1549_s5] sm:$0x1] %vm661_vm3, %v1011_v54  ;;  %663 = vst.msk [vmem:[%s1550_s6] sm:$0x1] %vm661_vm3, %v1011_v54 }
  0xfc PF: > { %v665_v55 = vsel %vm624_vm2, %v1206_v24, 0.0  ;;  %v666_v56 = vsel %vm624_vm2, %v1226_v28, 0.0  ;;  %v668_v57 = vsel %vm624_vm2, %v1199_v3, 0.0  ;;  %v670_v59 = vsel %vm624_vm2, %v1216_v26, 0.0 }
  0xfd   : > { %v667_v58 = vadd.f32 %v666_v56, %v665_v55  ;;  %v672_v61 = vsel %vm624_vm2, %v1246_v32, 0.0  ;;  %v674_v63 = vsel %vm624_vm2, %v1266_v36, 0.0  ;;  %v676_v1 = vsel %vm624_vm2, %v1236_v30, 0.0 }
  0xfe   : > { %v678_v5 = vsel %vm624_vm2, %v1256_v34, 0.0  ;;  %v680_v7 = vsel %vm624_vm2, %v1286_v40, 0.0  ;;  %v682_v9 = vsel %vm624_vm2, %v1306_v44, 0.0  ;;  %v738_v10 = vmul.f32 %v1206_v24, %v1206_v24 }
  0xff   : > { %v669_v60 = vadd.f32 %v668_v57, %v667_v58  ;;  %v739_v11 = vmul.f32 %v1226_v28, %v1226_v28  ;;  %v740_v13 = vmul.f32 %v1199_v3, %v1199_v3  ;;  %v684_v14 = vsel %vm624_vm2, %v1276_v38, 0.0 }
 0x100   : > { %v741_v15 = vmul.f32 %v1216_v26, %v1216_v26  ;;  %v686_v17 = vsel %vm624_vm2, %v1296_v42, 0.0  ;;  %v742_v18 = vmul.f32 %v1246_v32, %v1246_v32  ;;  %v770_v19 = vsel %vm624_vm2, %v738_v10, 0.0 }
 0x101   : > { %v671_v62 = vadd.f32 %v670_v59, %v669_v60  ;;  %v771_v20 = vsel %vm624_vm2, %v739_v11, 0.0  ;;  %v773_v2 = vsel %vm624_vm2, %v740_v13, 0.0  ;;  %v688_v3 = vsel %vm624_vm2, %v1326_v48, 0.0 }
 0x102   : > { %v772_v22 = vadd.f32 %v771_v20, %v770_v19  ;;  %v743_v24 = vmul.f32 %v1266_v36, %v1266_v36  ;;  %v775_v26 = vsel %vm624_vm2, %v741_v15, 0.0  ;;  %v690_v32 = vsel %vm624_vm2, %v1346_v52, 0.0 }
 0x103   : > { %v673_v0 = vadd.f32 %v672_v61, %v671_v62  ;;  %v744_v55 = vmul.f32 %v1236_v30, %v1236_v30  ;;  %v777_v56 = vsel %vm624_vm2, %v742_v18, 0.0  ;;  %v692_v59 = vsel %vm624_vm2, %v1316_v46, 0.0 }
 0x104   : > { %v774_v54 = vadd.f32 %v773_v2, %v772_v22  ;;  %v745_v36 = vmul.f32 %v1256_v34, %v1256_v34  ;;  %v779_v60 = vsel %vm624_vm2, %v743_v24, 0.0  ;;  %v746_v30 = vmul.f32 %v1286_v40, %v1286_v40 }
 0x105   : > { %v675_v4 = vadd.f32 %v674_v63, %v673_v0  ;;  %v694_v63 = vsel %vm624_vm2, %v1336_v50, 0.0  ;;  %v781_v0 = vsel %vm624_vm2, %v744_v55, 0.0  ;;  %v747_v34 = vmul.f32 %v1306_v44, %v1306_v44 }
 0x106   : > { %v776_v58 = vadd.f32 %v775_v26, %v774_v54  ;;  %v748_v40 = vmul.f32 %v1276_v38, %v1276_v38  ;;  %v785_v10 = vsel %vm624_vm2, %v746_v30, 0.0  ;;  %v700_v13 = vsel %vm624_vm2, %v1204_v23, 0.0 }
 0x107   : > { %v677_v6 = vadd.f32 %v676_v1, %v675_v4  ;;  %v749_v44 = vmul.f32 %v1296_v42, %v1296_v42  ;;  %v750_v38 = vmul.f32 %v1326_v48, %v1326_v48  ;;  %v751_v42 = vmul.f32 %v1346_v52, %v1346_v52 }
 0x108   : > { %v778_v62 = vadd.f32 %v777_v56, %v776_v58  ;;  %v789_v18 = vsel %vm624_vm2, %v748_v40, 0.0  ;;  %v706_v24 = vsel %vm624_vm2, %v1274_v37, 0.0  ;;  %v752_v48 = vmul.f32 %v1316_v46, %v1316_v46 }
 0x109   : > { %v679_v8 = vadd.f32 %v678_v5, %v677_v6  ;;  %v696_v5 = vsel %vm624_vm2, %v1214_v25, 0.0  ;;  %v783_v6 = vsel %vm624_vm2, %v745_v36, 0.0  ;;  %v791_v22 = vsel %vm624_vm2, %v749_v44, 0.0 }
 0x10a   : > { %v780_v4 = vadd.f32 %v779_v60, %v778_v62  ;;  %v793_v26 = vsel %vm624_vm2, %v750_v38, 0.0  ;;  %v753_v52 = vmul.f32 %v1336_v50, %v1336_v50  ;;  %v795_v55 = vsel %vm624_vm2, %v751_v42, 0.0 }
 0x10b   : > { %v681_v12 = vadd.f32 %v680_v7, %v679_v8  ;;  %v710_v58 = vsel %vm624_vm2, %v1264_v35, 0.0  ;;  %v754_v46 = vmul.f32 %v1214_v25, %v1214_v25  ;;  %v755_v50 = vmul.f32 %v1234_v29, %v1234_v29 }
 0x10c   : > { %v782_v8 = vadd.f32 %v781_v0, %v780_v4  ;;  %v799_v62 = vsel %vm624_vm2, %v753_v52, 0.0  ;;  %v714_v0 = vsel %vm624_vm2, %v1314_v45, 0.0  ;;  %v756_v25 = vmul.f32 %v1204_v23, %v1204_v23 }
 0x10d   : > { %v683_v16 = vadd.f32 %v682_v9, %v681_v12  ;;  %v698_v9 = vsel %vm624_vm2, %v1234_v29, 0.0  ;;  %v757_v29 = vmul.f32 %v1224_v27, %v1224_v27  ;;  %v758_v23 = vmul.f32 %v1254_v33, %v1254_v33 }
 0x10e   : > { %v784_v12 = vadd.f32 %v783_v6, %v782_v8  ;;  %v803_v6 = vsel %vm624_vm2, %v755_v50, 0.0  ;;  %v805_v40 = vsel %vm624_vm2, %v756_v25, 0.0  ;;  %v726_v42 = vsel %vm624_vm2, %v1344_v51, 0.0 }
 0x10f   : > { %v685_v21 = vadd.f32 %v684_v14, %v683_v16  ;;  %v787_v14 = vsel %vm624_vm2, %v747_v34, 0.0  ;;  %v716_v34 = vsel %vm624_vm2, %v1284_v39, 0.0  ;;  %vm735_vm4 = vcmask 122880  }
 0x110   : > { %v786_v16 = vadd.f32 %v785_v10, %v784_v12  ;;  %v720_v12 = vsel %vm624_vm2, %v1334_v49, 0.0 }
 0x111   : > { %v687_v28 = vadd.f32 %v686_v17, %v685_v21  ;;  %v702_v17 = vsel %vm624_vm2, %v1224_v27, 0.0  ;;  %v704_v21 = vsel %vm624_vm2, %v1254_v33, 0.0  ;;  %v759_v27 = vmul.f32 %v1274_v37, %v1274_v37 }
 0x112   : > { %v788_v20 = vadd.f32 %v787_v14, %v786_v16  ;;  %v760_v33 = vmul.f32 %v1244_v31, %v1244_v31  ;;  %v809_v16 = vsel %vm624_vm2, %v758_v23, 0.0  ;;  %v761_v37 = vmul.f32 %v1264_v35, %v1264_v35  ;;  %v737_v23 = vld [vmem:[%s1550_s6] sm:$0x1] }
 0x113   : > { %v689_v57 = vadd.f32 %v688_v3, %v687_v28 }
 0x114   : > { %v790_v3 = vadd.f32 %v789_v18, %v788_v20  ;;  %v724_v18 = vsel %vm624_vm2, %v1324_v47, 0.0 }
 0x115   : > { %v691_v61 = vadd.f32 %v690_v32, %v689_v57  ;;  %v708_v32 = vsel %vm624_vm2, %v1244_v31, 0.0  ;;  %v762_v31 = vmul.f32 %v1294_v41, %v1294_v41 }
 0x116   : > { %v792_v54 = vadd.f32 %v791_v22, %v790_v3  ;;  %v813_v22 = vsel %vm624_vm2, %v760_v33, 0.0 }
 0x117   : > { %v693_v1 = vadd.f32 %v692_v59, %v691_v61  ;;  %v797_v59 = vsel %vm624_vm2, %v752_v48, 0.0  ;;  %v712_v61 = vsel %vm624_vm2, %v1294_v41, 0.0  ;;  %v815_v48 = vsel %vm624_vm2, %v761_v37, 0.0 }
 0x118   : > { %v794_v57 = vadd.f32 %v793_v26, %v792_v54  ;;  %v817_v54 = vsel %vm624_vm2, %v762_v31, 0.0  ;;  %v765_v41 = vmul.f32 %v1304_v43, %v1304_v43 }
 0x119   : > { %v695_v7 = vadd.f32 %v694_v63, %v693_v1  ;;  %v801_v1 = vsel %vm624_vm2, %v754_v46, 0.0 }
 0x11a   : > { %v796_v60 = vadd.f32 %v795_v55, %v794_v57 }
 0x11b   : > { %v697_v11 = vadd.f32 %v696_v5, %v695_v7 }
 0x11c   : > { %v798_v30 = vadd.f32 %v797_v59, %v796_v60 }
 0x11d   : > { %v699_v15 = vadd.f32 %v698_v9, %v697_v11  ;;  %v718_v9 = vsel %vm624_vm2, %v1304_v43, 0.0  ;;  %v768_v43 = vmul.f32 %v1324_v47, %v1324_v47 }
 0x11e   : > { %v800_v5 = vadd.f32 %v799_v62, %v798_v30  ;;  %v769_v30 = vmul.f32 %v1344_v51, %v1344_v51 }
 0x11f   : > { %v701_v19 = vadd.f32 %v700_v13, %v699_v15  ;;  %v807_v13 = vsel %vm624_vm2, %v757_v29, 0.0  ;;  %v722_v15 = vsel %vm624_vm2, %v1354_v53, 0.0 }
 0x120   : > { %v802_v8 = vadd.f32 %v801_v1, %v800_v5  ;;  %v829_v1 = vsel %vm624_vm2, %v768_v43, 0.0  ;;  %v831_v5 = vsel %vm624_vm2, %v769_v30, 0.0 }
 0x121   : > { %v703_v2 = vadd.f32 %v702_v17, %v701_v19  ;;  %v811_v19 = vsel %vm624_vm2, %v759_v27, 0.0 }
 0x122   : > { %v804_v11 = vadd.f32 %v803_v6, %v802_v8 }
 0x123   : > { %v705_v28 = vadd.f32 %v704_v21, %v703_v2 }
 0x124   : > { %v806_v14 = vadd.f32 %v805_v40, %v804_v11 }
 0x125   : > { %v707_v56 = vadd.f32 %v706_v24, %v705_v28  ;;  %v763_v24 = vmul.f32 %v1314_v45, %v1314_v45  ;;  %v764_v28 = vmul.f32 %v1284_v39, %v1284_v39  ;;  %v766_v45 = vmul.f32 %v1334_v49, %v1334_v49  ;;  %v664_v49 = vld [vmem:[%s1549_s5] sm:$0x1] }
 0x126   : > { %v808_v38 = vadd.f32 %v807_v13, %v806_v14  ;;  %v767_v39 = vmul.f32 %v1354_v53, %v1354_v53 }
 0x127   : > { %v709_v36 = vadd.f32 %v708_v32, %v707_v56  ;;  %v819_v55 = vsel %vm624_vm2, %v763_v24, 0.0  ;;  %v825_v50 = vsel %vm624_vm2, %v766_v45, 0.0 }
 0x128   : > { %v810_v21 = vadd.f32 %v809_v16, %v808_v38  ;;  %v827_v53 = vsel %vm624_vm2, %v767_v39, 0.0 }
 0x129   : > { %v711_v63 = vadd.f32 %v710_v58, %v709_v36  ;;  %v821_v58 = vsel %vm624_vm2, %v764_v28, 0.0  ;;  %v823_v36 = vsel %vm624_vm2, %v765_v41, 0.0 }
 0x12a   : > { %v812_v3 = vadd.f32 %v811_v19, %v810_v21 }
 0x12b   : > { %v713_v4 = vadd.f32 %v712_v61, %v711_v63 }
 0x12c   : > { %v814_v26 = vadd.f32 %v813_v22, %v812_v3 }
 0x12d   : > { %v715_v7 = vadd.f32 %v714_v0, %v713_v4 }
 0x12e   : > { %v816_v52 = vadd.f32 %v815_v48, %v814_v26 }
 0x12f   : > { %v717_v10 = vadd.f32 %v716_v34, %v715_v7 }
 0x130   : > { %v818_v57 = vadd.f32 %v817_v54, %v816_v52 }
 0x131   : > { %v719_v44 = vadd.f32 %v718_v9, %v717_v10 }
 0x132   : > { %v820_v59 = vadd.f32 %v819_v55, %v818_v57 }
 0x133   : > { %v721_v17 = vadd.f32 %v720_v12, %v719_v44 }
 0x134   : > { %v822_v61 = vadd.f32 %v821_v58, %v820_v59 }
 0x135   : > { %v723_v20 = vadd.f32 %v722_v15, %v721_v17 }
 0x136   : > { %v824_v63 = vadd.f32 %v823_v36, %v822_v61 }
 0x137   : > { %v725_v2 = vadd.f32 %v724_v18, %v723_v20 }
 0x138   : > { %v826_v25 = vadd.f32 %v825_v50, %v824_v63 }
 0x139   : > { %v727_v35 = vadd.f32 %v726_v42, %v725_v2 }
 0x13a   : > { %v828_v47 = vadd.f32 %v827_v53, %v826_v25 }
 0x13b   : > { %v728_v32 = vrot.slane %v727_v35, 4 }
 0x13c   : > { %v830_v34 = vadd.f32 %v829_v1, %v828_v47 }
 0x13d   : > { %v729_v56 = vadd.f32 %v728_v32, %v727_v35 }
 0x13e   : > { %v832_v29 = vadd.f32 %v831_v5, %v830_v34 }
 0x13f   : > { %v730_v46 = vrot.slane %v729_v56, 2 }
 0x140   : > { %v833_v6 = vrot.slane %v832_v29, 4 }
 0x141   : > { %v731_v60 = vadd.f32 %v730_v46, %v729_v56 }
 0x142   : > { %v834_v51 = vadd.f32 %v833_v6, %v832_v29 }
 0x143   : > { %v732_v62 = vrot.slane %v731_v60, 1 }
 0x144   : > { %v835_v7 = vrot.slane %v834_v51, 2 }
 0x145   : > { %v733_v0 = vadd.f32 %v732_v62, %v731_v60 }
 0x146   : > { %v836_v8 = vadd.f32 %v835_v7, %v834_v51 }
 0x147   : > { %v734_v4 = vadd.f32 %v733_v0, %v664_v49 }
 0x148   : > { %v837_v9 = vrot.slane %v836_v8, 1 }
 0x149   : > { %736 = vst.msk [vmem:[%s1549_s5] sm:$0x1] %vm735_vm4, %v734_v4 }
 0x14a   : > { %v838_v40 = vadd.f32 %v837_v9, %v836_v8 }
 0x14c   : > { %v839_v10 = vadd.f32 %v838_v40, %v737_v23 }
 0x14e   : > { %840 = vst.msk [vmem:[%s1550_s6] sm:$0x1] %vm735_vm4, %v839_v10 }
 0x14f PF: > { %s17_s21 = sadd.s32 1, %s1009_s21  }
 0x150   : > { %p14_p5 = scmp.ge.s32.totalorder %s17_s21, 4  }
 0x152   :  { %16 = sbr.rel (!%p14_p5) target bundleno = 1 (0x1), region = 86 }

// kernel: bottleneck_forward.5
= control target key start
LH: loop header
LB: loop body
LE: loop exit
PB: predicated region body
PF: predicated region fallthrough
CT: control target
= control target key end

     0   :  { %s3088_s21 = smov 0   ;;  %s5054_s0 = inlined_call_operand.vmem [shape: f32[512,4], index: 0, kind: input, shape index: {}]   ;;  %s5055_s1 = inlined_call_operand.vmem [shape: f32[1,4], index: 1, kind: input, shape index: {}]   ;;  %s5056_s2 = inlined_call_operand.vmem [shape: f32[1,4], index: 2, kind: input, shape index: {}]   ;;  %s5057_s3 = inlined_call_operand.vmem [shape: bf16[36,4], index: 3, kind: input, shape index: {}]   ;;  %s5058_s4 = inlined_call_operand.vmem [shape: f32[512,4], index: 4, kind: output, shape index: {0}]   ;;  %s5059_s5 = inlined_call_operand.vmem [shape: f32[1,4], index: 5, kind: output, shape index: {1}]   ;;  %s5060_s6 = inlined_call_operand.vmem [shape: f32[1,4], index: 6, kind: output, shape index: {2}]  }
   0x1 LB: > { %s2301_s22 = sadd.s32 4294967295, %s3041_s21   ;;  %p2305_p0 = scmp.ge.s32.totalorder %s3041_s21, 1  ;;  %s3041_s21 = sphi %s3088_s21, %s17_s21  }
   0x2   : > { %p208_p1 = scmp.lt.s32.totalorder %s3041_s21, 3 }
   0x4   : > { %p209_p2 = pnand %p2305_p0, %p208_p1 }
   0x6   : > { %212 = sbr.rel (%p209_p2) target bundleno = 716 (0x2cc), region = 36 }
   0xb   : > { %s2306_s23 = sshll.u32 %s2301_s22, 5  ;;  %v3104_v0 = vld [vmem:[%s5055_s1] ss:$0 sm:$0xff]  ;;  %vm425_vm0 = vcmask 1040384   ;;  %vm584_vm1 = vcmask 1046528   ;;  %v5061_v51 = vmov 0.0  }
   0xc   : > { %p239_p3 = scmp.lt.s32.totalorder %s2306_s23, 63  ;;  %5163 = vst [vmem:[#allocation2_spill] sm:$0xff] %v3104_v0  ;;  %v3116_v1 = vld [vmem:[%s5056_s2] ss:$0 sm:$0xff]  ;;  %v3165_v52 = vrot.slane %v5061_v51, 1  ;;  %s3044_s8 = smov 4  }
   0xd   : > { %5164 = vst [vmem:[#allocation3_spill] sm:$0xff] %v3116_v1  ;;  %vm755_vm2 = vcmask 1045504   ;;  %s3045_s9 = smov 8   ;;  %s3046_s10 = smov 12   ;;  %vm1852_vm3 = vcmask 1041408   ;;  %vm1505_vm4 = vcmask 31744  }
   0xe   : > { %s5350_s23 = smov (!%p239_p3, %s2306_s23), 63  ;;  %5170 = vst [vmem:[#allocation9_spill] sm:$0xff] %v3165_v52  ;;  %s3047_s11 = smov 16   ;;  %vm1537_vm5 = vcmask 64512   ;;  %vm1569_vm6 = vcmask 97280   ;;  %vm1602_vm7 = vcmask 130048  }
   0xf   : > { %s2307_s24 = sshll.u32 %s5350_s23, 3  ;;  %s3048_s12 = smov 20   ;;  %vm1635_vm8 = vcmask 162816   ;;  %vm1668_vm9 = vcmask 195584   ;;  %vm1701_vm10 = vcmask 228352   ;;  %vm1734_vm11 = vcmask 261120  }
  0x10   : > { %s3111_s29 = scalar_lea.vmem %s5054_s0, %s2307_s24  ;;  %s3049_s13 = smov 24   ;;  %vm1803_vm12 = vcmask 293888  }
  0x11   : > { %v253_v2 = vld [vmem:[%s3111_s29 + $0x10] sm:$0xff]  ;;  %v254_v3 = vld [vmem:[%s3111_s29 + $0x18] sm:$0xff]  ;;  %v255_v4 = vld [vmem:[%s3111_s29 + $0x20] sm:$0xff]  ;;  %s3050_s18 = smov 28   ;;  %s3051_s25 = smov 32  }
  0x12   : > { %v256_v5 = vld [vmem:[%s3111_s29 + $0x28] sm:$0xff]  ;;  %v292_v6 = vmul.f32 %v3104_v0, %v253_v2  ;;  %v293_v7 = vmul.f32 %v3104_v0, %v254_v3  ;;  %v294_v8 = vmul.f32 %v3104_v0, %v255_v4  ;;  %v251_v9 = vld [vmem:[%s3111_s29] sm:$0xff]  ;;  %v257_v14 = vld [vmem:[%s3111_s29 + $0x30] sm:$0xff]  ;;  %s4707_s28 = scalar_lea.vmem %s5058_s4, %s2307_s24  ;;  %p2331_p4 = scmp.ne.s32.totalorder %s2301_s22, 0 }
  0x13   : > { %v252_v10 = vld [vmem:[%s3111_s29 + $0x8] sm:$0xff]  ;;  %v295_v11 = vmul.f32 %v3104_v0, %v256_v5  ;;  %v290_v12 = vmul.f32 %v3104_v0, %v251_v9  ;;  %v258_v15 = vld [vmem:[%s3111_s29 + $0x38] sm:$0xff]  ;;  %v296_v19 = vmul.f32 %v3104_v0, %v257_v14  ;;  %v259_v61 = vld [vmem:[%s3111_s29 + $0x40] sm:$0xff] }
  0x14   : > { %v291_v13 = vmul.f32 %v3104_v0, %v252_v10  ;;  %v331_v16 = vadd.f32 %v3116_v1, %v292_v6  ;;  %v332_v17 = vadd.f32 %v3116_v1, %v293_v7  ;;  %v333_v18 = vadd.f32 %v3116_v1, %v294_v8  ;;  %v260_v4 = vld [vmem:[%s3111_s29 + $0x48] sm:$0xff]  ;;  %v261_v5 = vld [vmem:[%s3111_s29 + $0x50] sm:$0xff]  ;;  %v262_v10 = vld [vmem:[%s3111_s29 + $0x58] sm:$0xff] }
  0x15   : > { %v334_v20 = vadd.f32 %v3116_v1, %v295_v11  ;;  %v329_v21 = vadd.f32 %v3116_v1, %v290_v12  ;;  %v297_v23 = vmul.f32 %v3104_v0, %v258_v15  ;;  %v335_v27 = vadd.f32 %v3116_v1, %v296_v19 }
  0x16   : > { %v330_v22 = vadd.f32 %v3116_v1, %v291_v13  ;;  %v363_v24 = vmax.f32 %v331_v16, 0.0  ;;  %v364_v25 = vmax.f32 %v332_v17, 0.0  ;;  %v365_v26 = vmax.f32 %v333_v18, 0.0 }
  0x17   : > { %v366_v28 = vmax.f32 %v334_v20, 0.0  ;;  %v361_v29 = vmax.f32 %v329_v21, 0.0  ;;  %v336_v31 = vadd.f32 %v3116_v1, %v297_v23  ;;  %v367_v35 = vmax.f32 %v335_v27, 0.0  ;;  %v263_v23 = vld [vmem:[%s3111_s29 + $0x60] sm:$0xff] }
  0x18   : > { %v362_v30 = vmax.f32 %v330_v22, 0.0  ;;  %v429_v32 = vrot.slane %v363_v24, 7  ;;  %v430_v33 = vrot.slane %v364_v25, 7  ;;  %v432_v34 = vrot.slane %v365_v26, 7  ;;  %v264_v24 = vld [vmem:[%s3111_s29 + $0x68] sm:$0xff] }
  0x19   : > { %v433_v36 = vrot.slane %v366_v28, 7  ;;  %v426_v37 = vrot.slane %v361_v29, 7  ;;  %v368_v39 = vmax.f32 %v336_v31, 0.0  ;;  %v435_v43 = vrot.slane %v367_v35, 7  ;;  %v265_v29 = vld [vmem:[%s3111_s29 + $0x70] sm:$0xff] }
  0x1a   : > { %v427_v38 = vrot.slane %v362_v30, 7  ;;  %v3143_v40 = vsel %vm425_vm0, %v429_v32, %v430_v33  ;;  %v3146_v41 = vsel %vm425_vm0, 0.0, %v432_v34  ;;  %v3149_v42 = vsel %vm425_vm0, %v430_v33, 0.0 }
  0x1b   : > { %5165 = vst [vmem:[#allocation4_spill] sm:$0xff] %v3143_v40  ;;  %5166 = vst [vmem:[#allocation5_spill] sm:$0xff] %v3146_v41  ;;  %v3152_v44 = vsel %vm425_vm0, %v432_v34, %v433_v36  ;;  %v593_v45 = vrot.slane %v3143_v40, 1  ;;  %v595_v46 = vrot.slane %v3149_v42, 1  ;;  %v597_v47 = vrot.slane %v3146_v41, 1  ;;  %v266_v34 = vld [vmem:[%s3111_s29 + $0x78] sm:$0xff] }
  0x1c   : > { %5167 = vst [vmem:[#allocation6_spill] sm:$0xff] %v3152_v44  ;;  %v598_v48 = vrot.slane %v3152_v44, 1  ;;  %v3159_v49 = vsel %vm425_vm0, %v426_v37, %v427_v38  ;;  %v3162_v50 = vsel %vm425_vm0, 0.0, %v426_v37  ;;  %v3171_v54 = vsel %vm425_vm0, %v427_v38, 0.0 }
  0x1d   : > { %5168 = vst [vmem:[#allocation7_spill] sm:$0xff] %v3159_v49  ;;  %5169 = vst [vmem:[#allocation8_spill] sm:$0xff] %v3162_v50  ;;  %v3168_v53 = vsel %vm584_vm1, %v593_v45, %v595_v46  ;;  %v587_v55 = vrot.slane %v3162_v50, 1  ;;  %v588_v56 = vrot.slane %v3159_v49, 1  ;;  %v590_v58 = vrot.slane %v3171_v54, 1 }
  0x1e   : > { %5171 = vst [vmem:[#allocation10_spill] sm:$0xff] %v3168_v53  ;;  %v3176_v57 = vsel %vm584_vm1, %v597_v47, %v598_v48  ;;  %v436_v59 = vrot.slane %v368_v39, 7  ;;  %v3180_v60 = vsel %vm425_vm0, 0.0, %v435_v43  ;;  %v3189_v2 = vsel %vm425_vm0, %v433_v36, 0.0 }
  0x1f   : > { %5172 = vst [vmem:[#allocation11_spill] sm:$0xff] %v3176_v57  ;;  %v2427_v62 = vpack.i.bf16 %v3176_v57, %v3168_v53  ;;  %v3186_v63 = vsel %vm584_vm1, %v587_v55, %v588_v56  ;;  %v602_v3 = vrot.slane %v3180_v60, 1  ;;  %v3195_v6 = vsel %vm584_vm1, %v588_v56, %v590_v58 }
  0x20   : > { %5173 = vst [vmem:[#allocation12_spill] sm:$0xff] %v3186_v63  ;;  %5174 = vst [vmem:[#allocation13_spill] sm:$0xff] %v3195_v6  ;;  %v2417_v7 = vpack.i.bf16 %v3186_v63, %v3165_v52  ;;  %v3200_v8 = vsel %vm425_vm0, %v435_v43, %v436_v59  ;;  %v600_v9 = vrot.slane %v3189_v2, 1  ;;  %v3209_v13 = vsel %vm425_vm0, 0.0, %v429_v32 }
  0x21   : > { %2428 = vrot.lane.b32.xlu1 %v2427_v62, %s3044_s8  ;;  %v603_v12 = vrot.slane %v3200_v8, 1  ;;  %5175 = vst [vmem:[#allocation14_spill] sm:$0xff] %v3209_v13  ;;  %v298_v14 = vmul.f32 %v3104_v0, %v259_v61  ;;  %v592_v16 = vrot.slane %v3209_v13, 1  ;;  %v299_v17 = vmul.f32 %v3104_v0, %v260_v4 }
  0x22   : > { %2418 = vrot.lane.b32.xlu0 %v2417_v7, %s3044_s8  ;;  %v3214_v15 = vsel %vm584_vm1, %v598_v48, %v600_v9  ;;  %v300_v18 = vmul.f32 %v3104_v0, %v261_v5  ;;  %v301_v20 = vmul.f32 %v3104_v0, %v262_v10  ;;  %v3225_v22 = vsel %vm425_vm0, %v436_v59, 0.0 }
  0x23   : > { %5176 = vst [vmem:[#allocation15_spill] sm:$0xff] %v3214_v15  ;;  %v3220_v19 = vsel %vm584_vm1, %v602_v3, %v603_v12  ;;  %v337_v21 = vadd.f32 %v3116_v1, %v298_v14  ;;  %v3232_v26 = vsel %vm584_vm1, %v592_v16, %v593_v45  ;;  %v338_v27 = vadd.f32 %v3116_v1, %v299_v17 }
  0x24   : > { %5177 = vst [vmem:[#allocation16_spill] sm:$0xff] %v3220_v19  ;;  %v2432_v25 = vpack.i.bf16 %v3220_v19, %v3214_v15  ;;  %5178 = vst [vmem:[#allocation17_spill] sm:$0xff] %v3232_v26  ;;  %v339_v28 = vadd.f32 %v3116_v1, %v300_v18  ;;  %v2422_v30 = vpack.i.bf16 %v3232_v26, %v3195_v6  ;;  %v605_v33 = vrot.slane %v3225_v22, 1 }
  0x25   : > { %v340_v31 = vadd.f32 %v3116_v1, %v301_v20  ;;  %v369_v32 = vmax.f32 %v337_v21, 0.0  ;;  %v370_v35 = vmax.f32 %v338_v27, 0.0  ;;  %v302_v37 = vmul.f32 %v3104_v0, %v263_v23  ;;  %v267_v27 = vld [vmem:[%s3111_s29 + $0x80] sm:$0xff] }
  0x26   : > { %2433 = vrot.lane.b32.xlu1 %v2432_v25, %s3044_s8  ;;  %v371_v36 = vmax.f32 %v339_v28, 0.0  ;;  %v303_v38 = vmul.f32 %v3104_v0, %v264_v24  ;;  %2423 = vrot.lane.b32.xlu0 %v2422_v30, %s3044_s8  ;;  %v3247_v45 = vsel %vm584_vm1, %v603_v12, %v605_v33  ;;  %v304_v46 = vmul.f32 %v3104_v0, %v265_v29  ;;  %v268_v28 = vld [vmem:[%s3111_s29 + $0x88] sm:$0xff] }
  0x27   : > { %v372_v39 = vmax.f32 %v340_v31, 0.0  ;;  %v438_v43 = vrot.slane %v369_v32, 7  ;;  %5179 = vst [vmem:[#allocation18_spill] sm:$0xff] %v3247_v45  ;;  %v439_v47 = vrot.slane %v370_v35, 7  ;;  %v305_v55 = vmul.f32 %v3104_v0, %v266_v34 }
  0x28   : > { %v441_v48 = vrot.slane %v371_v36, 7  ;;  %v341_v56 = vadd.f32 %v3116_v1, %v302_v37  ;;  %v342_v61 = vadd.f32 %v3116_v1, %v303_v38  ;;  %v343_v62 = vadd.f32 %v3116_v1, %v304_v46 }
  0x29   : > { %v442_v58 = vrot.slane %v372_v39, 7  ;;  %v3253_v59 = vsel %vm425_vm0, 0.0, %v438_v43  ;;  %v3258_v3 = vsel %vm425_vm0, %v438_v43, %v439_v47  ;;  %v3264_v5 = vsel %vm425_vm0, %v439_v47, 0.0  ;;  %v269_v39 = vld [vmem:[%s3111_s29 + $0x90] sm:$0xff]  ;;  %v270_v43 = vld [vmem:[%s3111_s29 + $0x98] sm:$0xff] }
  0x2a   : > { %5180 = vst [vmem:[#allocation19_spill] sm:$0xff] %v3258_v3  ;;  %v3261_v4 = vsel %vm425_vm0, 0.0, %v441_v48  ;;  %v607_v7 = vrot.slane %v3253_v59, 1  ;;  %v608_v10 = vrot.slane %v3258_v3, 1  ;;  %v610_v12 = vrot.slane %v3264_v5, 1 }
  0x2b   : > { %v3268_v9 = vsel %vm425_vm0, %v441_v48, %v442_v58  ;;  %v612_v14 = vrot.slane %v3261_v4, 1  ;;  %v344_v17 = vadd.f32 %v3116_v1, %v305_v55  ;;  %v373_v18 = vmax.f32 %v341_v56, 0.0 }
  0x2c   : > { %v613_v16 = vrot.slane %v3268_v9, 1  ;;  %v374_v20 = vmax.f32 %v342_v61, 0.0  ;;  %v3276_v21 = vsel %vm584_vm1, %v608_v10, %v610_v12  ;;  %v3279_v23 = vsel %vm584_vm1, %v607_v7, %v608_v10 }
  0x2d   : > { %5181 = vst [vmem:[#allocation20_spill] sm:$0xff] %v3276_v21  ;;  %5182 = vst [vmem:[#allocation21_spill] sm:$0xff] %v3279_v23  ;;  %v375_v24 = vmax.f32 %v343_v62, 0.0  ;;  %v3282_v25 = vsel %vm425_vm0, %v442_v58, 0.0  ;;  %v2437_v30 = vpack.i.bf16 %v3279_v23, %v3247_v45  ;;  %v376_v31 = vmax.f32 %v344_v17, 0.0 }
  0x2e   : > { %v3287_v29 = vsel %vm584_vm1, %v612_v14, %v613_v16  ;;  %v444_v32 = vrot.slane %v373_v18, 7  ;;  %v445_v34 = vrot.slane %v374_v20, 7  ;;  %v615_v36 = vrot.slane %v3282_v25, 1 }
  0x2f   : > { %5183 = vst [vmem:[#allocation22_spill] sm:$0xff] %v3287_v29  ;;  %v2442_v33 = vpack.i.bf16 %v3287_v29, %v3276_v21  ;;  %v447_v35 = vrot.slane %v375_v24, 7  ;;  %2438 = vrot.lane.b32.xlu0 %v2437_v30, %s3044_s8  ;;  %v448_v37 = vrot.slane %v376_v31, 7  ;;  %v306_v46 = vmul.f32 %v3104_v0, %v267_v27 }
  0x30   : > { %v3296_v38 = vsel %vm425_vm0, 0.0, %v444_v32  ;;  %v307_v47 = vmul.f32 %v3104_v0, %v268_v28  ;;  %v3304_v48 = vsel %vm425_vm0, %v444_v32, %v445_v34  ;;  %v3310_v56 = vsel %vm425_vm0, %v445_v34, 0.0  ;;  %v271_v28 = vld [vmem:[%s3111_s29 + $0xa0] sm:$0xff]  ;;  %v272_v34 = vld [vmem:[%s3111_s29 + $0xa8] sm:$0xff] }
  0x31   : > { %2443 = vrot.lane.b32.xlu1 %v2442_v33, %s3044_s8  ;;  %5184 = vst [vmem:[#allocation23_spill] sm:$0xff] %v3304_v48  ;;  %v3307_v55 = vsel %vm425_vm0, 0.0, %v447_v35  ;;  %v3313_v58 = vsel %vm584_vm1, %v613_v16, %v615_v36  ;;  %v3316_v61 = vsel %vm425_vm0, %v447_v35, %v448_v37  ;;  %v618_v62 = vrot.slane %v3304_v48, 1  ;;  %v273_v35 = vld [vmem:[%s3111_s29 + $0xb0] sm:$0xff] }
  0x32   : > { %5185 = vst [vmem:[#allocation24_spill] sm:$0xff] %v3307_v55  ;;  %5186 = vst [vmem:[#allocation25_spill] sm:$0xff] %v3313_v58  ;;  %v620_v7 = vrot.slane %v3310_v56, 1  ;;  %v622_v10 = vrot.slane %v3307_v55, 1  ;;  %v623_v12 = vrot.slane %v3316_v61, 1  ;;  %v617_v14 = vrot.slane %v3296_v38, 1 }
  0x33   : > { %5187 = vst [vmem:[#allocation26_spill] sm:$0xff] %v3316_v61  ;;  %v308_v17 = vmul.f32 %v3104_v0, %v269_v39  ;;  %v309_v16 = vmul.f32 %v3104_v0, %v270_v43  ;;  %v345_v20 = vadd.f32 %v3116_v1, %v306_v46  ;;  %v346_v24 = vadd.f32 %v3116_v1, %v307_v47  ;;  %v274_v46 = vld [vmem:[%s3111_s29 + $0xb8] sm:$0xff] }
  0x34   : > { %v3326_v18 = vsel %vm584_vm1, %v618_v62, %v620_v7  ;;  %v3331_v27 = vsel %vm425_vm0, %v448_v37, 0.0  ;;  %v3335_v30 = vsel %vm584_vm1, %v622_v10, %v623_v12  ;;  %v3338_v31 = vsel %vm584_vm1, %v617_v14, %v618_v62 }
  0x35   : > { %5188 = vst [vmem:[#allocation27_spill] sm:$0xff] %v3326_v18  ;;  %5189 = vst [vmem:[#allocation28_spill] sm:$0xff] %v3335_v30  ;;  %v347_v32 = vadd.f32 %v3116_v1, %v308_v17  ;;  %v348_v33 = vadd.f32 %v3116_v1, %v309_v16  ;;  %v2452_v36 = vpack.i.bf16 %v3335_v30, %v3326_v18  ;;  %v377_v39 = vmax.f32 %v345_v20, 0.0 }
  0x36   : > { %5190 = vst [vmem:[#allocation29_spill] sm:$0xff] %v3338_v31  ;;  %v2447_v37 = vpack.i.bf16 %v3338_v31, %v3313_v58  ;;  %v378_v43 = vmax.f32 %v346_v24, 0.0  ;;  %v625_v62 = vrot.slane %v3331_v27, 1  ;;  %v310_v10 = vmul.f32 %v3104_v0, %v271_v28 }
  0x37   : > { %v379_v47 = vmax.f32 %v347_v32, 0.0  ;;  %v380_v7 = vmax.f32 %v348_v33, 0.0  ;;  %2453 = vrot.lane.b32.xlu1 %v2452_v36, %s3044_s8  ;;  %v450_v14 = vrot.slane %v377_v39, 7  ;;  %v311_v16 = vmul.f32 %v3104_v0, %v272_v34 }
  0x38   : > { %2448 = vrot.lane.b32.xlu0 %v2447_v37, %s3044_s8  ;;  %v451_v17 = vrot.slane %v378_v43, 7  ;;  %v312_v11 = vmul.f32 %v3104_v0, %v273_v35  ;;  %v3356_v24 = vsel %vm584_vm1, %v623_v12, %v625_v62  ;;  %v313_v32 = vmul.f32 %v3104_v0, %v274_v46 }
  0x39   : > { %v453_v51 = vrot.slane %v379_v47, 7  ;;  %v454_v20 = vrot.slane %v380_v7, 7  ;;  %5191 = vst [vmem:[#allocation30_spill] sm:$0xff] %v3356_v24  ;;  %v3366_v36 = vsel %vm425_vm0, 0.0, %v450_v14  ;;  %v349_v34 = vadd.f32 %v3116_v1, %v310_v10 }
  0x3a   : > { %v3360_v33 = vsel %vm425_vm0, %v450_v14, %v451_v17  ;;  %v3363_v28 = vsel %vm425_vm0, %v451_v17, 0.0  ;;  %5193 = vst [vmem:[#allocation32_spill] sm:$0xff] %v3366_v36  ;;  %v627_v47 = vrot.slane %v3366_v36, 1  ;;  %v350_v7 = vadd.f32 %v3116_v1, %v311_v16  ;;  %v275_v17 = vld [vmem:[%s3111_s29 + $0xc0] sm:$0xff]  ;;  %v276_v16 = vld [vmem:[%s3111_s29 + $0xc8] sm:$0xff] }
  0x3b   : > { %5192 = vst [vmem:[#allocation31_spill] sm:$0xff] %v3360_v33  ;;  %v3370_v35 = vsel %vm425_vm0, %v453_v51, %v454_v20  ;;  %v3373_v12 = vsel %vm425_vm0, 0.0, %v453_v51  ;;  %v628_v37 = vrot.slane %v3360_v33, 1  ;;  %v630_v39 = vrot.slane %v3363_v28, 1 }
  0x3c   : > { %5194 = vst [vmem:[#allocation33_spill] sm:$0xff] %v3370_v35  ;;  %5195 = vst [vmem:[#allocation34_spill] sm:$0xff] %v3373_v12  ;;  %v632_v43 = vrot.slane %v3373_v12, 1  ;;  %v633_v46 = vrot.slane %v3370_v35, 1  ;;  %v351_v51 = vadd.f32 %v3116_v1, %v312_v11  ;;  %v352_v10 = vadd.f32 %v3116_v1, %v313_v32 }
  0x3d   : > { %v3382_v62 = vsel %vm584_vm1, %v628_v37, %v630_v39  ;;  %v381_v14 = vmax.f32 %v349_v34, 0.0  ;;  %v3391_v30 = vsel %vm584_vm1, %v627_v47, %v628_v37  ;;  %v382_v18 = vmax.f32 %v350_v7, 0.0  ;;  %v277_v39 = vld [vmem:[%s3111_s29 + $0xd0] sm:$0xff] }
  0x3e   : > { %5196 = vst [vmem:[#allocation35_spill] sm:$0xff] %v3382_v62  ;;  %v3388_v52 = vsel %vm584_vm1, %v632_v43, %v633_v46  ;;  %5197 = vst [vmem:[#allocation36_spill] sm:$0xff] %v3391_v30  ;;  %v3394_v31 = vsel %vm425_vm0, %v454_v20, 0.0  ;;  %v2457_v32 = vpack.i.bf16 %v3391_v30, %v3356_v24  ;;  %v383_v34 = vmax.f32 %v351_v51, 0.0  ;;  %v279_v30 = vld [vmem:[%s3111_s29 + $0xe0] sm:$0xff] }
  0x3f   : > { %v3400_v11 = vpack.i.bf16 %v3388_v52, %v3382_v62  ;;  %v384_v43 = vmax.f32 %v352_v10, 0.0  ;;  %v456_v21 = vrot.slane %v381_v14, 7  ;;  %v457_v23 = vrot.slane %v382_v18, 7  ;;  %v278_v62 = vld [vmem:[%s3111_s29 + $0xd8] sm:$0xff] }
  0x40   : > { %v635_v37 = vrot.slane %v3394_v31, 1  ;;  %v314_v47 = vmul.f32 %v3104_v0, %v275_v17  ;;  %2458 = vrot.lane.b32.xlu0 %v2457_v32, %s3044_s8  ;;  %v459_v20 = vrot.slane %v383_v34, 7  ;;  %v315_v58 = vmul.f32 %v3104_v0, %v276_v16 }
  0x41   : > { %5198 = vst [vmem:[#allocation37_spill] sm:$0xff] %v3400_v11  ;;  %2463 = vrot.lane.b32.xlu1 %v3400_v11, %s3044_s8  ;;  %v460_v7 = vrot.slane %v384_v43, 7  ;;  %v316_v24 = vmul.f32 %v3104_v0, %v277_v39  ;;  %v3413_v51 = vsel %vm425_vm0, %v456_v21, %v457_v23  ;;  %v3416_v18 = vsel %vm425_vm0, %v457_v23, 0.0 }
  0x42   : > { %5199 = vst [vmem:[#allocation38_spill] sm:$0xff] %v3413_v51  ;;  %v3419_v10 = vsel %vm425_vm0, 0.0, %v456_v21  ;;  %v3422_v14 = vsel %vm584_vm1, %v633_v46, %v635_v37  ;;  %v3428_v16 = vsel %vm425_vm0, 0.0, %v459_v20  ;;  %v638_v39 = vrot.slane %v3413_v51, 1 }
  0x43   : > { %5200 = vst [vmem:[#allocation39_spill] sm:$0xff] %v3419_v10  ;;  %v3425_v17 = vsel %vm425_vm0, %v459_v20, %v460_v7  ;;  %v640_v32 = vrot.slane %v3416_v18, 1  ;;  %v642_v23 = vrot.slane %v3428_v16, 1  ;;  %v637_v21 = vrot.slane %v3419_v10, 1 }
  0x44   : > { %5201 = vst [vmem:[#allocation40_spill] sm:$0xff] %v3425_v17  ;;  %v643_v34 = vrot.slane %v3425_v17, 1  ;;  %v317_v46 = vmul.f32 %v3104_v0, %v278_v62  ;;  %v353_v37 = vadd.f32 %v3116_v1, %v314_v47  ;;  %v354_v20 = vadd.f32 %v3116_v1, %v315_v58 }
  0x45   : > { %v3437_v43 = vsel %vm584_vm1, %v638_v39, %v640_v32  ;;  %v355_v11 = vadd.f32 %v3116_v1, %v316_v24  ;;  %v3447_v15 = vsel %vm584_vm1, %v637_v21, %v638_v39  ;;  %v3451_v62 = vsel %vm425_vm0, %v460_v7, 0.0  ;;  %v280_v32 = vld [vmem:[%s3111_s29 + $0xe8] sm:$0xff] }
  0x46   : > { %v3444_v29 = vsel %vm584_vm1, %v642_v23, %v643_v34  ;;  %v356_v57 = vadd.f32 %v3116_v1, %v317_v46  ;;  %v3460_v58 = vpack.i.bf16 %v3447_v15, %v3422_v14  ;;  %v385_v24 = vmax.f32 %v353_v37, 0.0 }
  0x47   : > { %5202 = vst [vmem:[#allocation41_spill] sm:$0xff] %v3444_v29  ;;  %v3456_v47 = vpack.i.bf16 %v3444_v29, %v3437_v43  ;;  %v386_v23 = vmax.f32 %v354_v20, 0.0  ;;  %v387_v63 = vmax.f32 %v355_v11, 0.0  ;;  %v645_v39 = vrot.slane %v3451_v62, 1 }
  0x48   : > { %5204 = vst [vmem:[#allocation43_spill] sm:$0xff] %v3460_v58  ;;  %v388_v6 = vmax.f32 %v356_v57, 0.0  ;;  %v318_v21 = vmul.f32 %v3104_v0, %v279_v30  ;;  %2468 = vrot.lane.b32.xlu0 %v3460_v58, %s3044_s8  ;;  %v462_v7 = vrot.slane %v385_v24, 7  ;;  %v319_v45 = vmul.f32 %v3104_v0, %v280_v32 }
  0x49   : > { %5203 = vst [vmem:[#allocation42_spill] sm:$0xff] %v3456_v47  ;;  %2473 = vrot.lane.b32.xlu1 %v3456_v47, %s3044_s8  ;;  %v463_v46 = vrot.slane %v386_v23, 7  ;;  %v759_v19 = vrot.slane %v3159_v49, 2  ;;  %v465_v37 = vrot.slane %v387_v63, 7  ;;  %v3471_v57 = vsel %vm584_vm1, %v643_v34, %v645_v39 }
  0x4a   : > { %v466_v20 = vrot.slane %v388_v6, 7  ;;  %5205 = vst [vmem:[#allocation44_spill] sm:$0xff] %v3471_v57  ;;  %v357_v11 = vadd.f32 %v3116_v1, %v318_v21  ;;  %v3481_v24 = vsel %vm425_vm0, 0.0, %v462_v7  ;;  %v358_v32 = vadd.f32 %v3116_v1, %v319_v45 }
  0x4b   : > { %v3475_v30 = vsel %vm425_vm0, %v462_v7, %v463_v46  ;;  %v3478_v47 = vsel %vm425_vm0, %v463_v46, 0.0  ;;  %5207 = vst [vmem:[#allocation46_spill] sm:$0xff] %v3481_v24  ;;  %v3488_v63 = vsel %vm425_vm0, 0.0, %v465_v37  ;;  %v647_v46 = vrot.slane %v3481_v24, 1 }
  0x4c   : > { %5206 = vst [vmem:[#allocation45_spill] sm:$0xff] %v3475_v30  ;;  %v3485_v23 = vsel %vm425_vm0, %v465_v37, %v466_v20  ;;  %5208 = vst [vmem:[#allocation47_spill] sm:$0xff] %v3488_v63  ;;  %v648_v6 = vrot.slane %v3475_v30, 1  ;;  %v650_v34 = vrot.slane %v3478_v47, 1  ;;  %v652_v39 = vrot.slane %v3488_v63, 1 }
  0x4d   : > { %v653_v21 = vrot.slane %v3485_v23, 1  ;;  %v389_v7 = vmax.f32 %v357_v11, 0.0  ;;  %v390_v45 = vmax.f32 %v358_v32, 0.0  ;;  %v3499_v53 = vsel %vm425_vm0, %v466_v20, 0.0 }
  0x4e   : > { %v3496_v58 = vsel %vm584_vm1, %v648_v6, %v650_v34  ;;  %v761_v37 = vrot.slane %v3171_v54, 2  ;;  %v3506_v1 = vsel %vm584_vm1, %v647_v46, %v648_v6  ;;  %v655_v29 = vrot.slane %v3499_v53, 1 }
  0x4f   : > { %5209 = vst [vmem:[#allocation48_spill] sm:$0xff] %v3496_v58  ;;  %v3503_v26 = vsel %vm584_vm1, %v652_v39, %v653_v21  ;;  %5211 = vst [vmem:[#allocation50_spill] sm:$0xff] %v3506_v1  ;;  %v468_v0 = vrot.slane %v389_v7, 7  ;;  %v3515_v32 = vpack.i.bf16 %v3506_v1, %v3471_v57  ;;  %v469_v20 = vrot.slane %v390_v45, 7 }
  0x50   : > { %5210 = vst [vmem:[#allocation49_spill] sm:$0xff] %v3503_v26  ;;  %v3511_v11 = vpack.i.bf16 %v3503_v26, %v3496_v58  ;;  %v3518_v54 = vsel %vm755_vm2, %v759_v19, %v761_v37  ;;  %v3524_v6 = vsel %vm584_vm1, %v653_v21, %v655_v29  ;;  %v763_v39 = vrot.slane %v3209_v13, 2 }
  0x51   : > { %5213 = vst [vmem:[#allocation52_spill] sm:$0xff] %v3515_v32  ;;  %v3521_v34 = vsel %vm425_vm0, 0.0, %v468_v0  ;;  %5215 = vst [vmem:[#allocation54_spill] sm:$0xff] %v3524_v6  ;;  %v764_v46 = vrot.slane %v3143_v40, 2  ;;  %2478 = vrot.lane.b32.xlu0 %v3515_v32, %s3044_s8  ;;  %v3533_v7 = vsel %vm425_vm0, %v468_v0, %v469_v20  ;;  %v3536_v45 = vsel %vm425_vm0, %v469_v20, 0.0 }
  0x52   : > { %5212 = vst [vmem:[#allocation51_spill] sm:$0xff] %v3511_v11  ;;  %5214 = vst [vmem:[#allocation53_spill] sm:$0xff] %v3521_v34  ;;  %2483 = vrot.lane.b32.xlu1 %v3511_v11, %s3044_s8  ;;  %v657_v37 = vrot.slane %v3521_v34, 1  ;;  %v758_v29 = vrot.slane %v3162_v50, 2  ;;  %v658_v21 = vrot.slane %v3533_v7, 1  ;;  %v660_v26 = vrot.slane %v3536_v45, 1 }
  0x53   : > { %5216 = vst [vmem:[#allocation55_spill] sm:$0xff] %v3533_v7  ;;  %v3543_v58 = vsel %vm755_vm2, %v763_v39, %v764_v46  ;;  %v769_v11 = vrot.slane %v3152_v44, 2  ;;  %v766_v32 = vrot.slane %v3149_v42, 2  ;;  %v5217_v0 = vmov 0.0  }
  0x54   : > { %v3548_v1 = vrot.slane %v5217_v0, 2  ;;  %v771_v20 = vrot.slane %v3189_v2, 2  ;;  %v773_v57 = vrot.slane %v3180_v60, 2  ;;  %v659_v49 = vsel %vm584_vm1, %v657_v37, %v658_v21 }
  0x55   : > { %v661_v50 = vsel %vm584_vm1, %v658_v21, %v660_v26  ;;  %v3555_v40 = vsel %vm755_vm2, %v758_v29, %v759_v19  ;;  %v774_v39 = vrot.slane %v3200_v8, 2  ;;  %v2487_v42 = vpack.i.bf16 %v659_v49, %v3524_v6 }
  0x56   : > { %5218 = vst [vmem:[#allocation56_spill] sm:$0xff] %v3548_v1  ;;  %v3558_v13 = vpack.i.bf16 %v661_v50, %v659_v49  ;;  %722 = vrot.lane.b32.xlu1 %v661_v50, %s3044_s8  ;;  %v2497_v2 = vpack.i.bf16 %v3543_v58, %v3518_v54  ;;  %v3565_v0 = vsel %vm755_vm2, %v769_v11, %v771_v20  ;;  %v768_v19 = vrot.slane %v3146_v41, 2 }
  0x57   : > { %v3568_v37 = vsel %vm755_vm2, %v773_v57, %v774_v39  ;;  %v779_v26 = vrot.slane %v3258_v3, 2  ;;  %2488 = vrot.lane.b32.xlu0 %v2487_v42, %s3044_s8  ;;  %v2492_v50 = vpack.i.bf16 %v3555_v40, %v3548_v1  ;;  %v781_v49 = vrot.slane %v3264_v5, 2 }
  0x58   : > { %5219 = vst [vmem:[#allocation57_spill] sm:$0xff] %v3558_v13  ;;  %v783_v29 = vrot.slane %v3261_v4, 2  ;;  %v784_v21 = vrot.slane %v3268_v9, 2  ;;  %v3579_v20 = vsel %vm755_vm2, %v764_v46, %v766_v32  ;;  %v3582_v57 = vsel %vm755_vm2, %v768_v19, %v769_v11 }
  0x59   : > { %v776_v13 = vrot.slane %v3225_v22, 2  ;;  %v778_v6 = vrot.slane %v3253_v59, 2  ;;  %v2507_v5 = vpack.i.bf16 %v3568_v37, %v3565_v0  ;;  %v3590_v42 = vsel %vm755_vm2, %v779_v26, %v781_v49 }
  0x5a   : > { %2498 = vrot.lane.b32.xlu1 %v2497_v2, %s3045_s9  ;;  %v3593_v1 = vsel %vm755_vm2, %v783_v29, %v784_v21  ;;  %v789_v32 = vrot.slane %v3304_v48, 2  ;;  %v791_v11 = vrot.slane %v3310_v56, 2  ;;  %v793_v22 = vrot.slane %v3307_v55, 2 }
  0x5b   : > { %2493 = vrot.lane.b32.xlu0 %v2492_v50, %s3045_s9  ;;  %v2502_v46 = vpack.i.bf16 %v3582_v57, %v3579_v20  ;;  %v794_v2 = vrot.slane %v3316_v61, 2  ;;  %v786_v19 = vrot.slane %v3282_v25, 2  ;;  %v2517_v49 = vpack.i.bf16 %v3593_v1, %v3590_v42 }
  0x5c   : > { %v3606_v29 = vsel %vm755_vm2, %v774_v39, %v776_v13  ;;  %v3609_v48 = vsel %vm755_vm2, %v778_v6, %v779_v26  ;;  %v788_v56 = vrot.slane %v3296_v38, 2  ;;  %v799_v50 = vrot.slane %v3360_v33, 2 }
  0x5d   : > { %v801_v55 = vrot.slane %v3363_v28, 2  ;;  %v803_v61 = vrot.slane %v3373_v12, 2  ;;  %v804_v25 = vrot.slane %v3370_v35, 2  ;;  %v3618_v3 = vsel %vm755_vm2, %v789_v32, %v791_v11 }
  0x5e   : > { %2508 = vrot.lane.b32.xlu1 %v2507_v5, %s3045_s9  ;;  %5220 = vst [vmem:[#allocation58_spill] sm:$0xff] %v3618_v3  ;;  %v3621_v13 = vsel %vm755_vm2, %v793_v22, %v794_v2  ;;  %v2512_v6 = vpack.i.bf16 %v3609_v48, %v3606_v29  ;;  %v3627_v39 = vsel %vm755_vm2, %v784_v21, %v786_v19  ;;  %v796_v28 = vrot.slane %v3331_v27, 2 }
  0x5f   : > { %5221 = vst [vmem:[#allocation59_spill] sm:$0xff] %v3621_v13  ;;  %2503 = vrot.lane.b32.xlu0 %v2502_v46, %s3045_s9  ;;  %v3631_v26 = vsel %vm755_vm2, %v788_v56, %v789_v32  ;;  %v798_v5 = vrot.slane %v3366_v36, 2  ;;  %v809_v11 = vrot.slane %v3413_v51, 2  ;;  %v811_v22 = vrot.slane %v3416_v18, 2 }
  0x60   : > { %5222 = vst [vmem:[#allocation60_spill] sm:$0xff] %v3631_v26  ;;  %v2527_v46 = vpack.i.bf16 %v3621_v13, %v3618_v3  ;;  %v3640_v33 = vsel %vm755_vm2, %v799_v50, %v801_v55  ;;  %v805_v21 = vsel %vm755_vm2, %v803_v61, %v804_v25  ;;  %v813_v27 = vrot.slane %v3428_v16, 2 }
  0x61   : > { %5223 = vst [vmem:[#allocation61_spill] sm:$0xff] %v3640_v33  ;;  %v814_v32 = vrot.slane %v3425_v17, 2  ;;  %v2522_v19 = vpack.i.bf16 %v3631_v26, %v3627_v39  ;;  %v806_v18 = vrot.slane %v3394_v31, 2  ;;  %v2537_v56 = vpack.i.bf16 %v805_v21, %v3640_v33 }
  0x62   : > { %2518 = vrot.lane.b32.xlu1 %v2517_v49, %s3045_s9  ;;  %v808_v49 = vrot.slane %v3419_v10, 2  ;;  %v3652_v55 = vsel %vm755_vm2, %v794_v2, %v796_v28  ;;  %v3655_v61 = vsel %vm755_vm2, %v798_v5, %v799_v50  ;;  %v812_v13 = vsel %vm755_vm2, %v809_v11, %v811_v22 }
  0x63   : > { %2513 = vrot.lane.b32.xlu0 %v2512_v6, %s3045_s9  ;;  %5224 = vst [vmem:[#allocation62_spill] sm:$0xff] %v3652_v55  ;;  %v819_v6 = vrot.slane %v3475_v30, 2  ;;  %v821_v3 = vrot.slane %v3478_v47, 2  ;;  %v828_v31 = vrot.slane %v3521_v34, 2  ;;  %v829_v26 = vrot.slane %v3533_v7, 2 }
  0x64   : > { %v815_v33 = vsel %vm755_vm2, %v813_v27, %v814_v32  ;;  %v823_v2 = vrot.slane %v3488_v63, 2  ;;  %v824_v28 = vrot.slane %v3485_v23, 2  ;;  %v831_v50 = vrot.slane %v3536_v45, 2 }
  0x65   : > { %v2532_v5 = vpack.i.bf16 %v3655_v61, %v3652_v55  ;;  %v807_v22 = vsel %vm755_vm2, %v804_v25, %v806_v18  ;;  %v810_v47 = vsel %vm755_vm2, %v808_v49, %v809_v11  ;;  %v818_v7 = vrot.slane %v3481_v24, 2 }
  0x66   : > { %2528 = vrot.lane.b32.xlu1 %v2527_v46, %s3045_s9  ;;  %v816_v46 = vrot.slane %v3451_v62, 2  ;;  %v830_v27 = vsel %vm755_vm2, %v828_v31, %v829_v26  ;;  %v832_v34 = vsel %vm755_vm2, %v829_v26, %v831_v50  ;;  %v2547_v45 = vpack.i.bf16 %v815_v33, %v812_v13  ;;  %v5228_v50 = vld [vmem:[#allocation8_spill] sm:$0xff] }
  0x67   : > { %2523 = vrot.lane.b32.xlu0 %v2522_v19, %s3045_s9  ;;  %v3677_v30 = vpack.i.bf16 %v832_v34, %v830_v27  ;;  %v822_v19 = vsel %vm755_vm2, %v819_v6, %v821_v3  ;;  %v825_v55 = vsel %vm755_vm2, %v823_v2, %v824_v28  ;;  %v2542_v25 = vpack.i.bf16 %v810_v47, %v807_v22  ;;  %v5245_v3 = vld [vmem:[#allocation60_spill] sm:$0xff] }
  0x68   : > { %v817_v62 = vsel %vm755_vm2, %v814_v32, %v816_v46  ;;  %v820_v11 = vsel %vm755_vm2, %v818_v7, %v819_v6  ;;  %v826_v18 = vrot.slane %v3499_v53, 2  ;;  %v2557_v26 = vpack.i.bf16 %v825_v55, %v822_v19  ;;  %v5242_v32 = vld [vmem:[#allocation54_spill] sm:$0xff] }
  0x69   : > { %5225 = vst [vmem:[#allocation63_spill] sm:$0xff] %v3677_v30  ;;  %v2552_v49 = vpack.i.bf16 %v820_v11, %v817_v62  ;;  %v3692_v31 = vpack.i.bf16 %v3579_v20, %v3543_v58  ;;  %v3695_v7 = vpack.i.bf16 %v807_v22, %v805_v21  ;;  %v3704_v2 = vpack.i.bf16 %v3565_v0, %v3582_v57  ;;  %v5226_v58 = vld [vmem:[#allocation14_spill] sm:$0xff]  ;;  %v5227_v20 = vld [vmem:[#allocation4_spill] sm:$0xff]  ;;  %v5230_v57 = vld [vmem:[#allocation41_spill] sm:$0xff] }
  0x6a   : > { %2538 = vrot.lane.b32.xlu1 %v2537_v56, %s3045_s9  ;;  %v827_v56 = vsel %vm755_vm2, %v824_v28, %v826_v18  ;;  %v3709_v21 = vpack.i.bf16 %v5227_v20, %v5226_v58  ;;  %v3711_v28 = vpack.i.bf16 %v812_v13, %v810_v47  ;;  %v3718_v46 = vpack.i.bf16 %v3606_v29, %v3568_v37  ;;  %v5231_v13 = vld [vmem:[#allocation44_spill] sm:$0xff]  ;;  %v5252_v20 = vld [vmem:[#allocation17_spill] sm:$0xff] }
  0x6b   : > { %2533 = vrot.lane.b32.xlu0 %v2532_v5, %s3045_s9  ;;  %v2562_v53 = vpack.i.bf16 %v830_v27, %v827_v56  ;;  %v5229_v5 = vld [vmem:[#allocation7_spill] sm:$0xff]  ;;  %v3720_v0 = vpack.i.bf16 %v817_v62, %v815_v33  ;;  %v5232_v27 = vld [vmem:[#allocation50_spill] sm:$0xff]  ;;  %v3734_v37 = vpack.i.bf16 %v3590_v42, %v3609_v48  ;;  %v3739_v33 = vpack.i.bf16 %v3152_v44, %v3146_v41  ;;  %v281_v29 = vld [vmem:[%s3111_s29 + $0xf0] sm:$0xff] }
  0x6c   : > { %v2567_v22 = vpack.i.bf16 %v5229_v5, %v5228_v50  ;;  %v282_v62 = vld [vmem:[%s3111_s29 + $0xf8] sm:$0xff]  ;;  %v3743_v18 = vpack.i.bf16 %v822_v19, %v820_v11  ;;  %v3753_v48 = vpack.i.bf16 %v3268_v9, %v3261_v4  ;;  %v3755_v42 = vpack.i.bf16 %v827_v56, %v825_v55  ;;  %v5235_v19 = vld [vmem:[#allocation19_spill] sm:$0xff]  ;;  %v5237_v11 = vld [vmem:[#allocation26_spill] sm:$0xff] }
  0x6d   : > { %v5239_v55 = vld [vmem:[#allocation3_spill] sm:$0xff]  ;;  %v3783_v47 = vpack.i.bf16 %v3370_v35, %v3373_v12  ;;  %v5253_v41 = vld [vmem:[#allocation10_spill] sm:$0xff] }
  0x6e   : > { %2548 = vrot.lane.b32.xlu1 %v2547_v45, %s3045_s9  ;;  %v5233_v45 = vld [vmem:[#allocation48_spill] sm:$0xff]  ;;  %v5251_v50 = vld [vmem:[#allocation55_spill] sm:$0xff] }
  0x6f   : > { %2543 = vrot.lane.b32.xlu0 %v2542_v25, %s3045_s9 }
  0x72   : > { %2558 = vrot.lane.b32.xlu1 %v2557_v26, %s3045_s9  ;;  %v3747_v26 = vpack.i.bf16 %v3627_v39, %v3593_v1  ;;  %v3763_v1 = vpack.i.bf16 %v5235_v19, %v3253_v59  ;;  %v5236_v39 = vld [vmem:[#allocation24_spill] sm:$0xff] }
  0x73   : > { %2553 = vrot.lane.b32.xlu0 %v2552_v49, %s3045_s9  ;;  %v5234_v49 = vld [vmem:[#allocation2_spill] sm:$0xff]  ;;  %v3769_v25 = vpack.i.bf16 %v5237_v11, %v5236_v39 }
  0x75   : > { %5238 = vst [vmem:[#allocation41_spill] sm:$0xff] %v3769_v25 }
  0x76   : > { %893 = vrot.lane.b32.xlu1 %v832_v34, %s3045_s9  ;;  %v3726_v34 = vpack.i.bf16 %v3200_v8, %v3180_v60 }
  0x77   : > { %2563 = vrot.lane.b32.xlu0 %v2562_v53, %s3045_s9  ;;  %v320_v53 = vmul.f32 %v5234_v49, %v281_v29 }
  0x79   : > { %v359_v56 = vadd.f32 %v5239_v55, %v320_v53 }
  0x7a   : > { %2573 = vrot.lane.b32.xlu1 %v3709_v21, %s3046_s10 }
  0x7b   : > { %2568 = vrot.lane.b32.xlu0 %v2567_v22, %s3046_s10  ;;  %v321_v22 = vmul.f32 %v5234_v49, %v282_v62  ;;  %v5240_v62 = vld [vmem:[#allocation23_spill] sm:$0xff]  ;;  %v391_v53 = vmax.f32 %v359_v56, 0.0  ;;  %v3803_v56 = vpack.i.bf16 %v3413_v51, %v3419_v10  ;;  %v5248_v10 = vld [vmem:[#allocation45_spill] sm:$0xff] }
  0x7c   : > { %v3777_v49 = vpack.i.bf16 %v5240_v62, %v3296_v38  ;;  %v3821_v51 = vpack.i.bf16 %v5248_v10, %v3481_v24 }
  0x7d   : > { %v360_v29 = vadd.f32 %v5239_v55, %v321_v22  ;;  %v5243_v22 = vld [vmem:[#allocation31_spill] sm:$0xff]  ;;  %v471_v35 = vrot.slane %v391_v53, 7 }
  0x7e   : > { %2583 = vrot.lane.b32.xlu1 %v3726_v34, %s3046_s10  ;;  %v3791_v55 = vpack.i.bf16 %v5243_v22, %v3366_v36  ;;  %v5246_v36 = vld [vmem:[#allocation58_spill] sm:$0xff] }
  0x7f   : > { %2578 = vrot.lane.b32.xlu0 %v3739_v33, %s3046_s10  ;;  %v392_v11 = vmax.f32 %v360_v29, 0.0  ;;  %v3809_v29 = vpack.i.bf16 %v3485_v23, %v3488_v63  ;;  %v3813_v22 = vpack.i.bf16 %v5246_v36, %v5245_v3  ;;  %v536_v53 = vsel %vm425_vm0, 0.0, %v471_v35 }
  0x80   : > { %5244 = vst [vmem:[#allocation44_spill] sm:$0xff] %v3791_v55 }
  0x81   : > { %v472_v12 = vrot.slane %v392_v11, 7  ;;  %5247 = vst [vmem:[#allocation50_spill] sm:$0xff] %v3813_v22  ;;  %v2652_v22 = vpack.i.bf16 %v5253_v41, %v5252_v20  ;;  %v5260_v41 = vld [vmem:[#allocation11_spill] sm:$0xff] }
  0x82   : > { %2593 = vrot.lane.b32.xlu1 %v3753_v48, %s3046_s10 }
  0x83   : > { %2588 = vrot.lane.b32.xlu0 %v3763_v1, %s3046_s10  ;;  %v473_v11 = vsel %vm425_vm0, %v471_v35, %v472_v12  ;;  %v552_v36 = vsel %vm425_vm0, %v472_v12, 0.0  ;;  %v5250_v35 = vld [vmem:[#allocation53_spill] sm:$0xff]  ;;  %v1125_v12 = vrot.slane %v536_v53, 2 }
  0x84   : > { %v1025_v39 = vrot.slane %v473_v11, 1  ;;  %v3825_v5 = vpack.i.bf16 %v473_v11, %v536_v53  ;;  %v1027_v3 = vrot.slane %v552_v36, 1  ;;  %v3832_v30 = vpack.i.bf16 %v5251_v50, %v5250_v35 }
  0x85   : > { %v1126_v6 = vrot.slane %v473_v11, 2 }
  0x86   : > { %2603 = vrot.lane.b32.xlu1 %v3769_v25, %s3046_s10  ;;  %v3797_v25 = vpack.i.bf16 %v3425_v17, %v3428_v16  ;;  %5249 = vst [vmem:[#allocation48_spill] sm:$0xff] %v3825_v5  ;;  %v1028_v44 = vsel %vm584_vm1, %v1025_v39, %v1027_v3  ;;  %v5255_v17 = vld [vmem:[#allocation16_spill] sm:$0xff]  ;;  %v5257_v3 = vld [vmem:[#allocation13_spill] sm:$0xff] }
  0x87   : > { %2598 = vrot.lane.b32.xlu0 %v3777_v49, %s3046_s10  ;;  %v1127_v20 = vsel %vm755_vm2, %v1125_v12, %v1126_v6 }
  0x8a   : > { %2613 = vrot.lane.b32.xlu1 %v3783_v47, %s3046_s10 }
  0x8b   : > { %2608 = vrot.lane.b32.xlu0 %v3791_v55, %s3046_s10  ;;  %v1024_v55 = vrot.slane %v536_v53, 1  ;;  %v5262_v53 = vld [vmem:[#allocation22_spill] sm:$0xff] }
  0x8d   : > { %v1026_v58 = vsel %vm584_vm1, %v1024_v55, %v1025_v39  ;;  %v5256_v55 = vld [vmem:[#allocation18_spill] sm:$0xff]  ;;  %v1128_v39 = vrot.slane %v552_v36, 2 }
  0x8e   : > { %2623 = vrot.lane.b32.xlu1 %v3797_v25, %s3046_s10  ;;  %v3840_v63 = vpack.i.bf16 %v1028_v44, %v1026_v58  ;;  %v3847_v24 = vpack.i.bf16 %v5256_v55, %v5255_v17  ;;  %v5261_v44 = vld [vmem:[#allocation15_spill] sm:$0xff] }
  0x8f   : > { %2618 = vrot.lane.b32.xlu0 %v3803_v56, %s3046_s10  ;;  %v2657_v58 = vpack.i.bf16 %v5261_v44, %v5260_v41  ;;  %v1129_v11 = vsel %vm755_vm2, %v1126_v6, %v1128_v39  ;;  %v5267_v6 = vld [vmem:[#allocation36_spill] sm:$0xff]  ;;  %v5268_v41 = vld [vmem:[#allocation37_spill] sm:$0xff] }
  0x90   : > { %5254 = vst [vmem:[#allocation2_spill] sm:$0xff] %v3840_v63  ;;  %v5263_v63 = vld [vmem:[#allocation25_spill] sm:$0xff]  ;;  %v3863_v36 = vpack.i.bf16 %v1129_v11, %v1127_v20  ;;  %v5269_v11 = vpack.i.bf16 %v3518_v54, %v3555_v40 }
  0x91   : > { %v3861_v17 = vpack.i.bf16 %v5263_v63, %v5262_v53  ;;  %v5266_v63 = vld [vmem:[#allocation29_spill] sm:$0xff]  ;;  %v5270_v53 = vld [vmem:[#allocation43_spill] sm:$0xff] }
  0x92   : > { %2633 = vrot.lane.b32.xlu1 %v3809_v29, %s3046_s10  ;;  %v2677_v39 = vpack.i.bf16 %v5267_v6, %v5266_v63 }
  0x93   : > { %2628 = vrot.lane.b32.xlu0 %v3821_v51, %s3046_s10 }
  0x94   : > { %v3872_v12 = vpop.permute.xlu0 %2418 }
  0x96   : > { %2643 = vrot.lane.b32.xlu1 %v3825_v5, %s3046_s10  ;;  %v5258_v5 = vld [vmem:[#allocation12_spill] sm:$0xff] }
  0x97   : > { %2638 = vrot.lane.b32.xlu0 %v3832_v30, %s3046_s10  ;;  %v5259_v10 = vpack.i.bf16 %v5257_v3, %v5258_v5  ;;  %v5264_v5 = vld [vmem:[#allocation21_spill] sm:$0xff]  ;;  %v3870_v3 = vpop.permute.xlu1 %2428 }
  0x98   : > { %v3884_v20 = vpop.permute.xlu0 %2423 }
  0x9a   : > { %2653 = vrot.lane.b32.xlu1 %v2652_v22, %s3047_s11 }
  0x9b   : > { %2648 = vrot.lane.b32.xlu0 %v5259_v10, %s3047_s11  ;;  %v5265_v10 = vld [vmem:[#allocation20_spill] sm:$0xff]  ;;  %v3882_v44 = vpop.permute.xlu1 %2433 }
  0x9c   : > { %v3868_v55 = vpack.i.bf16 %v5265_v10, %v5264_v5  ;;  %v5271_v5 = vld [vmem:[#allocation61_spill] sm:$0xff] }
  0x9d   : > { %v3895_v10 = vpack.i.bf16 %v5271_v5, %v3655_v61  ;;  %v3032_v61 = vld [vmem:[%s5057_s3 + $0x10] ss:$0 sps:$4 sm:$0x33]  }
  0x9e   : > { %2663 = vrot.lane.b32.xlu1 %v3847_v24, %s3047_s11  ;;  %2397 = vmatprep.subr.msk.bf16.mxu0 %vm1852_vm3, %v3032_v61 }
  0x9f   : > { %2658 = vrot.lane.b32.xlu0 %v2657_v58, %s3047_s11  ;;  %5272 = vst [vmem:[#allocation19_spill] sm:$0xff] %v3895_v10  ;;  %2398 = vmatprep.subr.msk.bf16.mxu1 %vm1852_vm3, %v3032_v61 }
  0xa1   : > { %v3899_v6 = vpop.permute.xlu0 %2438 }
  0xa2   : > { %2673 = vrot.lane.b32.xlu1 %v3861_v17, %s3047_s11 }
  0xa3   : > { %2668 = vrot.lane.b32.xlu0 %v3868_v55, %s3047_s11 }
  0xa6   : > { %2683 = vrot.lane.b32.xlu1 %v5268_v41, %s3047_s11  ;;  %v3897_v41 = vpop.permute.xlu1 %2443 }
  0xa7   : > { %2678 = vrot.lane.b32.xlu0 %v2677_v39, %s3047_s11  ;;  %v1854_v39 = vsel %vm1852_vm3, %v3032_v61, 0 }
  0xa8   : > { %2354 = vmatpush3.bf16.msra.mxu0 %v1854_v39  ;;  %2394 = vmatpush3.bf16.msra.mxu1 %v1854_v39  ;;  %v5277_v39 = vld [vmem:[#allocation42_spill] sm:$0xff] }
  0xaa   : > { %2693 = vrot.lane.b32.xlu1 %v5269_v11, %s3048_s12  ;;  %v3907_v40 = vpop.permute.xlu1 %2453  ;;  %v3909_v54 = vpop.permute.xlu0 %2448 }
  0xab   : > { %2688 = vrot.lane.b32.xlu0 %v5270_v53, %s3047_s11 }
  0xae   : > { %2703 = vrot.lane.b32.xlu1 %v3692_v31, %s3048_s12 }
  0xaf   : > { %2698 = vrot.lane.b32.xlu0 %v3895_v10, %s3048_s12 }
  0xb2   : > { %2713 = vrot.lane.b32.xlu1 %v3709_v21, %s3049_s13  ;;  %v3033_v21 = vld [vmem:[%s5057_s3 + $0x8] sm:$0xff]   ;;  %v3925_v53 = vpop.permute.xlu0 %2458 }
  0xb3   : > { %2708 = vrot.lane.b32.xlu0 %v3695_v7, %s3048_s12  ;;  %v3923_v11 = vpop.permute.xlu1 %2463  ;;  %5273 = vst [vmem:[#allocation3_spill] sm:$0xff] %v3925_v53  ;;  %2355 = vmatprep.subr.bf16.mxu0 %v3033_v21 }
  0xb4   : > { %2392 = vmatprep.subr.bf16.mxu1 %v3033_v21  ;;  %2356 = vmatpush3.bf16.msra.mxu0 %v3033_v21 }
  0xb5   : > { %2395 = vmatpush3.bf16.msra.mxu1 %v3033_v21 }
  0xb6   : > { %2723 = vrot.lane.b32.xlu1 %v3739_v33, %s3049_s13  ;;  %v3034_v33 = vld [vmem:[%s5057_s3] sm:$0xff]  }
  0xb7   : > { %2718 = vrot.lane.b32.xlu0 %v3783_v47, %s3049_s13  ;;  %2357 = vmatprep.subr.bf16.mxu0 %v3034_v33 }
  0xb8   : > { %2393 = vmatprep.subr.bf16.mxu1 %v3034_v33  ;;  %2358 = vmatpush3.bf16.msra.mxu0 %v3034_v33 }
  0xb9   : > { %2396 = vmatpush3.bf16.msra.mxu1 %v3034_v33 }
  0xba   : > { %2733 = vrot.lane.b32.xlu1 %v2652_v22, %s3050_s18  ;;  %v3936_v5 = vpop.permute.xlu0 %2468  ;;  %v5275_v22 = vpack.i.bf16 %v3422_v14, %v3388_v52 }
  0xbb   : > { %2728 = vrot.lane.b32.xlu0 %v3803_v56, %s3049_s13  ;;  %v3934_v47 = vpop.permute.xlu1 %2473  ;;  %5274 = vst [vmem:[#allocation23_spill] sm:$0xff] %v3936_v5  ;;  %v5276_v56 = vpack.i.bf16 %v3437_v43, %v3447_v15 }
  0xbe   : > { %2743 = vrot.lane.b32.xlu1 %v2657_v58, %s3050_s18 }
  0xbf   : > { %2738 = vrot.lane.b32.xlu0 %v5275_v22, %s3050_s18 }
  0xc2   : > { %2753 = vrot.lane.b32.xlu1 %v3692_v31, %s3051_s25  ;;  %v5279_v31 = vld [vmem:[#allocation52_spill] sm:$0xff] }
  0xc3   : > { %2748 = vrot.lane.b32.xlu0 %v5276_v56, %s3050_s18  ;;  %v3950_v61 = vpop.permute.xlu0 %2478 }
  0xc4   : > { %v3948_v58 = vpop.permute.xlu1 %2483 }
  0xc6   : > { %2763 = vrot.lane.b32.xlu1 %v3704_v2, %s3051_s25 }
  0xc7   : > { %2758 = vrot.lane.b32.xlu0 %v3695_v7, %s3051_s25 }
  0xc8   : > { %v723_v52 = vpop.permute.xlu1 %722 }
  0xc9   : > { %v2489_v14 = vpop.permute.xlu0 %2488 }
  0xca   : > { %2773 = vrot.lane.b32.xlu1 %v5277_v39, %s3047_s11 }
  0xcb   : > { %2768 = vrot.lane.b32.xlu0 %v3711_v28, %s3051_s25 }
  0xcc   : > { %v3960_v15 = vpop.permute.xlu1 %2498 }
  0xcd   : > { %v3962_v43 = vpop.permute.xlu0 %2493 }
  0xce   : > { %5278 = vst [vmem:[#allocation54_spill] sm:$0xff] %v3962_v43  ;;  %2783 = vrot.lane.b32.xlu1 %v3704_v2, %s3048_s12  ;;  %v2450_v43 = vunpack.i.l.bf16 %v3909_v54 }
  0xcf   : > { %2778 = vrot.lane.b32.xlu0 %v5279_v31, %s3047_s11 }
  0xd0   : > { %v3968_v21 = vpop.permute.xlu1 %2508 }
  0xd1   : > { %v3970_v7 = vpop.permute.xlu0 %2503  ;;  %v2511_v53 = vunpack.i.h.bf16 %v3968_v21 }
  0xd2   : > { %2793 = vrot.lane.b32.xlu1 %v3718_v46, %s3048_s12 }
  0xd3   : > { %2788 = vrot.lane.b32.xlu0 %v3711_v28, %s3048_s12 }
  0xd4   : > { %v3976_v33 = vpop.permute.xlu1 %2518 }
  0xd5   : > { %v3978_v22 = vpop.permute.xlu0 %2513 }
  0xd6   : > { %2803 = vrot.lane.b32.xlu1 %v3726_v34, %s3049_s13 }
  0xd7   : > { %2798 = vrot.lane.b32.xlu0 %v3720_v0, %s3048_s12 }
  0xd8   : > { %v3984_v2 = vpop.permute.xlu1 %2528 }
  0xd9   : > { %v3986_v56 = vpop.permute.xlu0 %2523 }
  0xda   : > { %2813 = vrot.lane.b32.xlu1 %v3763_v1, %s3049_s13 }
  0xdb   : > { %2808 = vrot.lane.b32.xlu0 %v3797_v25, %s3049_s13  ;;  %v5283_v25 = vpack.i.bf16 %v5231_v13, %v5230_v57 }
  0xdc   : > { %v3992_v28 = vpop.permute.xlu1 %2538 }
  0xdd   : > { %5280 = vst [vmem:[#allocation60_spill] sm:$0xff] %v3992_v28  ;;  %v3994_v39 = vpop.permute.xlu0 %2533 }
  0xde   : > { %5281 = vst [vmem:[#allocation58_spill] sm:$0xff] %v3994_v39  ;;  %2823 = vrot.lane.b32.xlu1 %v3847_v24, %s3050_s18  ;;  %v2491_v24 = vunpack.i.h.bf16 %v2489_v14 }
  0xdf   : > { %2818 = vrot.lane.b32.xlu0 %v3821_v51, %s3049_s13  ;;  %v1536_v51 = vsel %vm1505_vm4, %v5251_v50, %v723_v52 }
  0xe0   : > { %v4000_v34 = vpop.permute.xlu1 %2548  ;;  %v1535_v50 = vsel %vm1505_vm4, %v5250_v35, %v2491_v24  ;;  %v2436_v35 = vunpack.i.h.bf16 %v3882_v44  ;;  %v5288_v24 = vld [vmem:[#allocation27_spill] sm:$0xff] }
  0xe1   : > { %v4002_v31 = vpop.permute.xlu0 %2543 }
  0xe2   : > { %5282 = vst [vmem:[#allocation53_spill] sm:$0xff] %v4002_v31  ;;  %2833 = vrot.lane.b32.xlu1 %v3868_v55, %s3050_s18  ;;  %v2490_v31 = vunpack.i.l.bf16 %v2489_v14  ;;  %v5284_v55 = vpack.i.bf16 %v5233_v45, %v5232_v27 }
  0xe3   : > { %2828 = vrot.lane.b32.xlu0 %v5283_v25, %s3050_s18 }
  0xe4   : > { %v4010_v1 = vpop.permute.xlu1 %2558  ;;  %v1534_v52 = vsel %vm1505_vm4, %v3485_v23, %v2490_v31  ;;  %v2441_v23 = vunpack.i.h.bf16 %v3899_v6  ;;  %v2440_v31 = vunpack.i.l.bf16 %v3899_v6 }
  0xe5   : > { %v4012_v5 = vpop.permute.xlu0 %2553 }
  0xe6   : > { %2843 = vrot.lane.b32.xlu1 %v3718_v46, %s3051_s25  ;;  %v1514_v39 = vsel %vm1505_vm4, %v3200_v8, %v2440_v31  ;;  %v2526_v31 = vunpack.i.h.bf16 %v3986_v56 }
  0xe7   : > { %2838 = vrot.lane.b32.xlu0 %v5284_v55, %s3050_s18  ;;  %v5287_v55 = vld [vmem:[#allocation51_spill] sm:$0xff] }
  0xe8   : > { %v894_v57 = vpop.permute.xlu1 %893 }
  0xe9   : > { %v4023_v13 = vsel %vm1537_vm5, %v1536_v51, %v894_v57  ;;  %v2564_v25 = vpop.permute.xlu0 %2563  ;;  %v2867_v57 = vpack.i.bf16 %v5288_v24, %v5242_v32 }
  0xea   : > { %2853 = vrot.lane.b32.xlu1 %v3734_v37, %s3051_s25  ;;  %v2566_v46 = vunpack.i.h.bf16 %v2564_v25  ;;  %v2565_v10 = vunpack.i.l.bf16 %v2564_v25  ;;  %v2455_v25 = vunpack.i.l.bf16 %v3907_v40 }
  0xeb   : > { %2848 = vrot.lane.b32.xlu0 %v3720_v0, %s3051_s25  ;;  %v2445_v0 = vunpack.i.l.bf16 %v3897_v41 }
  0xec   : > { %v4033_v27 = vpop.permute.xlu1 %2573  ;;  %v4036_v45 = vsel %vm1537_vm5, %v1534_v52, %v2565_v10  ;;  %v4039_v14 = vsel %vm1537_vm5, %v1535_v50, %v2566_v46  ;;  %v2451_v46 = vunpack.i.h.bf16 %v3909_v54  ;;  %v2520_v50 = vunpack.i.l.bf16 %v3976_v33 }
  0xed   : > { %5285 = vst [vmem:[#allocation55_spill] sm:$0xff] %v4033_v27  ;;  %v4041_v51 = vpop.permute.xlu0 %2568  ;;  %v2516_v52 = vunpack.i.h.bf16 %v3978_v22  ;;  %v1515_v27 = vsel %vm1505_vm4, %v3253_v59, %v2441_v23  ;;  %v1516_v28 = vsel %vm1505_vm4, %v5235_v19, %v2445_v0  ;;  %v2530_v54 = vunpack.i.l.bf16 %v3984_v2 }
  0xee   : > { %5286 = vst [vmem:[#allocation17_spill] sm:$0xff] %v4041_v51  ;;  %2863 = vrot.lane.b32.xlu1 %v5287_v55, %s3047_s11  ;;  %v1513_v55 = vsel %vm1505_vm4, %v3180_v60, %v2436_v35  ;;  %v2446_v51 = vunpack.i.h.bf16 %v3897_v41  ;;  %v1520_v41 = vsel %vm1505_vm4, %v5240_v62, %v2455_v25  ;;  %v1519_v59 = vsel %vm1505_vm4, %v3296_v38, %v2451_v46 }
  0xef   : > { %2858 = vrot.lane.b32.xlu0 %v3743_v18, %s3051_s25  ;;  %v1548_v23 = vsel %vm1537_vm5, %v1516_v28, %v2520_v50  ;;  %v1547_v19 = vsel %vm1537_vm5, %v1515_v27, %v2516_v52  ;;  %v1545_v28 = vsel %vm1537_vm5, %v1513_v55, %v2511_v53  ;;  %v2521_v27 = vunpack.i.h.bf16 %v3976_v33 }
  0xf0   : > { %v4051_v10 = vpop.permute.xlu1 %2583  ;;  %v2525_v46 = vunpack.i.l.bf16 %v3986_v56  ;;  %v1517_v53 = vsel %vm1505_vm4, %v3261_v4, %v2446_v51  ;;  %v1518_v33 = vsel %vm1505_vm4, %v3268_v9, %v2450_v43  ;;  %v1552_v56 = vsel %vm1537_vm5, %v1520_v41, %v2530_v54 }
  0xf1   : > { %v4059_v6 = vpop.permute.xlu0 %2578  ;;  %v1549_v4 = vsel %vm1537_vm5, %v1517_v53, %v2521_v27 }
  0xf2   : > { %2873 = vrot.lane.b32.xlu1 %v3734_v37, %s3048_s12  ;;  %v2515_v37 = vunpack.i.l.bf16 %v3978_v22  ;;  %v1550_v9 = vsel %vm1537_vm5, %v1518_v33, %v2525_v46  ;;  %v2555_v46 = vunpack.i.l.bf16 %v4012_v5 }
  0xf3   : > { %2868 = vrot.lane.b32.xlu0 %v2867_v57, %s3047_s11 }
  0xf4   : > { %v2594_v60 = vpop.permute.xlu1 %2593  ;;  %v1546_v25 = vsel %vm1537_vm5, %v1514_v39, %v2515_v37  ;;  %v1551_v39 = vsel %vm1537_vm5, %v1519_v59, %v2526_v31  ;;  %v2476_v59 = vunpack.i.h.bf16 %v3934_v47  ;;  %v2485_v31 = vunpack.i.l.bf16 %v3948_v58 }
  0xf5   : > { %v2596_v35 = vunpack.i.h.bf16 %v2594_v60  ;;  %v2595_v8 = vunpack.i.l.bf16 %v2594_v60  ;;  %v2589_v22 = vpop.permute.xlu0 %2588 }
  0xf6   : > { %2883 = vrot.lane.b32.xlu1 %v3747_v26, %s3048_s12  ;;  %v2591_v38 = vunpack.i.h.bf16 %v2589_v22  ;;  %v2590_v57 = vunpack.i.l.bf16 %v2589_v22  ;;  %v2481_v22 = vunpack.i.h.bf16 %v3950_v61 }
  0xf7   : > { %v4087_v0 = vsel %vm1569_vm6, %v1547_v19, %v2595_v8  ;;  %v4090_v62 = vsel %vm1569_vm6, %v1548_v23, %v2596_v35  ;;  %2878 = vrot.lane.b32.xlu0 %v3743_v18, %s3048_s12 }
  0xf8   : > { %v2604_v50 = vpop.permute.xlu1 %2603  ;;  %v4099_v52 = vsel %vm1569_vm6, %v1545_v28, %v2590_v57  ;;  %v4102_v60 = vsel %vm1569_vm6, %v1546_v25, %v2591_v38  ;;  %v2480_v38 = vunpack.i.l.bf16 %v3950_v61  ;;  %v2560_v57 = vunpack.i.l.bf16 %v4010_v1 }
  0xf9   : > { %v2606_v35 = vunpack.i.h.bf16 %v2604_v50  ;;  %v2605_v8 = vunpack.i.l.bf16 %v2604_v50  ;;  %v2599_v18 = vpop.permute.xlu0 %2598  ;;  %v2556_v28 = vunpack.i.h.bf16 %v4012_v5  ;;  %v2551_v25 = vunpack.i.h.bf16 %v4000_v34  ;;  %v5291_v50 = vld [vmem:[#allocation45_spill] sm:$0xff] }
  0xfa   : > { %2893 = vrot.lane.b32.xlu1 %v3753_v48, %s3049_s13  ;;  %v2601_v23 = vunpack.i.h.bf16 %v2599_v18  ;;  %v2600_v19 = vunpack.i.l.bf16 %v2599_v18 }
  0xfb   : > { %v4113_v55 = vsel %vm1569_vm6, %v1551_v39, %v2605_v8  ;;  %v4116_v37 = vsel %vm1569_vm6, %v1552_v56, %v2606_v35  ;;  %2888 = vrot.lane.b32.xlu0 %v3755_v42, %s3048_s12  ;;  %v1532_v35 = vsel %vm1505_vm4, %v5291_v50, %v2485_v31  ;;  %v5292_v8 = vld [vmem:[#allocation46_spill] sm:$0xff] }
  0xfc   : > { %5289 = vst [vmem:[#allocation10_spill] sm:$0xff] %v4113_v55  ;;  %5290 = vst [vmem:[#allocation16_spill] sm:$0xff] %v4116_v37  ;;  %v4122_v43 = vpop.permute.xlu1 %2613  ;;  %v4125_v51 = vsel %vm1569_vm6, %v1549_v4, %v2600_v19  ;;  %v4128_v48 = vsel %vm1569_vm6, %v1550_v9, %v2601_v23  ;;  %v1564_v56 = vsel %vm1537_vm5, %v1532_v35, %v2560_v57  ;;  %v2561_v4 = vunpack.i.h.bf16 %v4010_v1 }
  0xfd   : > { %v4130_v41 = vpop.permute.xlu0 %2608  ;;  %v2430_v1 = vunpack.i.l.bf16 %v3870_v3 }
  0xfe   : > { %2903 = vrot.lane.b32.xlu1 %v3777_v49, %s3049_s13  ;;  %v2922_v49 = vpack.i.bf16 %v5288_v24, %v5266_v63  ;;  %v2486_v63 = vunpack.i.h.bf16 %v3948_v58  ;;  %v5293_v24 = vld [vmem:[#allocation40_spill] sm:$0xff] }
  0xff   : > { %2898 = vrot.lane.b32.xlu0 %v3809_v29, %s3049_s13  ;;  %v1529_v29 = vsel %vm1505_vm4, %v3428_v16, %v2476_v59  ;;  %v1530_v16 = vsel %vm1505_vm4, %v5293_v24, %v2480_v38  ;;  %v5294_v59 = vld [vmem:[#allocation49_spill] sm:$0xff] }
 0x100   : > { %v4137_v54 = vpop.permute.xlu1 %2623  ;;  %v1561_v58 = vsel %vm1537_vm5, %v1529_v29, %v2551_v25  ;;  %v1562_v9 = vsel %vm1537_vm5, %v1530_v16, %v2555_v46  ;;  %v5295_v31 = vpack.i.bf16 %v5242_v32, %v5294_v59  ;;  %v2431_v29 = vunpack.i.h.bf16 %v3870_v3  ;;  %v5296_v25 = vld [vmem:[#allocation47_spill] sm:$0xff] }
 0x101   : > { %v4144_v27 = vpop.permute.xlu0 %2618  ;;  %v1533_v46 = vsel %vm1505_vm4, %v5296_v25, %v2486_v63  ;;  %v2426_v3 = vunpack.i.h.bf16 %v3884_v20  ;;  %v2506_v63 = vunpack.i.h.bf16 %v3970_v7  ;;  %v2505_v16 = vunpack.i.l.bf16 %v3970_v7  ;;  %v5306_v7 = vld [vmem:[#allocation14_spill] sm:$0xff] }
 0x102   : > { %2913 = vrot.lane.b32.xlu1 %v3861_v17, %s3050_s18  ;;  %v1531_v17 = vsel %vm1505_vm4, %v5292_v8, %v2481_v22 }
 0x103   : > { %2908 = vrot.lane.b32.xlu0 %v3832_v30, %s3049_s13  ;;  %v1563_v5 = vsel %vm1537_vm5, %v1531_v17, %v2556_v28  ;;  %v2435_v17 = vunpack.i.l.bf16 %v3882_v44  ;;  %v2501_v44 = vunpack.i.h.bf16 %v3960_v15  ;;  %v1509_v59 = vsel %vm1505_vm4, %v5306_v7, %v2426_v3 }
 0x104   : > { %v2634_v61 = vpop.permute.xlu1 %2633 }
 0x105   : > { %v2636_v53 = vunpack.i.h.bf16 %v2634_v61  ;;  %v2635_v33 = vunpack.i.l.bf16 %v2634_v61  ;;  %v2629_v39 = vpop.permute.xlu0 %2628  ;;  %v1541_v25 = vsel %vm1537_vm5, %v1509_v59, %v2501_v44 }
 0x106   : > { %2923 = vrot.lane.b32.xlu1 %v2922_v49, %s3050_s18  ;;  %v2631_v23 = vunpack.i.h.bf16 %v2629_v39  ;;  %v2630_v19 = vunpack.i.l.bf16 %v2629_v39 }
 0x107   : > { %v4167_v30 = vsel %vm1569_vm6, %v1563_v5, %v2635_v33  ;;  %v4170_v18 = vsel %vm1569_vm6, %v1564_v56, %v2636_v53  ;;  %2918 = vrot.lane.b32.xlu0 %v5295_v31, %s3050_s18  ;;  %v1565_v53 = vsel %vm1537_vm5, %v1533_v46, %v2561_v4  ;;  %v5299_v33 = vld [vmem:[#allocation57_spill] sm:$0xff]  ;;  %v2586_v56 = vunpack.i.h.bf16 %v4051_v10  ;;  %v5305_v4 = vld [vmem:[#allocation6_spill] sm:$0xff] }
 0x108   : > { %v2644_v22 = vpop.permute.xlu1 %2643  ;;  %v4180_v38 = vsel %vm1569_vm6, %v1561_v58, %v2630_v19  ;;  %v4183_v57 = vsel %vm1569_vm6, %v1562_v9, %v2631_v23  ;;  %v2585_v5 = vunpack.i.l.bf16 %v4051_v10  ;;  %v5303_v23 = vld [vmem:[#allocation5_spill] sm:$0xff]  ;;  %v5304_v58 = vld [vmem:[#allocation4_spill] sm:$0xff]  ;;  %v1512_v9 = vsel %vm1505_vm4, %v5305_v4, %v2435_v17  ;;  %v5310_v4 = vld [vmem:[#allocation2_spill] sm:$0xff] }
 0x109   : > { %v2646_v28 = vunpack.i.h.bf16 %v2644_v22  ;;  %v2645_v49 = vunpack.i.l.bf16 %v2644_v22  ;;  %v2639_v61 = vpop.permute.xlu0 %2638  ;;  %v1511_v19 = vsel %vm1505_vm4, %v5303_v23, %v2431_v29  ;;  %v2581_v10 = vunpack.i.h.bf16 %v4059_v6 }
 0x10a   : > { %2933 = vrot.lane.b32.xlu1 %v3747_v26, %s3051_s25  ;;  %v2641_v35 = vunpack.i.h.bf16 %v2639_v61  ;;  %v2640_v8 = vunpack.i.l.bf16 %v2639_v61  ;;  %v2580_v31 = vunpack.i.l.bf16 %v4059_v6 }
 0x10b   : > { %v4193_v32 = vsel %vm1569_vm6, %v4023_v13, %v2646_v28  ;;  %v4197_v50 = vsel %vm1569_vm6, %v4039_v14, %v2645_v49  ;;  %2928 = vrot.lane.b32.xlu0 %v5299_v33, %s3050_s18  ;;  %v2510_v13 = vunpack.i.l.bf16 %v3968_v21  ;;  %v5302_v21 = vld [vmem:[#allocation50_spill] sm:$0xff]  ;;  %v1543_v49 = vsel %vm1537_vm5, %v1511_v19, %v2506_v63  ;;  %v5307_v63 = vld [vmem:[#allocation63_spill] sm:$0xff] }
 0x10c   : > { %5297 = vst [vmem:[#allocation18_spill] sm:$0xff] %v4193_v32  ;;  %5298 = vst [vmem:[#allocation13_spill] sm:$0xff] %v4197_v50  ;;  %v4204_v26 = vpop.permute.xlu1 %2653  ;;  %v4209_v14 = vsel %vm1569_vm6, %v1565_v53, %v2640_v8  ;;  %v4213_v24 = vsel %vm1569_vm6, %v4036_v45, %v2641_v35  ;;  %v1510_v45 = vsel %vm1505_vm4, %v5304_v58, %v2430_v1  ;;  %v2610_v50 = vunpack.i.l.bf16 %v4130_v41 }
 0x10d   : > { %5300 = vst [vmem:[#allocation12_spill] sm:$0xff] %v4209_v14  ;;  %5301 = vst [vmem:[#allocation11_spill] sm:$0xff] %v4213_v24  ;;  %v4219_v39 = vpop.permute.xlu0 %2648  ;;  %v1544_v28 = vsel %vm1537_vm5, %v1512_v9, %v2510_v13  ;;  %v1542_v46 = vsel %vm1537_vm5, %v1510_v45, %v2505_v16  ;;  %v1576_v61 = vsel %vm1569_vm6, %v1543_v49, %v2585_v5  ;;  %v5308_v16 = vld [vmem:[#allocation28_spill] sm:$0xff] }
 0x10e   : > { %2943 = vrot.lane.b32.xlu1 %v5302_v21, %s3051_s25  ;;  %v1577_v35 = vsel %vm1569_vm6, %v1544_v28, %v2586_v56  ;;  %v1574_v53 = vsel %vm1569_vm6, %v1541_v25, %v2580_v31  ;;  %v1575_v13 = vsel %vm1569_vm6, %v1542_v46, %v2581_v10  ;;  %v5309_v56 = vld [vmem:[#allocation30_spill] sm:$0xff]  ;;  %v2421_v25 = vunpack.i.h.bf16 %v3872_v12  ;;  %v5331_v24 = vld [vmem:[#allocation44_spill] sm:$0xff] }
 0x10f   : > { %2938 = vrot.lane.b32.xlu0 %v3755_v42, %s3051_s25  ;;  %v4255_v5 = vpack.i.bf16 %v5309_v56, %v5308_v16  ;;  %v5317_v56 = vld [vmem:[#allocation48_spill] sm:$0xff] }
 0x110   : > { %v2664_v22 = vpop.permute.xlu1 %2663 }
 0x111   : > { %v2666_v29 = vunpack.i.h.bf16 %v2664_v22  ;;  %v2665_v1 = vunpack.i.l.bf16 %v2664_v22  ;;  %v2659_v8 = vpop.permute.xlu0 %2658 }
 0x112   : > { %2953 = vrot.lane.b32.xlu1 %v5299_v33, %s3047_s11  ;;  %v2661_v17 = vunpack.i.h.bf16 %v2659_v8  ;;  %v2660_v3 = vunpack.i.l.bf16 %v2659_v8  ;;  %v2465_v8 = vunpack.i.l.bf16 %v3923_v11 }
 0x113   : > { %v4244_v42 = vsel %vm1602_vm7, %v1576_v61, %v2665_v1  ;;  %v4247_v6 = vsel %vm1602_vm7, %v1577_v35, %v2666_v29  ;;  %2948 = vrot.lane.b32.xlu0 %v5307_v63, %s3051_s25  ;;  %v5311_v29 = vld [vmem:[#allocation59_spill] sm:$0xff]  ;;  %v5312_v1 = vld [vmem:[#allocation62_spill] sm:$0xff]  ;;  %v2425_v61 = vunpack.i.l.bf16 %v3884_v20 }
 0x114   : > { %v2674_v44 = vpop.permute.xlu1 %2673  ;;  %v4258_v33 = vsel %vm1602_vm7, %v1574_v53, %v2660_v3  ;;  %v4261_v23 = vsel %vm1602_vm7, %v1575_v13, %v2661_v17  ;;  %v5314_v17 = vld [vmem:[#allocation3_spill] sm:$0xff] }
 0x115   : > { %v2676_v19 = vunpack.i.h.bf16 %v2674_v44  ;;  %v2675_v58 = vunpack.i.l.bf16 %v2674_v44  ;;  %v2669_v45 = vpop.permute.xlu0 %2668  ;;  %v2461_v3 = vunpack.i.h.bf16 %v5314_v17  ;;  %v2460_v13 = vunpack.i.l.bf16 %v5314_v17 }
 0x116   : > { %2963 = vrot.lane.b32.xlu1 %v5310_v4, %s3047_s11  ;;  %v2671_v59 = vunpack.i.h.bf16 %v2669_v45  ;;  %v2670_v10 = vunpack.i.l.bf16 %v2669_v45  ;;  %v5319_v45 = vld [vmem:[#allocation54_spill] sm:$0xff]  ;;  %v2531_v17 = vunpack.i.h.bf16 %v3984_v2 }
 0x117   : > { %v4267_v9 = vsel %vm1602_vm7, %v4087_v0, %v2675_v58  ;;  %v4271_v7 = vsel %vm1602_vm7, %v4090_v62, %v2676_v19  ;;  %2958 = vrot.lane.b32.xlu0 %v4255_v5, %s3047_s11  ;;  %v5318_v19 = vld [vmem:[#allocation24_spill] sm:$0xff] }
 0x118   : > { %v4275_v31 = vpop.permute.xlu1 %2683  ;;  %v4279_v22 = vsel %vm1602_vm7, %v4099_v52, %v2670_v10  ;;  %v4283_v28 = vsel %vm1602_vm7, %v4102_v60, %v2671_v59  ;;  %v4296_v52 = vpack.i.bf16 %v5312_v1, %v5311_v29  ;;  %v2420_v60 = vunpack.i.l.bf16 %v3872_v12  ;;  %v5320_v10 = vld [vmem:[#allocation36_spill] sm:$0xff]  ;;  %v5322_v1 = vld [vmem:[#allocation31_spill] sm:$0xff] }
 0x119   : > { %v4285_v0 = vpop.permute.xlu0 %2678  ;;  %v2495_v59 = vunpack.i.l.bf16 %v5319_v45 }
 0x11a   : > { %2973 = vrot.lane.b32.xlu1 %v5307_v63, %s3048_s12  ;;  %v2680_v62 = vunpack.i.l.bf16 %v4285_v0  ;;  %v1506_v20 = vsel %vm1505_vm4, 0.0, %v2420_v60  ;;  %v5316_v63 = vld [vmem:[#allocation7_spill] sm:$0xff]  ;;  %v5323_v60 = vld [vmem:[#allocation32_spill] sm:$0xff] }
 0x11b   : > { %2968 = vrot.lane.b32.xlu0 %v5302_v21, %s3048_s12  ;;  %v2456_v21 = vunpack.i.h.bf16 %v3907_v40  ;;  %v1508_v44 = vsel %vm1505_vm4, %v5316_v63, %v2425_v61  ;;  %v2500_v40 = vunpack.i.l.bf16 %v3960_v15  ;;  %v1523_v61 = vsel %vm1505_vm4, %v5323_v60, %v2461_v3 }
 0x11c   : > { %v4292_v49 = vpop.permute.xlu1 %2693  ;;  %v4302_v46 = vsel %vm1602_vm7, %v4125_v51, %v2680_v62  ;;  %v5315_v51 = vld [vmem:[#allocation8_spill] sm:$0xff]  ;;  %v5321_v62 = vld [vmem:[#allocation35_spill] sm:$0xff]  ;;  %v2496_v15 = vunpack.i.h.bf16 %v5319_v45 }
 0x11d   : > { %5313 = vst [vmem:[#allocation15_spill] sm:$0xff] %v4302_v46  ;;  %v4305_v35 = vpop.permute.xlu0 %2688  ;;  %v1507_v53 = vsel %vm1505_vm4, %v5315_v51, %v2421_v25  ;;  %v1521_v58 = vsel %vm1505_vm4, %v5318_v19, %v2456_v21  ;;  %v1524_v25 = vsel %vm1505_vm4, %v5322_v1, %v2465_v8  ;;  %v5324_v51 = vld [vmem:[#allocation41_spill] sm:$0xff]  ;;  %v5325_v21 = vld [vmem:[#allocation26_spill] sm:$0xff]  ;;  %v5326_v19 = vld [vmem:[#allocation60_spill] sm:$0xff]  ;;  %v1540_v3 = vsel %vm1537_vm5, %v1508_v44, %v2500_v40 }
 0x11e   : > { %2983 = vrot.lane.b32.xlu1 %v3863_v36, %s3048_s12  ;;  %v2540_v29 = vunpack.i.l.bf16 %v5326_v19  ;;  %v5327_v46 = vld [vmem:[#allocation58_spill] sm:$0xff]  ;;  %v5328_v1 = vld [vmem:[#allocation55_spill] sm:$0xff]  ;;  %v1539_v44 = vsel %vm1537_vm5, %v1507_v53, %v2496_v15  ;;  %v1553_v40 = vsel %vm1537_vm5, %v1521_v58, %v2531_v17  ;;  %v2611_v53 = vunpack.i.h.bf16 %v4130_v41 }
 0x11f   : > { %2978 = vrot.lane.b32.xlu0 %v4296_v52, %s3048_s12  ;;  %v2536_v32 = vunpack.i.h.bf16 %v5327_v46  ;;  %v2535_v8 = vunpack.i.l.bf16 %v5327_v46  ;;  %v2576_v45 = vunpack.i.h.bf16 %v5328_v1  ;;  %v2575_v2 = vunpack.i.l.bf16 %v5328_v1 }
 0x120   : > { %v4314_v12 = vpop.permute.xlu1 %2703  ;;  %v2615_v46 = vunpack.i.l.bf16 %v4122_v43  ;;  %v2616_v1 = vunpack.i.h.bf16 %v4122_v43  ;;  %v2656_v15 = vunpack.i.h.bf16 %v4204_v26  ;;  %v2655_v17 = vunpack.i.l.bf16 %v4204_v26 }
 0x121   : > { %v4323_v16 = vpop.permute.xlu0 %2698  ;;  %v1572_v58 = vsel %vm1569_vm6, %v1539_v44, %v2575_v2  ;;  %v1573_v43 = vsel %vm1569_vm6, %v1540_v3, %v2576_v45  ;;  %v1586_v26 = vsel %vm1569_vm6, %v1553_v40, %v2610_v50  ;;  %v2695_v3 = vunpack.i.l.bf16 %v4292_v49 }
 0x122   : > { %2993 = vrot.lane.b32.xlu1 %v5317_v56, %s3049_s13  ;;  %v1522_v56 = vsel %vm1505_vm4, %v5325_v21, %v2460_v13  ;;  %v1538_v13 = vsel %vm1537_vm5, %v1506_v20, %v2495_v59  ;;  %v5330_v21 = vld [vmem:[#allocation17_spill] sm:$0xff]  ;;  %v1556_v20 = vsel %vm1537_vm5, %v1524_v25, %v2540_v29  ;;  %v2650_v29 = vunpack.i.l.bf16 %v4219_v39 }
 0x123   : > { %2988 = vrot.lane.b32.xlu0 %v5324_v51, %s3049_s13  ;;  %v5329_v51 = vmov 0.0   ;;  %v2571_v55 = vunpack.i.h.bf16 %v5330_v21  ;;  %v2570_v37 = vunpack.i.l.bf16 %v5330_v21  ;;  %v1554_v59 = vsel %vm1537_vm5, %v1522_v56, %v2535_v8 }
 0x124   : > { %v4340_v63 = vpop.permute.xlu1 %2713  ;;  %v1555_v21 = vsel %vm1537_vm5, %v1523_v61, %v2536_v32  ;;  %v4385_v25 = vsel %vm1569_vm6, %v1556_v20, %v2616_v1  ;;  %v2651_v61 = vunpack.i.h.bf16 %v4219_v39  ;;  %v2685_v56 = vunpack.i.l.bf16 %v4275_v31 }
 0x125   : > { %v4350_v60 = vpop.permute.xlu0 %2708  ;;  %v1571_v32 = vsel %vm1569_vm6, %v1538_v13, %v2571_v55  ;;  %v4381_v41 = vsel %vm1569_vm6, %v1555_v21, %v2615_v46  ;;  %v1587_v55 = vsel %vm1569_vm6, %v1554_v59, %v2611_v53  ;;  %v2696_v8 = vunpack.i.h.bf16 %v4292_v49 }
 0x126   : > { %1286 = vrot.lane.b32.xlu1 %v5329_v51, %s3049_s13  ;;  %v1605_v45 = vsel %vm1602_vm7, %v1572_v58, %v2655_v17  ;;  %v1606_v50 = vsel %vm1602_vm7, %v1573_v43, %v2656_v15  ;;  %v2706_v39 = vunpack.i.h.bf16 %v4314_v12  ;;  %v2705_v2 = vunpack.i.l.bf16 %v4314_v12 }
 0x127   : > { %2998 = vrot.lane.b32.xlu0 %v5331_v24, %s3049_s13  ;;  %v1570_v24 = vsel %vm1569_vm6, %v1538_v13, %v2570_v37  ;;  %v2700_v44 = vunpack.i.l.bf16 %v4323_v16  ;;  %v2715_v49 = vunpack.i.l.bf16 %v4340_v63  ;;  %v1604_v40 = vsel %vm1602_vm7, %v1571_v32, %v2651_v61 }
 0x128   : > { %v4364_v51 = vpop.permute.xlu1 %2723  ;;  %v1603_v46 = vsel %vm1602_vm7, %v1570_v24, %v2650_v29  ;;  %v2686_v1 = vunpack.i.h.bf16 %v4275_v31  ;;  %v1620_v12 = vsel %vm1602_vm7, %v1587_v55, %v2685_v56  ;;  %v2716_v20 = vunpack.i.h.bf16 %v4340_v63 }
 0x129   : > { %v4374_v14 = vpop.permute.xlu0 %2718  ;;  %v5333_v59 = vpack.i.bf16 %v5321_v62, %v5320_v10  ;;  %v1637_v58 = vsel %vm1635_vm8, %v1604_v40, %v2696_v8  ;;  %v2690_v15 = vunpack.i.l.bf16 %v4305_v35  ;;  %v1638_v17 = vsel %vm1635_vm8, %v1605_v45, %v2705_v2 }
 0x12a   : > { %3008 = vrot.lane.b32.xlu1 %v5310_v4, %s3050_s18  ;;  %v2681_v4 = vunpack.i.h.bf16 %v4285_v0  ;;  %v2701_v0 = vunpack.i.h.bf16 %v4323_v16  ;;  %v1636_v16 = vsel %vm1635_vm8, %v1603_v46, %v2695_v3  ;;  %v1639_v24 = vsel %vm1635_vm8, %v1606_v50, %v2706_v39  ;;  %v5334_v46 = vld [vmem:[#allocation56_spill] sm:$0xff] }
 0x12b   : > { %3003 = vrot.lane.b32.xlu0 %v4255_v5, %s3050_s18  ;;  %v5332_v5 = vld [vmem:[#allocation9_spill] sm:$0xff]  ;;  %v1669_v29 = vsel %vm1668_vm9, %v1636_v16, %v2715_v49  ;;  %v1670_v61 = vsel %vm1668_vm9, %v1637_v58, %v2716_v20  ;;  %v2711_v56 = vunpack.i.h.bf16 %v4350_v60  ;;  %v2726_v55 = vunpack.i.h.bf16 %v4364_v51  ;;  %v5335_v20 = vld [vmem:[#allocation19_spill] sm:$0xff] }
 0x12c   : > { %v2734_v37 = vpop.permute.xlu1 %2733  ;;  %v1619_v53 = vsel %vm1602_vm7, %v1586_v26, %v2681_v4  ;;  %v1653_v62 = vsel %vm1635_vm8, %v1620_v12, %v2701_v0  ;;  %v2725_v26 = vunpack.i.l.bf16 %v4364_v51  ;;  %v2721_v4 = vunpack.i.h.bf16 %v4374_v14 }
 0x12d   : > { %v4400_v13 = vpop.permute.xlu0 %2728  ;;  %v2735_v43 = vunpack.i.l.bf16 %v2734_v37  ;;  %v2736_v63 = vunpack.i.h.bf16 %v2734_v37  ;;  %v1652_v10 = vsel %vm1635_vm8, %v1619_v53, %v2700_v44  ;;  %v2720_v37 = vunpack.i.l.bf16 %v4374_v14 }
 0x12e   : > { %1379 = vrot.lane.b32.xlu1 %v5332_v5, %s3050_s18  ;;  %v2710_v0 = vunpack.i.l.bf16 %v4350_v60  ;;  %v1672_v49 = vsel %vm1668_vm9, %v1639_v24, %v2726_v55  ;;  %v1686_v53 = vsel %vm1668_vm9, %v1653_v62, %v2721_v4  ;;  %v2731_v60 = vunpack.i.h.bf16 %v4400_v13 }
 0x12f   : > { %3013 = vrot.lane.b32.xlu0 %v5333_v59, %s3050_s18  ;;  %v1702_v45 = vsel %vm1701_vm10, %v1669_v29, %v2735_v43  ;;  %v1703_v51 = vsel %vm1701_vm10, %v1670_v61, %v2736_v63  ;;  %v1685_v40 = vsel %vm1668_vm9, %v1652_v10, %v2720_v37  ;;  %v2730_v43 = vunpack.i.l.bf16 %v4400_v13 }
 0x130   : > { %v2744_v21 = vpop.permute.xlu1 %2743  ;;  %v1621_v4 = vsel %vm1602_vm7, %v4381_v41, %v2686_v1 }
 0x131   : > { %v2739_v32 = vpop.permute.xlu0 %2738  ;;  %v2746_v50 = vunpack.i.h.bf16 %v2744_v21  ;;  %v2745_v39 = vunpack.i.l.bf16 %v2744_v21 }
 0x132   : > { %3023 = vrot.lane.b32.xlu1 %v3863_v36, %s3051_s25  ;;  %v2740_v2 = vunpack.i.l.bf16 %v2739_v32  ;;  %v2741_v12 = vunpack.i.h.bf16 %v2739_v32 }
 0x133   : > { %3018 = vrot.lane.b32.xlu0 %v4296_v52, %s3051_s25  ;;  %v1671_v52 = vsel %vm1668_vm9, %v1638_v17, %v2725_v26  ;;  %v1705_v24 = vsel %vm1701_vm10, %v1672_v49, %v2746_v50  ;;  %v1654_v50 = vsel %vm1635_vm8, %v1621_v4, %v2710_v0 }
 0x134   : > { %v2754_v36 = vpop.permute.xlu1 %2753  ;;  %v1704_v17 = vsel %vm1701_vm10, %v1671_v52, %v2745_v39  ;;  %v1718_v32 = vsel %vm1701_vm10, %v1685_v40, %v2740_v2  ;;  %v1719_v13 = vsel %vm1701_vm10, %v1686_v53, %v2741_v12  ;;  %v1687_v31 = vsel %vm1668_vm9, %v1654_v50, %v2730_v43  ;;  %v5337_v43 = vld [vmem:[#allocation53_spill] sm:$0xff] }
 0x135   : > { %v2756_v8 = vunpack.i.h.bf16 %v2754_v36  ;;  %v2755_v3 = vunpack.i.l.bf16 %v2754_v36  ;;  %v2749_v5 = vpop.permute.xlu0 %2748  ;;  %v2466_v12 = vunpack.i.h.bf16 %v3923_v11 }
 0x136   : > { %1472 = vrot.lane.b32.xlu1 %v5334_v46, %s3051_s25  ;;  %v2751_v61 = vunpack.i.h.bf16 %v2749_v5  ;;  %v2750_v55 = vunpack.i.l.bf16 %v2749_v5 }
 0x137   : > { %v1735_v44 = vsel %vm1734_vm11, %v1702_v45, %v2755_v3  ;;  %v1736_v14 = vsel %vm1734_vm11, %v1703_v51, %v2756_v8  ;;  %3028 = vrot.lane.b32.xlu0 %v5335_v20, %s3051_s25  ;;  %v1622_v8 = vsel %vm1602_vm7, %v4385_v25, %v2690_v15  ;;  %v2475_v20 = vunpack.i.l.bf16 %v3934_v47  ;;  %v5339_v47 = vld [vmem:[#allocation38_spill] sm:$0xff] }
 0x138   : > { %v2764_v59 = vpop.permute.xlu1 %2763  ;;  %v1767_v21 = vpack.c.bf16 %v1736_v14, %v1735_v44  ;;  %v1655_v39 = vsel %vm1635_vm8, %v1622_v8, %v2711_v56  ;;  %v1720_v25 = vsel %vm1701_vm10, %v1687_v31, %v2750_v55 }
 0x139   : > { %v2766_v16 = vunpack.i.h.bf16 %v2764_v59  ;;  %v2765_v58 = vunpack.i.l.bf16 %v2764_v59  ;;  %v2759_v63 = vpop.permute.xlu0 %2758  ;;  %v1688_v46 = vsel %vm1668_vm9, %v1655_v39, %v2731_v60 }
 0x13a   : > { %2359 = vmatprep.mubr.msk.bf16.mxu0 %vm1803_vm12, %v1767_v21  ;;  %v2761_v62 = vunpack.i.h.bf16 %v2759_v63  ;;  %v2760_v26 = vunpack.i.l.bf16 %v2759_v63  ;;  %v1721_v15 = vsel %vm1701_vm10, %v1688_v46, %v2751_v61  ;;  %v5336_v21 = vld [vmem:[#allocation23_spill] sm:$0xff]  ;;  %v2546_v63 = vunpack.i.h.bf16 %v5337_v43  ;;  %v5341_v61 = vld [vmem:[#allocation33_spill] sm:$0xff] }
 0x13b   : > { %v1737_v10 = vsel %vm1734_vm11, %v1704_v17, %v2765_v58  ;;  %v1738_v29 = vsel %vm1734_vm11, %v1705_v24, %v2766_v16  ;;  %v2471_v53 = vunpack.i.h.bf16 %v5336_v21  ;;  %v2470_v60 = vunpack.i.l.bf16 %v5336_v21 }
 0x13c   : > { %v1768_v37 = vpack.c.bf16 %v1738_v29, %v1737_v10  ;;  %v4456_v36 = vpop.permute.xlu1 %2773  ;;  %v1751_v3 = vsel %vm1734_vm11, %v1718_v32, %v2760_v26  ;;  %v1752_v45 = vsel %vm1734_vm11, %v1719_v13, %v2761_v62  ;;  %v2541_v16 = vunpack.i.h.bf16 %v5326_v19  ;;  %v5338_v32 = vld [vmem:[#allocation34_spill] sm:$0xff]  ;;  %v5340_v19 = vld [vmem:[#allocation39_spill] sm:$0xff] }
 0x13d   : > { %v2769_v2 = vpop.permute.xlu0 %2768  ;;  %v1775_v5 = vpack.c.bf16 %v1752_v45, %v1751_v3  ;;  %v2550_v58 = vunpack.i.l.bf16 %v4000_v34  ;;  %v2545_v17 = vunpack.i.l.bf16 %v5337_v43  ;;  %v1525_v11 = vsel %vm1505_vm4, %v5338_v32, %v2466_v12 }
 0x13e   : > { %2360 = vmatmul.mubr.msk.bf16.vlgmr.msra.gmra.mxu0 %vm1803_vm12, %v1768_v37  ;;  %v2771_v41 = vunpack.i.h.bf16 %v2769_v2  ;;  %v2770_v1 = vunpack.i.l.bf16 %v2769_v2  ;;  %v1528_v10 = vsel %vm1505_vm4, %v5339_v47, %v2475_v20  ;;  %v2626_v29 = vunpack.i.h.bf16 %v4137_v54 }
 0x13f   : > { %2375 = vmatprep.mubr.msk.bf16.mxu1 %vm1803_vm12, %v1775_v5  ;;  %v2625_v62 = vunpack.i.l.bf16 %v4137_v54  ;;  %v1527_v34 = vsel %vm1505_vm4, %v5340_v19, %v2471_v53  ;;  %v1526_v55 = vsel %vm1505_vm4, %v5341_v61, %v2470_v60  ;;  %v1557_v37 = vsel %vm1537_vm5, %v1525_v11, %v2541_v16 }
 0x140   : > { %v2784_v51 = vpop.permute.xlu1 %2783  ;;  %v1753_v0 = vsel %vm1734_vm11, %v1720_v25, %v2770_v1  ;;  %v1754_v56 = vsel %vm1734_vm11, %v1721_v15, %v2771_v41  ;;  %v2620_v13 = vunpack.i.l.bf16 %v4144_v27  ;;  %v1560_v4 = vsel %vm1537_vm5, %v1528_v10, %v2550_v58 }
 0x141   : > { %v1776_v52 = vpack.c.bf16 %v1754_v56, %v1753_v0  ;;  %v4477_v44 = vpop.permute.xlu0 %2778  ;;  %v1558_v8 = vsel %vm1537_vm5, %v1526_v55, %v2545_v17  ;;  %v2621_v3 = vunpack.i.h.bf16 %v4144_v27  ;;  %v2691_v54 = vunpack.i.h.bf16 %v4305_v35 }
 0x142   : > { %v1559_v50 = vsel %vm1537_vm5, %v1527_v34, %v2546_v63  ;;  %v2775_v39 = vunpack.i.l.bf16 %v4456_v36  ;;  %v2786_v2 = vunpack.i.h.bf16 %v2784_v51  ;;  %v2785_v5 = vunpack.i.l.bf16 %v2784_v51 }
 0x143   : > { %2376 = vmatmul.mubr.msk.bf16.vlgmr.msra.gmra.mxu1 %vm1803_vm12, %v1776_v52  ;;  %v4513_v31 = vsel %vm1569_vm6, %v1559_v50, %v2625_v62  ;;  %v4516_v46 = vsel %vm1569_vm6, %v1560_v4, %v2626_v29  ;;  %v1590_v27 = vsel %vm1569_vm6, %v1557_v37, %v2620_v13  ;;  %v1591_v56 = vsel %vm1569_vm6, %v1558_v8, %v2621_v3 }
 0x144   : > { %v2794_v14 = vpop.permute.xlu1 %2793  ;;  %v1623_v52 = vsel %vm1602_vm7, %v1590_v27, %v2691_v54  ;;  %v2776_v51 = vunpack.i.h.bf16 %v4456_v36  ;;  %v1624_v21 = vsel %vm1602_vm7, %v1591_v56, %v2775_v39  ;;  %v1641_v53 = vsel %vm1635_vm8, %v4261_v23, %v2786_v2 }
 0x145   : > { %v2789_v49 = vpop.permute.xlu0 %2788  ;;  %v2796_v41 = vunpack.i.h.bf16 %v2794_v14  ;;  %v2795_v1 = vunpack.i.l.bf16 %v2794_v14  ;;  %v1640_v14 = vsel %vm1635_vm8, %v4258_v33, %v2785_v5 }
 0x146   : > { %v2791_v35 = vunpack.i.h.bf16 %v2789_v49  ;;  %v2790_v15 = vunpack.i.l.bf16 %v2789_v49  ;;  %v2780_v49 = vunpack.i.l.bf16 %v4477_v44 }
 0x147   : > { %v1643_v16 = vsel %vm1635_vm8, %v4247_v6, %v2796_v41  ;;  %v1642_v58 = vsel %vm1635_vm8, %v4244_v42, %v2795_v1 }
 0x148   : > { %v2804_v40 = vpop.permute.xlu1 %2803  ;;  %v1656_v43 = vsel %vm1635_vm8, %v1623_v52, %v2790_v15  ;;  %v1657_v17 = vsel %vm1635_vm8, %v1624_v21, %v2791_v35 }
 0x149   : > { %v4482_v59 = vpop.permute.xlu0 %2798  ;;  %v2805_v0 = vunpack.i.l.bf16 %v2804_v40  ;;  %v2806_v12 = vunpack.i.h.bf16 %v2804_v40 }
 0x14a   : > { %v2801_v32 = vunpack.i.h.bf16 %v4482_v59  ;;  %v2800_v13 = vunpack.i.l.bf16 %v4482_v59 }
 0x14b   : > { %v1673_v33 = vsel %vm1668_vm9, %v1640_v14, %v2805_v0  ;;  %v1674_v23 = vsel %vm1668_vm9, %v1641_v53, %v2806_v12 }
 0x14c   : > { %v4489_v24 = vpop.permute.xlu1 %2813 }
 0x14d   : > { %v4498_v26 = vpop.permute.xlu0 %2808  ;;  %v2815_v63 = vunpack.i.l.bf16 %v4489_v24  ;;  %v2816_v11 = vunpack.i.h.bf16 %v4489_v24 }
 0x14e   : > { %v2810_v6 = vunpack.i.l.bf16 %v4498_v26  ;;  %v2811_v42 = vunpack.i.h.bf16 %v4498_v26 }
 0x14f   : > { %v1675_v4 = vsel %vm1668_vm9, %v1642_v58, %v2815_v63  ;;  %v1676_v26 = vsel %vm1668_vm9, %v1643_v16, %v2816_v11  ;;  %v1626_v16 = vsel %vm1602_vm7, %v4516_v46, %v2780_v49 }
 0x150   : > { %v2824_v45 = vpop.permute.xlu1 %2823  ;;  %v1689_v3 = vsel %vm1668_vm9, %v1656_v43, %v2810_v6  ;;  %v1690_v39 = vsel %vm1668_vm9, %v1657_v17, %v2811_v42  ;;  %v1659_v43 = vsel %vm1635_vm8, %v1626_v16, %v2801_v32 }
 0x151   : > { %v4518_v25 = vpop.permute.xlu0 %2818  ;;  %v2825_v60 = vunpack.i.l.bf16 %v2824_v45  ;;  %v2826_v36 = vunpack.i.h.bf16 %v2824_v45 }
 0x152   : > { %v2821_v2 = vunpack.i.h.bf16 %v4518_v25  ;;  %v2820_v59 = vunpack.i.l.bf16 %v4518_v25 }
 0x153   : > { %v1706_v10 = vsel %vm1701_vm10, %v1673_v33, %v2825_v60  ;;  %v1707_v19 = vsel %vm1701_vm10, %v1674_v23, %v2826_v36  ;;  %v1625_v60 = vsel %vm1602_vm7, %v4513_v31, %v2776_v51 }
 0x154   : > { %v2834_v20 = vpop.permute.xlu1 %2833  ;;  %v1692_v23 = vsel %vm1668_vm9, %v1659_v43, %v2821_v2 }
 0x155   : > { %v2829_v40 = vpop.permute.xlu0 %2828  ;;  %v2836_v34 = vunpack.i.h.bf16 %v2834_v20  ;;  %v2835_v61 = vunpack.i.l.bf16 %v2834_v20 }
 0x156   : > { %v2830_v55 = vunpack.i.l.bf16 %v2829_v40  ;;  %v2831_v54 = vunpack.i.h.bf16 %v2829_v40  ;;  %v1658_v40 = vsel %vm1635_vm8, %v1625_v60, %v2800_v13 }
 0x157   : > { %v1708_v1 = vsel %vm1701_vm10, %v1675_v4, %v2835_v61  ;;  %v1709_v27 = vsel %vm1701_vm10, %v1676_v26, %v2836_v34  ;;  %v1691_v63 = vsel %vm1668_vm9, %v1658_v40, %v2820_v59 }
 0x158   : > { %v2844_v47 = vpop.permute.xlu1 %2843  ;;  %v1722_v35 = vsel %vm1701_vm10, %v1689_v3, %v2830_v55  ;;  %v1723_v20 = vsel %vm1701_vm10, %v1690_v39, %v2831_v54  ;;  %v2781_v55 = vunpack.i.h.bf16 %v4477_v44 }
 0x159   : > { %v2846_v29 = vunpack.i.h.bf16 %v2844_v47  ;;  %v2845_v62 = vunpack.i.l.bf16 %v2844_v47  ;;  %v2839_v37 = vpop.permute.xlu0 %2838 }
 0x15a   : > { %v2841_v21 = vunpack.i.h.bf16 %v2839_v37  ;;  %v2840_v14 = vunpack.i.l.bf16 %v2839_v37  ;;  %v1627_v39 = vsel %vm1602_vm7, %v4180_v38, %v2781_v55 }
 0x15b   : > { %v1739_v24 = vsel %vm1734_vm11, %v1706_v10, %v2845_v62  ;;  %v1740_v8 = vsel %vm1734_vm11, %v1707_v19, %v2846_v29 }
 0x15c   : > { %v1769_v45 = vpack.c.bf16 %v1740_v8, %v1739_v24  ;;  %v2854_v50 = vpop.permute.xlu1 %2853  ;;  %v1724_v46 = vsel %vm1701_vm10, %v1691_v63, %v2840_v14  ;;  %v1725_v49 = vsel %vm1701_vm10, %v1692_v23, %v2841_v21 }
 0x15d   : > { %v2856_v5 = vunpack.i.h.bf16 %v2854_v50  ;;  %v2855_v41 = vunpack.i.l.bf16 %v2854_v50  ;;  %v2849_v15 = vpop.permute.xlu0 %2848 }
 0x15e   : > { %2363 = vmatprep.mubr.msk.bf16.mxu0 %vm1803_vm12, %v1769_v45  ;;  %v2851_v52 = vunpack.i.h.bf16 %v2849_v15  ;;  %v2850_v12 = vunpack.i.l.bf16 %v2849_v15 }
 0x15f   : > { %v1741_v0 = vsel %vm1734_vm11, %v1708_v1, %v2855_v41  ;;  %v1742_v56 = vsel %vm1734_vm11, %v1709_v27, %v2856_v5 }
 0x160   : > { %v1770_v25 = vpack.c.bf16 %v1742_v56, %v1741_v0  ;;  %v4561_v53 = vpop.permute.xlu1 %2863  ;;  %v1755_v58 = vsel %vm1734_vm11, %v1722_v35, %v2850_v12  ;;  %v1756_v36 = vsel %vm1734_vm11, %v1723_v20, %v2851_v52 }
 0x161   : > { %v1777_v17 = vpack.c.bf16 %v1756_v36, %v1755_v58  ;;  %v2859_v33 = vpop.permute.xlu0 %2858  ;;  %v2865_v13 = vunpack.i.l.bf16 %v4561_v53  ;;  %v2866_v2 = vunpack.i.h.bf16 %v4561_v53 }
 0x162   : > { %2364 = vmatmul.mubr.msk.bf16.gmra.mxu0 %vm1803_vm12, %v1770_v25  ;;  %v2861_v31 = vunpack.i.h.bf16 %v2859_v33  ;;  %v2860_v51 = vunpack.i.l.bf16 %v2859_v33 }
 0x163   : > { %2379 = vmatprep.mubr.msk.bf16.mxu1 %vm1803_vm12, %v1777_v17  ;;  %v1628_v44 = vsel %vm1602_vm7, %v4183_v57, %v2865_v13 }
 0x164   : > { %v2874_v11 = vpop.permute.xlu1 %2873  ;;  %v1757_v6 = vsel %vm1734_vm11, %v1724_v46, %v2860_v51  ;;  %v1758_v32 = vsel %vm1734_vm11, %v1725_v49, %v2861_v31 }
 0x165   : > { %v1778_v47 = vpack.c.bf16 %v1758_v32, %v1757_v6  ;;  %v4579_v42 = vpop.permute.xlu0 %2868  ;;  %v2876_v4 = vunpack.i.h.bf16 %v2874_v11  ;;  %v2875_v24 = vunpack.i.l.bf16 %v2874_v11 }
 0x166   : > { %v2870_v35 = vunpack.i.l.bf16 %v4579_v42 }
 0x167   : > { %2380 = vmatmul.mubr.msk.bf16.gmra.mxu1 %vm1803_vm12, %v1778_v47  ;;  %v1644_v59 = vsel %vm1635_vm8, %v4279_v22, %v2875_v24  ;;  %v1645_v1 = vsel %vm1635_vm8, %v4283_v28, %v2876_v4 }
 0x168   : > { %v2884_v10 = vpop.permute.xlu1 %2883 }
 0x169   : > { %v2879_v29 = vpop.permute.xlu0 %2878  ;;  %v2886_v8 = vunpack.i.h.bf16 %v2884_v10  ;;  %v2885_v26 = vunpack.i.l.bf16 %v2884_v10 }
 0x16a   : > { %v2881_v54 = vunpack.i.h.bf16 %v2879_v29  ;;  %v2880_v45 = vunpack.i.l.bf16 %v2879_v29 }
 0x16b   : > { %v1647_v15 = vsel %vm1635_vm8, %v4271_v7, %v2886_v8  ;;  %v1646_v38 = vsel %vm1635_vm8, %v4267_v9, %v2885_v26 }
 0x16c   : > { %v2894_v62 = vpop.permute.xlu1 %2893  ;;  %v1660_v52 = vsel %vm1635_vm8, %v1627_v39, %v2880_v45  ;;  %v1661_v57 = vsel %vm1635_vm8, %v1628_v44, %v2881_v54  ;;  %v1629_v45 = vsel %vm1602_vm7, %v4167_v30, %v2866_v2 }
 0x16d   : > { %v4582_v19 = vpop.permute.xlu0 %2888  ;;  %v2895_v50 = vunpack.i.l.bf16 %v2894_v62  ;;  %v2896_v5 = vunpack.i.h.bf16 %v2894_v62 }
 0x16e   : > { %v2891_v20 = vunpack.i.h.bf16 %v4582_v19  ;;  %v2890_v17 = vunpack.i.l.bf16 %v4582_v19 }
 0x16f   : > { %v1677_v22 = vsel %vm1668_vm9, %v1644_v59, %v2895_v50  ;;  %v1678_v28 = vsel %vm1668_vm9, %v1645_v1, %v2896_v5  ;;  %v1630_v50 = vsel %vm1602_vm7, %v4170_v18, %v2870_v35 }
 0x170   : > { %v2904_v34 = vpop.permute.xlu1 %2903  ;;  %v1663_v44 = vsel %vm1635_vm8, %v1630_v50, %v2891_v20 }
 0x171   : > { %v2899_v61 = vpop.permute.xlu0 %2898  ;;  %v2905_v12 = vunpack.i.l.bf16 %v2904_v34  ;;  %v2906_v21 = vunpack.i.h.bf16 %v2904_v34 }
 0x172   : > { %v2900_v14 = vunpack.i.l.bf16 %v2899_v61  ;;  %v2901_v7 = vunpack.i.h.bf16 %v2899_v61 }
 0x173   : > { %v1679_v33 = vsel %vm1668_vm9, %v1646_v38, %v2905_v12  ;;  %v1680_v31 = vsel %vm1668_vm9, %v1647_v15, %v2906_v21 }
 0x174   : > { %v2914_v37 = vpop.permute.xlu1 %2913  ;;  %v1693_v51 = vsel %vm1668_vm9, %v1660_v52, %v2900_v14  ;;  %v1694_v6 = vsel %vm1668_vm9, %v1661_v57, %v2901_v7 }
 0x175   : > { %v4586_v3 = vpop.permute.xlu0 %2908  ;;  %v2915_v27 = vunpack.i.l.bf16 %v2914_v37  ;;  %v2916_v0 = vunpack.i.h.bf16 %v2914_v37 }
 0x176   : > { %v2911_v32 = vunpack.i.h.bf16 %v4586_v3  ;;  %v2910_v29 = vunpack.i.l.bf16 %v4586_v3 }
 0x177   : > { %v1710_v53 = vsel %vm1701_vm10, %v1677_v22, %v2915_v27  ;;  %v1711_v16 = vsel %vm1701_vm10, %v1678_v28, %v2916_v0 }
 0x178   : > { %v2924_v41 = vpop.permute.xlu1 %2923  ;;  %v1696_v15 = vsel %vm1668_vm9, %v1663_v44, %v2911_v32  ;;  %v5345_v32 = vld [vmem:[#allocation16_spill] sm:$0xff] }
 0x179   : > { %v2919_v56 = vpop.permute.xlu0 %2918  ;;  %v2926_v58 = vunpack.i.h.bf16 %v2924_v41  ;;  %v2925_v36 = vunpack.i.l.bf16 %v2924_v41  ;;  %v1662_v41 = vsel %vm1635_vm8, %v1629_v45, %v2890_v17 }
 0x17a   : > { %v2920_v40 = vunpack.i.l.bf16 %v2919_v56  ;;  %v2921_v46 = vunpack.i.h.bf16 %v2919_v56  ;;  %v1695_v27 = vsel %vm1668_vm9, %v1662_v41, %v2910_v29 }
 0x17b   : > { %v1712_v62 = vsel %vm1701_vm10, %v1679_v33, %v2925_v36  ;;  %v1713_v19 = vsel %vm1701_vm10, %v1680_v31, %v2926_v58  ;;  %v5342_v31 = vld [vmem:[#allocation12_spill] sm:$0xff] }
 0x17c   : > { %v2934_v25 = vpop.permute.xlu1 %2933  ;;  %v1726_v34 = vsel %vm1701_vm10, %v1693_v51, %v2920_v40  ;;  %v1727_v24 = vsel %vm1701_vm10, %v1694_v6, %v2921_v46 }
 0x17d   : > { %v2936_v9 = vunpack.i.h.bf16 %v2934_v25  ;;  %v2935_v60 = vunpack.i.l.bf16 %v2934_v25  ;;  %v2929_v43 = vpop.permute.xlu0 %2928  ;;  %v2871_v25 = vunpack.i.h.bf16 %v4579_v42  ;;  %v5343_v42 = vld [vmem:[#allocation11_spill] sm:$0xff] }
 0x17e   : > { %v2931_v8 = vunpack.i.h.bf16 %v2929_v43  ;;  %v2930_v26 = vunpack.i.l.bf16 %v2929_v43 }
 0x17f   : > { %v1743_v63 = vsel %vm1734_vm11, %v1710_v53, %v2935_v60  ;;  %v1744_v23 = vsel %vm1734_vm11, %v1711_v16, %v2936_v9  ;;  %v1616_v43 = vsel %vm1602_vm7, %v4128_v48, %v2871_v25 }
 0x180   : > { %v1771_v49 = vpack.c.bf16 %v1744_v23, %v1743_v63  ;;  %v2944_v11 = vpop.permute.xlu1 %2943  ;;  %v1728_v18 = vsel %vm1701_vm10, %v1695_v27, %v2930_v26  ;;  %v1729_v35 = vsel %vm1701_vm10, %v1696_v15, %v2931_v8  ;;  %v5348_v8 = vld [vmem:[#allocation15_spill] sm:$0xff] }
 0x181   : > { %v2946_v47 = vunpack.i.h.bf16 %v2944_v11  ;;  %v2945_v10 = vunpack.i.l.bf16 %v2944_v11  ;;  %v2939_v61 = vpop.permute.xlu0 %2938  ;;  %v5344_v11 = vld [vmem:[#allocation13_spill] sm:$0xff] }
 0x182   : > { %2367 = vmatprep.mubr.msk.bf16.mxu0 %vm1803_vm12, %v1771_v49  ;;  %v2941_v13 = vunpack.i.h.bf16 %v2939_v61  ;;  %v2940_v4 = vunpack.i.l.bf16 %v2939_v61 }
 0x183   : > { %v1745_v55 = vsel %vm1734_vm11, %v1712_v62, %v2945_v10  ;;  %v1746_v37 = vsel %vm1734_vm11, %v1713_v19, %v2946_v47  ;;  %v5346_v10 = vld [vmem:[#allocation10_spill] sm:$0xff] }
 0x184   : > { %v1772_v3 = vpack.c.bf16 %v1746_v37, %v1745_v55  ;;  %v2954_v54 = vpop.permute.xlu1 %2953  ;;  %v1759_v39 = vsel %vm1734_vm11, %v1726_v34, %v2940_v4  ;;  %v1760_v5 = vsel %vm1734_vm11, %v1727_v24, %v2941_v13  ;;  %v5347_v62 = vld [vmem:[#allocation18_spill] sm:$0xff] }
 0x185   : > { %v1779_v59 = vpack.c.bf16 %v1760_v5, %v1759_v39  ;;  %v2949_v1 = vpop.permute.xlu0 %2948  ;;  %v2956_v53 = vunpack.i.h.bf16 %v2954_v54  ;;  %v2955_v9 = vunpack.i.l.bf16 %v2954_v54 }
 0x186   : > { %2368 = vmatmul.mubr.msk.bf16.gmra.mxu0 %vm1803_vm12, %v1772_v3  ;;  %v2951_v30 = vunpack.i.h.bf16 %v2949_v1  ;;  %v2950_v2 = vunpack.i.l.bf16 %v2949_v1 }
 0x187   : > { %2383 = vmatprep.mubr.msk.bf16.mxu1 %vm1803_vm12, %v1779_v59  ;;  %v1631_v51 = vsel %vm1602_vm7, %v5342_v31, %v2955_v9  ;;  %v1632_v46 = vsel %vm1602_vm7, %v5343_v42, %v2956_v53 }
 0x188   : > { %v2964_v38 = vpop.permute.xlu1 %2963  ;;  %v1761_v0 = vsel %vm1734_vm11, %v1728_v18, %v2950_v2  ;;  %v1762_v56 = vsel %vm1734_vm11, %v1729_v35, %v2951_v30 }
 0x189   : > { %v1780_v52 = vpack.c.bf16 %v1762_v56, %v1761_v0  ;;  %v2959_v57 = vpop.permute.xlu0 %2958  ;;  %v2965_v60 = vunpack.i.l.bf16 %v2964_v38  ;;  %v2966_v16 = vunpack.i.h.bf16 %v2964_v38 }
 0x18a   : > { %v2961_v58 = vunpack.i.h.bf16 %v2959_v57  ;;  %v2960_v36 = vunpack.i.l.bf16 %v2959_v57 }
 0x18b   : > { %2384 = vmatmul.mubr.msk.bf16.gmra.mxu1 %vm1803_vm12, %v1780_v52  ;;  %v1633_v6 = vsel %vm1602_vm7, %v5344_v11, %v2965_v60  ;;  %v1634_v19 = vsel %vm1602_vm7, %v5347_v62, %v2966_v16 }
 0x18c   : > { %v2974_v22 = vpop.permute.xlu1 %2973  ;;  %v1618_v47 = vsel %vm1602_vm7, %v5345_v32, %v2961_v58  ;;  %v1617_v48 = vsel %vm1602_vm7, %v5346_v10, %v2960_v36 }
 0x18d   : > { %v2969_v12 = vpop.permute.xlu0 %2968  ;;  %v2976_v17 = vunpack.i.h.bf16 %v2974_v22  ;;  %v2975_v33 = vunpack.i.l.bf16 %v2974_v22 }
 0x18e   : > { %v2970_v63 = vunpack.i.l.bf16 %v2969_v12  ;;  %v2971_v49 = vunpack.i.h.bf16 %v2969_v12 }
 0x18f   : > { %v1664_v4 = vsel %vm1635_vm8, %v1631_v51, %v2975_v33  ;;  %v1665_v24 = vsel %vm1635_vm8, %v1632_v46, %v2976_v17 }
 0x190   : > { %v2984_v28 = vpop.permute.xlu1 %2983  ;;  %v1648_v26 = vsel %vm1635_vm8, %v5348_v8, %v2970_v63  ;;  %v1649_v45 = vsel %vm1635_vm8, %v1616_v43, %v2971_v49 }
 0x191   : > { %v4642_v20 = vpop.permute.xlu0 %2978  ;;  %v2985_v29 = vunpack.i.l.bf16 %v2984_v28  ;;  %v2986_v61 = vunpack.i.h.bf16 %v2984_v28 }
 0x192   : > { %v2981_v50 = vunpack.i.h.bf16 %v4642_v20  ;;  %v2980_v39 = vunpack.i.l.bf16 %v4642_v20 }
 0x193   : > { %v1666_v41 = vsel %vm1635_vm8, %v1633_v6, %v2985_v29  ;;  %v1667_v18 = vsel %vm1635_vm8, %v1634_v19, %v2986_v61 }
 0x194   : > { %v2994_v21 = vpop.permute.xlu1 %2993  ;;  %v1650_v51 = vsel %vm1635_vm8, %v1617_v48, %v2980_v39  ;;  %v1651_v42 = vsel %vm1635_vm8, %v1618_v47, %v2981_v50 }
 0x195   : > { %v2989_v14 = vpop.permute.xlu0 %2988  ;;  %v2996_v55 = vunpack.i.h.bf16 %v2994_v21  ;;  %v2995_v37 = vunpack.i.l.bf16 %v2994_v21 }
 0x196   : > { %v2990_v13 = vunpack.i.l.bf16 %v2989_v14  ;;  %v2991_v3 = vunpack.i.h.bf16 %v2989_v14 }
 0x197   : > { %v1697_v15 = vsel %vm1668_vm9, %v1664_v4, %v2995_v37  ;;  %v1698_v30 = vsel %vm1668_vm9, %v1665_v24, %v2996_v55 }
 0x198   : > { %v1287_v7 = vpop.permute.xlu1 %1286  ;;  %v1681_v2 = vsel %vm1668_vm9, %v1648_v26, %v2990_v13  ;;  %v1682_v35 = vsel %vm1668_vm9, %v1649_v45, %v2991_v3 }
 0x199   : > { %v4645_v40 = vpop.permute.xlu0 %2998  ;;  %v1699_v38 = vsel %vm1668_vm9, %v1666_v41, %v1287_v7  ;;  %v1700_v0 = vsel %vm1668_vm9, %v1667_v18, %v1287_v7 }
 0x19a   : > { %v3001_v56 = vunpack.i.h.bf16 %v4645_v40  ;;  %v3000_v57 = vunpack.i.l.bf16 %v4645_v40 }
 0x19c   : > { %v3009_v23 = vpop.permute.xlu1 %3008  ;;  %v1683_v6 = vsel %vm1668_vm9, %v1650_v51, %v3000_v57  ;;  %v1684_v32 = vsel %vm1668_vm9, %v1651_v42, %v3001_v56 }
 0x19d   : > { %v3004_v34 = vpop.permute.xlu0 %3003  ;;  %v3010_v5 = vunpack.i.l.bf16 %v3009_v23  ;;  %v3011_v44 = vunpack.i.h.bf16 %v3009_v23 }
 0x19e   : > { %v3006_v59 = vunpack.i.h.bf16 %v3004_v34  ;;  %v3005_v1 = vunpack.i.l.bf16 %v3004_v34 }
 0x19f   : > { %v1730_v22 = vsel %vm1701_vm10, %v1697_v15, %v3010_v5  ;;  %v1731_v20 = vsel %vm1701_vm10, %v1698_v30, %v3011_v44 }
 0x1a0   : > { %v1380_v54 = vpop.permute.xlu1 %1379  ;;  %v1714_v21 = vsel %vm1701_vm10, %v1681_v2, %v3005_v1  ;;  %v1715_v14 = vsel %vm1701_vm10, %v1682_v35, %v3006_v59 }
 0x1a1   : > { %v3014_v27 = vpop.permute.xlu0 %3013  ;;  %v1732_v25 = vsel %vm1701_vm10, %v1699_v38, %v1380_v54  ;;  %v1733_v58 = vsel %vm1701_vm10, %v1700_v0, %v1380_v54 }
 0x1a2   : > { %v3016_v36 = vunpack.i.h.bf16 %v3014_v27  ;;  %v3015_v40 = vunpack.i.l.bf16 %v3014_v27 }
 0x1a4   : > { %v3024_v52 = vpop.permute.xlu1 %3023  ;;  %v1716_v62 = vsel %vm1701_vm10, %v1683_v6, %v3015_v40  ;;  %v1717_v19 = vsel %vm1701_vm10, %v1684_v32, %v3016_v36 }
 0x1a5   : > { %v3026_v12 = vunpack.i.h.bf16 %v3024_v52  ;;  %v3025_v28 = vunpack.i.l.bf16 %v3024_v52  ;;  %v3019_v53 = vpop.permute.xlu0 %3018 }
 0x1a6   : > { %v3021_v60 = vunpack.i.h.bf16 %v3019_v53  ;;  %v3020_v16 = vunpack.i.l.bf16 %v3019_v53 }
 0x1a7   : > { %v1763_v7 = vsel %vm1734_vm11, %v1730_v22, %v3025_v28  ;;  %v1764_v9 = vsel %vm1734_vm11, %v1731_v20, %v3026_v12 }
 0x1a8   : > { %v1781_v43 = vpack.c.bf16 %v1764_v9, %v1763_v7  ;;  %v1473_v17 = vpop.permute.xlu1 %1472  ;;  %v1747_v33 = vsel %vm1734_vm11, %v1714_v21, %v3020_v16  ;;  %v1748_v63 = vsel %vm1734_vm11, %v1715_v14, %v3021_v60 }
 0x1a9   : > { %v1765_v23 = vsel %vm1734_vm11, %v1732_v25, %v1473_v17  ;;  %v1766_v31 = vsel %vm1734_vm11, %v1733_v58, %v1473_v17  ;;  %v1773_v46 = vpack.c.bf16 %v1748_v63, %v1747_v33  ;;  %v3029_v11 = vpop.permute.xlu0 %3028 }
 0x1aa   : > { %v1782_v49 = vpack.c.bf16 %v1766_v31, %v1765_v23  ;;  %2387 = vmatprep.mubr.msk.bf16.mxu1 %vm1803_vm12, %v1781_v43  ;;  %v3031_v10 = vunpack.i.h.bf16 %v3029_v11  ;;  %v3030_v29 = vunpack.i.l.bf16 %v3029_v11 }
 0x1ab   : > { %2371 = vmatprep.mubr.msk.bf16.mxu0 %vm1803_vm12, %v1773_v46 }
 0x1ac   : > { %2388 = vmatmul.mubr.msk.bf16.gmra.mxu1 %vm1803_vm12, %v1782_v49  ;;  %v1749_v47 = vsel %vm1734_vm11, %v1716_v62, %v3030_v29  ;;  %v1750_v48 = vsel %vm1734_vm11, %v1717_v19, %v3031_v10 }
 0x1ad   : > { %v1774_v34 = vpack.c.bf16 %v1750_v48, %v1749_v47 }
 0x1af   : > { %2372 = vmatmul.mubr.msk.bf16.gmra.mxu0 %vm1803_vm12, %v1774_v34 }
 0x1fe   : > { %v4709_v61 = vpop.f32.mrf.mxu0 }
 0x1ff   : > { %2019 = vst.msk [vmem:[%s4707_s28 + $0x10] sm:$0xff] %vm1505_vm4, %v4709_v61 }
 0x200   : > { %v4714_v55 = vpop.f32.mrf.mxu0 }
 0x201   : > { %2017 = vst.msk [vmem:[%s4707_s28] sm:$0xff] %vm1505_vm4, %v4714_v55 }
 0x202   : > { %v4719_v37 = vpop.f32.mrf.mxu0 }
 0x203   : > { %2020 = vst.msk [vmem:[%s4707_s28 + $0x18] sm:$0xff] %vm1505_vm4, %v4719_v37  ;;  %v4724_v13 = vpop.f32.mrf.mxu1 }
 0x204   : > { %v4726_v4 = vpop.f32.mrf.mxu0  ;;  %2035 = vst.msk [vmem:[%s4707_s28 + $0x90] sm:$0xff] %vm1505_vm4, %v4724_v13 }
 0x205   : > { %2018 = vst.msk [vmem:[%s4707_s28 + $0x8] sm:$0xff] %vm1505_vm4, %v4726_v4  ;;  %v4734_v24 = vpop.f32.mrf.mxu1 }
 0x206   : > { %2033 = vst.msk [vmem:[%s4707_s28 + $0x80] sm:$0xff] %vm1505_vm4, %v4734_v24 }
 0x207   : > { %v4739_v8 = vpop.f32.mrf.mxu1 }
 0x208   : > { %2036 = vst.msk [vmem:[%s4707_s28 + $0x98] sm:$0xff] %vm1505_vm4, %v4739_v8 }
 0x209   : > { %v4744_v26 = vpop.f32.mrf.mxu1 }
 0x20a   : > { %2034 = vst.msk [vmem:[%s4707_s28 + $0x88] sm:$0xff] %vm1505_vm4, %v4744_v26 }
 0x222   : > { %v4749_v3 = vpop.f32.mrf.mxu0 }
 0x223   : > { %2023 = vst.msk [vmem:[%s4707_s28 + $0x30] sm:$0xff] %vm1505_vm4, %v4749_v3 }
 0x224   : > { %v4754_v54 = vpop.f32.mrf.mxu0 }
 0x225   : > { %2021 = vst.msk [vmem:[%s4707_s28 + $0x20] sm:$0xff] %vm1505_vm4, %v4754_v54 }
 0x226   : > { %v4759_v45 = vpop.f32.mrf.mxu0 }
 0x227   : > { %2024 = vst.msk [vmem:[%s4707_s28 + $0x38] sm:$0xff] %vm1505_vm4, %v4759_v45  ;;  %v4764_v50 = vpop.f32.mrf.mxu1 }
 0x228   : > { %v4766_v39 = vpop.f32.mrf.mxu0  ;;  %2039 = vst.msk [vmem:[%s4707_s28 + $0xb0] sm:$0xff] %vm1505_vm4, %v4764_v50 }
 0x229   : > { %2022 = vst.msk [vmem:[%s4707_s28 + $0x28] sm:$0xff] %vm1505_vm4, %v4766_v39  ;;  %v4774_v5 = vpop.f32.mrf.mxu1 }
 0x22a   : > { %2037 = vst.msk [vmem:[%s4707_s28 + $0xa0] sm:$0xff] %vm1505_vm4, %v4774_v5 }
 0x22b   : > { %v4779_v41 = vpop.f32.mrf.mxu1 }
 0x22c   : > { %2040 = vst.msk [vmem:[%s4707_s28 + $0xb8] sm:$0xff] %vm1505_vm4, %v4779_v41 }
 0x22d   : > { %v4784_v44 = vpop.f32.mrf.mxu1 }
 0x22e   : > { %2038 = vst.msk [vmem:[%s4707_s28 + $0xa8] sm:$0xff] %vm1505_vm4, %v4784_v44 }
 0x246   : > { %v4789_v59 = vpop.f32.mrf.mxu0 }
 0x247   : > { %2027 = vst.msk [vmem:[%s4707_s28 + $0x50] sm:$0xff] %vm1505_vm4, %v4789_v59 }
 0x248   : > { %v4794_v1 = vpop.f32.mrf.mxu0 }
 0x249   : > { %2025 = vst.msk [vmem:[%s4707_s28 + $0x40] sm:$0xff] %vm1505_vm4, %v4794_v1 }
 0x24a   : > { %v4799_v27 = vpop.f32.mrf.mxu0 }
 0x24b   : > { %2028 = vst.msk [vmem:[%s4707_s28 + $0x58] sm:$0xff] %vm1505_vm4, %v4799_v27  ;;  %v4804_v15 = vpop.f32.mrf.mxu1 }
 0x24c   : > { %v4806_v30 = vpop.f32.mrf.mxu0  ;;  %2043 = vst.msk [vmem:[%s4707_s28 + $0xd0] sm:$0xff] %vm1505_vm4, %v4804_v15 }
 0x24d   : > { %2026 = vst.msk [vmem:[%s4707_s28 + $0x48] sm:$0xff] %vm1505_vm4, %v4806_v30  ;;  %v4814_v2 = vpop.f32.mrf.mxu1 }
 0x24e   : > { %2041 = vst.msk [vmem:[%s4707_s28 + $0xc0] sm:$0xff] %vm1505_vm4, %v4814_v2 }
 0x24f   : > { %v4819_v18 = vpop.f32.mrf.mxu1 }
 0x250   : > { %2044 = vst.msk [vmem:[%s4707_s28 + $0xd8] sm:$0xff] %vm1505_vm4, %v4819_v18 }
 0x251   : > { %v4824_v35 = vpop.f32.mrf.mxu1 }
 0x252   : > { %2042 = vst.msk [vmem:[%s4707_s28 + $0xc8] sm:$0xff] %vm1505_vm4, %v4824_v35 }
 0x26c   : > { %v4829_v38 = vpop.f32.mrf.mxu1 }
 0x26d   : > { %2047 = vst.msk [vmem:[%s4707_s28 + $0xf0] sm:$0xff] %vm1505_vm4, %v4829_v38 }
 0x26e   : > { %v4834_v0 = vpop.f32.mrf.mxu1 }
 0x26f   : > { %2045 = vst.msk [vmem:[%s4707_s28 + $0xe0] sm:$0xff] %vm1505_vm4, %v4834_v0  ;;  %v4839_v56 = vpop.f32.mrf.mxu0 }
 0x270   : > { %v4841_v52 = vpop.f32.mrf.mxu1  ;;  %2031 = vst.msk [vmem:[%s4707_s28 + $0x70] sm:$0xff] %vm1505_vm4, %v4839_v56 }
 0x271   : > { %2048 = vst.msk [vmem:[%s4707_s28 + $0xf8] sm:$0xff] %vm1505_vm4, %v4841_v52  ;;  %v4849_v57 = vpop.f32.mrf.mxu0 }
 0x272   : > { %v4851_v22 = vpop.f32.mrf.mxu1  ;;  %2029 = vst.msk [vmem:[%s4707_s28 + $0x60] sm:$0xff] %vm1505_vm4, %v4849_v57  ;;  %2052 = sbr.rel (%p2331_p4) target bundleno = 633 (0x279), region = 40 }
 0x273   : > { %2046 = vst.msk [vmem:[%s4707_s28 + $0xe8] sm:$0xff] %vm1505_vm4, %v4851_v22  ;;  %v4859_v12 = vpop.f32.mrf.mxu0 }
 0x274   : > { %2032 = vst.msk [vmem:[%s4707_s28 + $0x78] sm:$0xff] %vm1505_vm4, %v4859_v12 }
 0x275   : > { %v4864_v28 = vpop.f32.mrf.mxu0 }
 0x276   : > { %2030 = vst.msk [vmem:[%s4707_s28 + $0x68] sm:$0xff] %vm1505_vm4, %v4864_v28 }
 0x277   : > { %vm2053_vm13 = vcmask 24576   ;;  %v3052_v20 = vmov 0.0  }
 0x278   : > { %2054 = vst.msk [vmem:[%s5059_s5] sm:$0x1] %vm2053_vm13, %v3052_v20  ;;  %2055 = vst.msk [vmem:[%s5060_s6] sm:$0x1] %vm2053_vm13, %v3052_v20 }
 0x279 PF: > { %v2057_v21 = vsel %vm1505_vm4, %v4714_v55, 0.0  ;;  %v2058_v14 = vsel %vm1505_vm4, %v4726_v4, 0.0  ;;  %v2060_v25 = vsel %vm1505_vm4, %v4709_v61, 0.0  ;;  %v2062_v7 = vsel %vm1505_vm4, %v4719_v37, 0.0 }
 0x27a   : > { %v2059_v53 = vadd.f32 %v2058_v14, %v2057_v21  ;;  %v2064_v60 = vsel %vm1505_vm4, %v4754_v54, 0.0  ;;  %v2066_v58 = vsel %vm1505_vm4, %v4766_v39, 0.0  ;;  %v2068_v40 = vsel %vm1505_vm4, %v4749_v3, 0.0 }
 0x27b   : > { %v2070_v17 = vsel %vm1505_vm4, %v4759_v45, 0.0  ;;  %v2072_v63 = vsel %vm1505_vm4, %v4794_v1, 0.0  ;;  %v2074_v31 = vsel %vm1505_vm4, %v4806_v30, 0.0  ;;  %v2130_v51 = vmul.f32 %v4714_v55, %v4714_v55 }
 0x27c   : > { %v2061_v9 = vadd.f32 %v2060_v25, %v2059_v53  ;;  %v2131_v42 = vmul.f32 %v4726_v4, %v4726_v4  ;;  %v2132_v49 = vmul.f32 %v4709_v61, %v4709_v61  ;;  %v2076_v11 = vsel %vm1505_vm4, %v4789_v59, 0.0 }
 0x27d   : > { %v2133_v6 = vmul.f32 %v4719_v37, %v4719_v37  ;;  %v2078_v10 = vsel %vm1505_vm4, %v4799_v27, 0.0  ;;  %v2134_v29 = vmul.f32 %v4754_v54, %v4754_v54  ;;  %v2162_v62 = vsel %vm1505_vm4, %v2130_v51, 0.0 }
 0x27e   : > { %v2063_v16 = vadd.f32 %v2062_v7, %v2061_v9  ;;  %v2163_v19 = vsel %vm1505_vm4, %v2131_v42, 0.0  ;;  %v2165_v34 = vsel %vm1505_vm4, %v2132_v49, 0.0  ;;  %v2080_v61 = vsel %vm1505_vm4, %v4849_v57, 0.0 }
 0x27f   : > { %v2164_v48 = vadd.f32 %v2163_v19, %v2162_v62  ;;  %v2135_v55 = vmul.f32 %v4766_v39, %v4766_v39  ;;  %v2167_v37 = vsel %vm1505_vm4, %v2133_v6, 0.0  ;;  %v2082_v54 = vsel %vm1505_vm4, %v4864_v28, 0.0 }
 0x280   : > { %v2065_v36 = vadd.f32 %v2064_v60, %v2063_v16  ;;  %v2136_v21 = vmul.f32 %v4749_v3, %v4749_v3  ;;  %v2169_v14 = vsel %vm1505_vm4, %v2134_v29, 0.0  ;;  %v2084_v7 = vsel %vm1505_vm4, %v4839_v56, 0.0 }
 0x281   : > { %v2166_v20 = vadd.f32 %v2165_v34, %v2164_v48  ;;  %v2137_v39 = vmul.f32 %v4759_v45, %v4759_v45  ;;  %v2171_v9 = vsel %vm1505_vm4, %v2135_v55, 0.0  ;;  %v2138_v3 = vmul.f32 %v4794_v1, %v4794_v1 }
 0x282   : > { %v2067_v43 = vadd.f32 %v2066_v58, %v2065_v36  ;;  %v2086_v58 = vsel %vm1505_vm4, %v4859_v12, 0.0  ;;  %v2173_v36 = vsel %vm1505_vm4, %v2136_v21, 0.0  ;;  %v2139_v45 = vmul.f32 %v4806_v30, %v4806_v30 }
 0x283   : > { %v2168_v53 = vadd.f32 %v2167_v37, %v2166_v20  ;;  %v2140_v1 = vmul.f32 %v4789_v59, %v4789_v59  ;;  %v2177_v51 = vsel %vm1505_vm4, %v2138_v3, 0.0  ;;  %v2092_v49 = vsel %vm1505_vm4, %v4724_v13, 0.0 }
 0x284   : > { %v2069_v33 = vadd.f32 %v2068_v40, %v2067_v43  ;;  %v2141_v30 = vmul.f32 %v4799_v27, %v4799_v27  ;;  %v2142_v59 = vmul.f32 %v4849_v57, %v4849_v57  ;;  %v2143_v27 = vmul.f32 %v4864_v28, %v4864_v28 }
 0x285   : > { %v2170_v16 = vadd.f32 %v2169_v14, %v2168_v53  ;;  %v2181_v29 = vsel %vm1505_vm4, %v2140_v1, 0.0  ;;  %v2098_v55 = vsel %vm1505_vm4, %v4784_v44, 0.0  ;;  %v2144_v57 = vmul.f32 %v4839_v56, %v4839_v56 }
 0x286   : > { %v2071_v23 = vadd.f32 %v2070_v17, %v2069_v33  ;;  %v2088_v17 = vsel %vm1505_vm4, %v4734_v24, 0.0  ;;  %v2175_v33 = vsel %vm1505_vm4, %v2137_v39, 0.0  ;;  %v2183_v48 = vsel %vm1505_vm4, %v2141_v30, 0.0 }
 0x287   : > { %v2172_v43 = vadd.f32 %v2171_v9, %v2170_v16  ;;  %v2185_v37 = vsel %vm1505_vm4, %v2142_v59, 0.0  ;;  %v2145_v28 = vmul.f32 %v4859_v12, %v4859_v12  ;;  %v2187_v21 = vsel %vm1505_vm4, %v2143_v27, 0.0 }
 0x288   : > { %v2073_v46 = vadd.f32 %v2072_v63, %v2071_v23  ;;  %v2102_v53 = vsel %vm1505_vm4, %v4779_v41, 0.0  ;;  %v2146_v56 = vmul.f32 %v4734_v24, %v4734_v24  ;;  %v2147_v12 = vmul.f32 %v4744_v26, %v4744_v26 }
 0x289   : > { %v2174_v23 = vadd.f32 %v2173_v36, %v2172_v43  ;;  %v2191_v16 = vsel %vm1505_vm4, %v2145_v28, 0.0  ;;  %v2106_v36 = vsel %vm1505_vm4, %v4824_v35, 0.0  ;;  %v2148_v24 = vmul.f32 %v4724_v13, %v4724_v13 }
 0x28a   : > { %v2075_v32 = vadd.f32 %v2074_v31, %v2073_v46  ;;  %v2090_v31 = vsel %vm1505_vm4, %v4744_v26, 0.0  ;;  %v2149_v26 = vmul.f32 %v4739_v8, %v4739_v8  ;;  %v2150_v13 = vmul.f32 %v4774_v5, %v4774_v5 }
 0x28b   : > { %v2176_v46 = vadd.f32 %v2175_v33, %v2174_v23  ;;  %v2195_v33 = vsel %vm1505_vm4, %v2147_v12, 0.0  ;;  %v2197_v1 = vsel %vm1505_vm4, %v2148_v24, 0.0  ;;  %v2118_v27 = vsel %vm1505_vm4, %v4841_v52, 0.0 }
 0x28c   : > { %v2077_v47 = vadd.f32 %v2076_v11, %v2075_v32  ;;  %v2179_v11 = vsel %vm1505_vm4, %v2139_v45, 0.0  ;;  %v2108_v45 = vsel %vm1505_vm4, %v4804_v15, 0.0  ;;  %vm2127_vm14 = vcmask 24576  }
 0x28d   : > { %v2178_v32 = vadd.f32 %v2177_v51, %v2176_v46  ;;  %v2112_v46 = vsel %vm1505_vm4, %v4834_v0, 0.0 }
 0x28e   : > { %v2079_v4 = vadd.f32 %v2078_v10, %v2077_v47  ;;  %v2094_v10 = vsel %vm1505_vm4, %v4739_v8, 0.0  ;;  %v2096_v47 = vsel %vm1505_vm4, %v4774_v5, 0.0  ;;  %v2151_v8 = vmul.f32 %v4784_v44, %v4784_v44 }
 0x28f   : > { %v2180_v19 = vadd.f32 %v2179_v11, %v2178_v32  ;;  %v2152_v5 = vmul.f32 %v4764_v50, %v4764_v50  ;;  %v2201_v32 = vsel %vm1505_vm4, %v2150_v13, 0.0  ;;  %v2153_v44 = vmul.f32 %v4779_v41, %v4779_v41  ;;  %v2129_v13 = vld [vmem:[%s5060_s6] sm:$0x1] }
 0x290   : > { %v2081_v25 = vadd.f32 %v2080_v61, %v2079_v4 }
 0x291   : > { %v2182_v61 = vadd.f32 %v2181_v29, %v2180_v19  ;;  %v2116_v29 = vsel %vm1505_vm4, %v4829_v38, 0.0 }
 0x292   : > { %v2083_v60 = vadd.f32 %v2082_v54, %v2081_v25  ;;  %v2100_v54 = vsel %vm1505_vm4, %v4764_v50, 0.0  ;;  %v2154_v50 = vmul.f32 %v4814_v2, %v4814_v2 }
 0x293   : > { %v2184_v20 = vadd.f32 %v2183_v48, %v2182_v61  ;;  %v2205_v48 = vsel %vm1505_vm4, %v2152_v5, 0.0 }
 0x294   : > { %v2085_v40 = vadd.f32 %v2084_v7, %v2083_v60  ;;  %v2189_v7 = vsel %vm1505_vm4, %v2144_v57, 0.0  ;;  %v2104_v60 = vsel %vm1505_vm4, %v4814_v2, 0.0  ;;  %v2207_v57 = vsel %vm1505_vm4, %v2153_v44, 0.0 }
 0x295   : > { %v2186_v25 = vadd.f32 %v2185_v37, %v2184_v20  ;;  %v2209_v20 = vsel %vm1505_vm4, %v2154_v50, 0.0  ;;  %v2157_v2 = vmul.f32 %v4819_v18, %v4819_v18 }
 0x296   : > { %v2087_v63 = vadd.f32 %v2086_v58, %v2085_v40  ;;  %v2193_v40 = vsel %vm1505_vm4, %v2146_v56, 0.0 }
 0x297   : > { %v2188_v9 = vadd.f32 %v2187_v21, %v2186_v25 }
 0x298   : > { %v2089_v42 = vadd.f32 %v2088_v17, %v2087_v63 }
 0x299   : > { %v2190_v3 = vadd.f32 %v2189_v7, %v2188_v9 }
 0x29a   : > { %v2091_v6 = vadd.f32 %v2090_v31, %v2089_v42  ;;  %v2110_v31 = vsel %vm1505_vm4, %v4819_v18, 0.0  ;;  %v2160_v18 = vmul.f32 %v4829_v38, %v4829_v38 }
 0x29b   : > { %v2192_v17 = vadd.f32 %v2191_v16, %v2190_v3  ;;  %v2161_v3 = vmul.f32 %v4841_v52, %v4841_v52 }
 0x29c   : > { %v2093_v62 = vadd.f32 %v2092_v49, %v2091_v6  ;;  %v2199_v49 = vsel %vm1505_vm4, %v2149_v26, 0.0  ;;  %v2114_v6 = vsel %vm1505_vm4, %v4851_v22, 0.0 }
 0x29d   : > { %v2194_v23 = vadd.f32 %v2193_v40, %v2192_v17  ;;  %v2221_v40 = vsel %vm1505_vm4, %v2160_v18, 0.0  ;;  %v2223_v17 = vsel %vm1505_vm4, %v2161_v3, 0.0 }
 0x29e   : > { %v2095_v34 = vadd.f32 %v2094_v10, %v2093_v62  ;;  %v2203_v62 = vsel %vm1505_vm4, %v2151_v8, 0.0 }
 0x29f   : > { %v2196_v42 = vadd.f32 %v2195_v33, %v2194_v23 }
 0x2a0   : > { %v2097_v4 = vadd.f32 %v2096_v47, %v2095_v34 }
 0x2a1   : > { %v2198_v11 = vadd.f32 %v2197_v1, %v2196_v42 }
 0x2a2   : > { %v2099_v14 = vadd.f32 %v2098_v55, %v2097_v4  ;;  %v2155_v55 = vmul.f32 %v4824_v35, %v4824_v35  ;;  %v2156_v4 = vmul.f32 %v4804_v15, %v4804_v15  ;;  %v2158_v35 = vmul.f32 %v4834_v0, %v4834_v0  ;;  %v2056_v0 = vld [vmem:[%s5059_s5] sm:$0x1] }
 0x2a3   : > { %v2200_v59 = vadd.f32 %v2199_v49, %v2198_v11  ;;  %v2159_v15 = vmul.f32 %v4851_v22, %v4851_v22 }
 0x2a4   : > { %v2101_v39 = vadd.f32 %v2100_v54, %v2099_v14  ;;  %v2211_v21 = vsel %vm1505_vm4, %v2155_v55, 0.0  ;;  %v2217_v12 = vsel %vm1505_vm4, %v2158_v35, 0.0 }
 0x2a5   : > { %v2202_v47 = vadd.f32 %v2201_v32, %v2200_v59  ;;  %v2219_v22 = vsel %vm1505_vm4, %v2159_v15, 0.0 }
 0x2a6   : > { %v2103_v58 = vadd.f32 %v2102_v53, %v2101_v39  ;;  %v2213_v53 = vsel %vm1505_vm4, %v2156_v4, 0.0  ;;  %v2215_v39 = vsel %vm1505_vm4, %v2157_v2, 0.0 }
 0x2a7   : > { %v2204_v61 = vadd.f32 %v2203_v62, %v2202_v47 }
 0x2a8   : > { %v2105_v43 = vadd.f32 %v2104_v60, %v2103_v58 }
 0x2a9   : > { %v2206_v37 = vadd.f32 %v2205_v48, %v2204_v61 }
 0x2aa   : > { %v2107_v63 = vadd.f32 %v2106_v36, %v2105_v43 }
 0x2ab   : > { %v2208_v28 = vadd.f32 %v2207_v57, %v2206_v37 }
 0x2ac   : > { %v2109_v51 = vadd.f32 %v2108_v45, %v2107_v63 }
 0x2ad   : > { %v2210_v25 = vadd.f32 %v2209_v20, %v2208_v28 }
 0x2ae   : > { %v2111_v30 = vadd.f32 %v2110_v31, %v2109_v51 }
 0x2af   : > { %v2212_v7 = vadd.f32 %v2211_v21, %v2210_v25 }
 0x2b0   : > { %v2113_v10 = vadd.f32 %v2112_v46, %v2111_v30 }
 0x2b1   : > { %v2214_v60 = vadd.f32 %v2213_v53, %v2212_v7 }
 0x2b2   : > { %v2115_v19 = vadd.f32 %v2114_v6, %v2113_v10 }
 0x2b3   : > { %v2216_v58 = vadd.f32 %v2215_v39, %v2214_v60 }
 0x2b4   : > { %v2117_v34 = vadd.f32 %v2116_v29, %v2115_v19 }
 0x2b5   : > { %v2218_v24 = vadd.f32 %v2217_v12, %v2216_v58 }
 0x2b6   : > { %v2119_v41 = vadd.f32 %v2118_v27, %v2117_v34 }
 0x2b7   : > { %v2220_v38 = vadd.f32 %v2219_v22, %v2218_v24 }
 0x2b8   : > { %v2120_v54 = vrot.slane %v2119_v41, 4 }
 0x2b9   : > { %v2222_v45 = vadd.f32 %v2221_v40, %v2220_v38 }
 0x2ba   : > { %v2121_v14 = vadd.f32 %v2120_v54, %v2119_v41 }
 0x2bb   : > { %v2224_v26 = vadd.f32 %v2223_v17, %v2222_v45 }
 0x2bc   : > { %v2122_v56 = vrot.slane %v2121_v14, 2 }
 0x2bd   : > { %v2225_v33 = vrot.slane %v2224_v26, 4 }
 0x2be   : > { %v2123_v9 = vadd.f32 %v2122_v56, %v2121_v14 }
 0x2bf   : > { %v2226_v52 = vadd.f32 %v2225_v33, %v2224_v26 }
 0x2c0   : > { %v2124_v16 = vrot.slane %v2123_v9, 1 }
 0x2c1   : > { %v2227_v63 = vrot.slane %v2226_v52, 2 }
 0x2c2   : > { %v2125_v36 = vadd.f32 %v2124_v16, %v2123_v9 }
 0x2c3   : > { %v2228_v23 = vadd.f32 %v2227_v63, %v2226_v52 }
 0x2c4   : > { %v2126_v43 = vadd.f32 %v2125_v36, %v2056_v0 }
 0x2c5   : > { %v2229_v31 = vrot.slane %v2228_v23, 1 }
 0x2c6   : > { %2128 = vst.msk [vmem:[%s5059_s5] sm:$0x1] %vm2127_vm14, %v2126_v43 }
 0x2c7   : > { %v2230_v1 = vadd.f32 %v2229_v31, %v2228_v23 }
 0x2c9   : > { %v2231_v51 = vadd.f32 %v2230_v1, %v2129_v13 }
 0x2cb   : > { %2232 = vst.msk [vmem:[%s5060_s6] sm:$0x1] %vm2127_vm14, %v2231_v51 }
 0x2cc PF: > { %s17_s21 = sadd.s32 1, %s3041_s21  }
 0x2cd   : > { %p14_p5 = scmp.ge.s32.totalorder %s17_s21, 4  }
 0x2cf   :  { %16 = sbr.rel (!%p14_p5) target bundleno = 1 (0x1), region = 86 }

// kernel: bottleneck_forward.7
= control target key start
LH: loop header
LB: loop body
LE: loop exit
PB: predicated region body
PF: predicated region fallthrough
CT: control target
= control target key end

     0   :  { %s413_s15 = smov 0   ;;  %s439_s0 = inlined_call_operand.vmem [shape: f32[32,256], index: 0, kind: input, shape index: {}]   ;;  %s440_s1 = inlined_call_operand.vmem [shape: f32[1,256], index: 1, kind: input, shape index: {}]   ;;  %s441_s2 = inlined_call_operand.vmem [shape: f32[1,256], index: 2, kind: input, shape index: {}]   ;;  %s442_s3 = inlined_call_operand.vmem [shape: f32[32,256], index: 3, kind: input, shape index: {}]   ;;  %s443_s4 = inlined_call_operand.vmem [shape: f32[32,256], index: 4, kind: output, shape index: {}]  }
   0x1 LB: > { %s353_s16 = sadd.s32 4294967295, %s386_s15   ;;  %p357_p0 = scmp.ge.s32.totalorder %s386_s15, 1  ;;  %s386_s15 = sphi %s413_s15, %s14_s15  }
   0x2   : > { %p176_p1 = scmp.lt.s32.totalorder %s386_s15, 3 }
   0x4   : > { %p177_p2 = pnand %p357_p0, %p176_p1 }
   0x5   : > { %s358_s17 = sshll.u32 (!%p177_p2), %s353_s16, 1 }
   0x6   : > { %180 = sbr.rel (%p177_p2) target bundleno = 29 (0x1d), region = 36  ;;  %p211_p3 = scmp.lt.s32.totalorder (!%p177_p2), %s358_s17, 3 }
   0xb   : > { %v237_v0 = vlaneseq  ;;  %s445_s17 = smov (!%p211_p3, %s358_s17), 3  ;;  %v235_v2 = vld [vmem:[%s440_s1] sm:$0x3] }
   0xc   : > { %v251_v3 = vld [vmem:[%s441_s2] sm:$0x3]  ;;  %s369_s22 = sshll.u32 %s445_s17, 4 }
   0xd   : > { %v238_v1 = vshrl.u32 %v237_v0, 7  ;;  %s215_s25 = scalar_lea.vmem %s439_s0, %s369_s22  ;;  %s222_s28 = scalar_lea.vmem %s442_s3, %s369_s22 }
   0xe   : > { %v231_v10 = vld [vmem:[%s215_s25] sm:$0xff]  ;;  %v232_v11 = vld [vmem:[%s215_s25 + $0x8] sm:$0xff]  ;;  %v233_v14 = vld [vmem:[%s215_s25 + $0x10] sm:$0xff]  ;;  %s229_s5 = scalar_lea.vmem %s443_s4, %s369_s22 }
   0xf   : > { %v239_v4 = vsub.s32 0, %v238_v1  ;;  %v243_v5 = vsub.s32 1, %v238_v1  ;;  %v267_v15 = vld [vmem:[%s222_s28] sm:$0xff]  ;;  %v268_v16 = vld [vmem:[%s222_s28 + $0x8] sm:$0xff]  ;;  %v234_v18 = vld [vmem:[%s215_s25 + $0x18] sm:$0xff] }
  0x10   : > { %v269_v21 = vld [vmem:[%s222_s28 + $0x10] sm:$0xff]  ;;  %v270_v24 = vld [vmem:[%s222_s28 + $0x18] sm:$0xff] }
  0x11   : > { %v240_v6 = vrot.slane %v235_v2, %v239_v4  ;;  %v256_v7 = vrot.slane %v251_v3, %v239_v4  ;;  %v244_v8 = vrot.slane %v235_v2, %v243_v5  ;;  %v260_v9 = vrot.slane %v251_v3, %v243_v5 }
  0x13   : > { %v247_v12 = vmul.f32 %v240_v6, %v231_v10  ;;  %v248_v13 = vmul.f32 %v244_v8, %v232_v11  ;;  %v249_v17 = vmul.f32 %v240_v6, %v233_v14  ;;  %v250_v22 = vmul.f32 %v244_v8, %v234_v18 }
  0x15   : > { %v263_v19 = vadd.f32 %v256_v7, %v247_v12  ;;  %v264_v20 = vadd.f32 %v260_v9, %v248_v13  ;;  %v265_v23 = vadd.f32 %v256_v7, %v249_v17  ;;  %v266_v27 = vadd.f32 %v260_v9, %v250_v22 }
  0x17   : > { %v271_v25 = vadd.f32 %v267_v15, %v263_v19  ;;  %v272_v26 = vadd.f32 %v268_v16, %v264_v20  ;;  %v273_v28 = vadd.f32 %v269_v21, %v265_v23  ;;  %v274_v31 = vadd.f32 %v270_v24, %v266_v27 }
  0x19   : > { %v275_v29 = vmax.f32 %v271_v25, 0.0  ;;  %v276_v30 = vmax.f32 %v272_v26, 0.0  ;;  %v277_v32 = vmax.f32 %v273_v28, 0.0  ;;  %v278_v33 = vmax.f32 %v274_v31, 0.0 }
  0x1b   : > { %279 = vst [vmem:[%s229_s5] sm:$0xff] %v275_v29  ;;  %280 = vst [vmem:[%s229_s5 + $0x8] sm:$0xff] %v276_v30 }
  0x1c   : > { %281 = vst [vmem:[%s229_s5 + $0x10] sm:$0xff] %v277_v32  ;;  %282 = vst [vmem:[%s229_s5 + $0x18] sm:$0xff] %v278_v33 }
  0x1d PF: > { %s14_s15 = sadd.s32 1, %s386_s15  }
  0x1e   : > { %p11_p4 = scmp.ge.s32.totalorder %s14_s15, 4  }
  0x20   :  { %13 = sbr.rel (!%p11_p4) target bundleno = 1 (0x1), region = 69 }

</bundles_post_ra>
